<compile_context>
chip_gen: v7x
topology: tpu7x:2x2x1
jax: 0.10.0
libtpu: 0.0.40
codegen_flags: <defaults>
</compile_context>

<pallas_src>
import numpy as np
import jax
import jax.numpy as jnp
from jax.experimental import pallas as pl
from jax.experimental.pallas import tpu as pltpu

_EPS = 1e-5  # BatchNorm1d eps (PyTorch default)
_PAD = 8     # sublane-aligned front pad for the staging buffer


def make_fused_kernel(B, L):
    """Fused kernel for ResBlock(stride=1) + 3x ResBlock(stride=2)."""
    Ls = [L, L // 2, L // 4, L // 8]      # per-block output lengths
    Rs = [B * l for l in Ls]              # per-block output row counts

    def kernel(xpad_ref,
               w1_0, w2_0, wr_0, bn_0,
               w1_1, w2_1, wr_1, bn_1,
               w1_2, w2_2, wr_2, bn_2,
               w1_3, w2_3, wr_3, bn_3,
               out_ref, stage):

        def bn_apply(h, bn_ref, which):
            # training-mode BatchNorm1d: per-channel stats over all rows
            # (batch x length), biased variance, applied as h*scale + shift.
            g = bn_ref[pl.ds(2 * which, 1), :]        # (1, C) gamma
            be = bn_ref[pl.ds(2 * which + 1, 1), :]   # (1, C) beta
            inv_n = 1.0 / h.shape[0]
            mean = jnp.sum(h, axis=0, keepdims=True) * inv_n
            ex2 = jnp.sum(h * h, axis=0, keepdims=True) * inv_n
            var = ex2 - mean * mean                   # biased variance
            scale = g * jax.lax.rsqrt(var + _EPS)
            shift = be - mean * scale
            return h * scale + shift

        def masks(R, Lb):
            pos = jax.lax.broadcasted_iota(jnp.int32, (R, 1), 0) % Lb
            return pos == 0, pos == (Lb - 1)

        def res_block(t_l, t_m, t_r, w1, w2, wr, bnp, first, last):
            # conv1 (k=3; conv bias is a no-op before training-mode BN)
            h = (jnp.dot(t_l, w1[0], preferred_element_type=jnp.float32)
                 + jnp.dot(t_m, w1[1], preferred_element_type=jnp.float32)
                 + jnp.dot(t_r, w1[2], preferred_element_type=jnp.float32))
            h = jnp.maximum(bn_apply(h, bnp, 0), 0.0)

            R = h.shape[0]
            # Stage h in the shared row-padded scratch so conv2's +/-1 taps are
            # plain contiguous loads; rows crossing a sequence boundary are
            # masked to zero (stale / uninitialized rows never used).
            stage[pl.ds(_PAD, R), :] = h
            h_m1 = jnp.where(first, 0.0, stage[pl.ds(_PAD - 1, R), :])
            h_p1 = jnp.where(last, 0.0, stage[pl.ds(_PAD + 1, R), :])
            y = (jnp.dot(h_m1, w2[0], preferred_element_type=jnp.float32)
                 + jnp.dot(h,    w2[1], preferred_element_type=jnp.float32)
                 + jnp.dot(h_p1, w2[2], preferred_element_type=jnp.float32))
            y = bn_apply(y, bnp, 1)

            # residual: 1x1 conv (stride already applied via tap selection) + BN
            res = bn_apply(
                jnp.dot(t_m, wr[...], preferred_element_type=jnp.float32),
                bnp, 2)
            return jnp.maximum(y + res, 0.0)

        # ---- block 0: stride 1, Cin -> H; taps from the zero-padded input ----
        R0 = Rs[0]
        f0, l0 = masks(R0, Ls[0])
        t_m = xpad_ref[pl.ds(_PAD, R0), :]
        t_l = jnp.where(f0, 0.0, xpad_ref[pl.ds(_PAD - 1, R0), :])
        t_r = jnp.where(l0, 0.0, xpad_ref[pl.ds(_PAD + 1, R0), :])
        y = res_block(t_l, t_m, t_r, w1_0, w2_0, wr_0, bn_0, f0, l0)
        stage[pl.ds(_PAD, R0), :] = y

        # ---- blocks 1..3: stride 2, H -> H; taps are stride-2 reads of the
        # previous block's output staged in `stage` (output row r uses input
        # rows 2r-1, 2r, 2r+1; 2r+1 never crosses a sequence boundary).
        # The strided tap loads materialize BEFORE res_block overwrites the
        # shared scratch with this block's conv1 output, so one buffer
        # suffices for the whole chain. ----
        blk_params = [(w1_1, w2_1, wr_1, bn_1),
                      (w1_2, w2_2, wr_2, bn_2),
                      (w1_3, w2_3, wr_3, bn_3)]
        for i, (w1, w2, wr, bnp) in zip((1, 2, 3), blk_params):
            R, Lb = Rs[i], Ls[i]
            fi, li = masks(R, Lb)
            t_m = stage[pl.ds(_PAD, R, 2), :]                          # x[2r]
            t_l = jnp.where(fi, 0.0, stage[pl.ds(_PAD - 1, R, 2), :])  # x[2r-1]
            t_r = stage[pl.ds(_PAD + 1, R, 2), :]                      # x[2r+1]
            y = res_block(t_l, t_m, t_r, w1, w2, wr, bnp, fi, li)
            if i < 3:
                stage[pl.ds(_PAD, R), :] = y
            else:
                out_ref[...] = y

    return kernel


def baseline_v2(x_ncl, params):
    """x_ncl: (B, C_in, L) like PyTorch.  Returns (B, hidden, L // 8)."""
    B, cin, L = x_ncl.shape
    assert L % 8 == 0, "fused kernel assumes seq_len divisible by 8"
    hid = params[0]["w1"].shape[-1]
    R0 = B * L
    Lf = L // 8

    # Boundary glue only: NCL -> flattened (rows, C) + zero row padding.
    x = jnp.transpose(x_ncl, (0, 2, 1)).reshape(R0, cin)
    xpad = jnp.pad(x, ((_PAD, _PAD), (0, 0)))

    vmem = pl.BlockSpec(memory_space=pltpu.MemorySpace.VMEM)
    args = [xpad]
    for p in params:
        args += [p["w1"], p["w2"], p["wr"], p["bn"]]

    out = pl.pallas_call(
        make_fused_kernel(B, L),
        out_shape=jax.ShapeDtypeStruct((B * Lf, hid), jnp.float32),
        in_specs=[vmem] * len(args),
        out_specs=vmem,
        scratch_shapes=[pltpu.VMEM((R0 + 2 * _PAD, hid), jnp.float32)],  # stage
        compiler_params=pltpu.CompilerParams(vmem_limit_bytes=48 * 1024 * 1024),
    )(*args)
    return jnp.transpose(out.reshape(B, Lf, hid), (0, 2, 1))


def init_block_params(key, cin, cout):
    ks = jax.random.split(key, 9)

    def conv_w(k, kw, ci, co):
        s = 1.0 / np.sqrt(ci * kw)
        return jax.random.uniform(k, (kw, ci, co), jnp.float32, -s, s)

    gam = lambda k: 1.0 + 0.1 * jax.random.normal(k, (cout,), jnp.float32)
    bet = lambda k: 0.1 * jax.random.normal(k, (cout,), jnp.float32)
    # Conv biases are omitted: they are exactly cancelled by training-mode BN.
    bn = jnp.stack([gam(ks[3]), bet(ks[4]),     # bn1 gamma/beta
                    gam(ks[5]), bet(ks[6]),     # bn2 gamma/beta
                    gam(ks[7]), bet(ks[8])])    # res_norm gamma/beta
    return dict(
        w1=conv_w(ks[0], 3, cin, cout),     # (3, Cin, Cout)
        w2=conv_w(ks[1], 3, cout, cout),    # (3, Cout, Cout)
        wr=conv_w(ks[2], 1, cin, cout)[0],  # (Cin, Cout)
        bn=bn,                              # (6, Cout)
    )


def init_params(key, in_channels, hidden_dim):
    assert in_channels != hidden_dim, "block 0 assumes a conv residual path"
    ks = jax.random.split(key, 4)
    dims = [(in_channels, hidden_dim)] + [(hidden_dim, hidden_dim)] * 3
    return [init_block_params(k, ci, co) for k, (ci, co) in zip(ks, dims)]


if __name__ == "__main__":
    key = jax.random.PRNGKey(0)
    kx, kp = jax.random.split(key)

    # small shapes consistent with the module: (batch, in_channels, seq_len)
    B, C_in, L, hidden = 2, 8, 16, 32
    x = jax.random.normal(kx, (B, C_in, L), jnp.float32)
    params = init_params(kp, C_in, hidden)

    out = jax.jit(lambda xx: baseline_v2(xx, params))(x)
    out = jax.block_until_ready(out)
    assert out.shape == (B, hidden, L // 8), out.shape
    assert bool(jnp.all(jnp.isfinite(out)))
    print("KERNEL_OK")
</pallas_src>

<mosaic_0001>
module attributes {stable_mosaic.version = 11 : i64} {
  func.func @kernel(%arg0: memref<48x8xf32, #tpu.memory_space<vmem>>, %arg1: memref<3x8x32xf32, #tpu.memory_space<vmem>>, %arg2: memref<3x32x32xf32, #tpu.memory_space<vmem>>, %arg3: memref<8x32xf32, #tpu.memory_space<vmem>>, %arg4: memref<6x32xf32, #tpu.memory_space<vmem>>, %arg5: memref<3x32x32xf32, #tpu.memory_space<vmem>>, %arg6: memref<3x32x32xf32, #tpu.memory_space<vmem>>, %arg7: memref<32x32xf32, #tpu.memory_space<vmem>>, %arg8: memref<6x32xf32, #tpu.memory_space<vmem>>, %arg9: memref<3x32x32xf32, #tpu.memory_space<vmem>>, %arg10: memref<3x32x32xf32, #tpu.memory_space<vmem>>, %arg11: memref<32x32xf32, #tpu.memory_space<vmem>>, %arg12: memref<6x32xf32, #tpu.memory_space<vmem>>, %arg13: memref<3x32x32xf32, #tpu.memory_space<vmem>>, %arg14: memref<3x32x32xf32, #tpu.memory_space<vmem>>, %arg15: memref<32x32xf32, #tpu.memory_space<vmem>>, %arg16: memref<6x32xf32, #tpu.memory_space<vmem>>, %arg17: memref<4x32xf32, #tpu.memory_space<vmem>>, %arg18: memref<48x32xf32, #tpu.memory_space<vmem>>) attributes {dimension_semantics = [], scalar_prefetch = 0 : i64, scratch_operands = 1 : i64, tpu.core_type = #tpu.core_type<tc>} {
    %0 = tpu.iota {dimensions = array<i32: 0>} : vector<32x1xi32>
    %c16_i32 = arith.constant 16 : i32
    %c0_i32 = arith.constant 0 : i32
    %1 = arith.cmpi eq, %c16_i32, %c0_i32 : i32
    %c1_i32 = arith.constant 1 : i32
    %2 = arith.select %1, %c1_i32, %c16_i32 : i32
    %3 = vector.broadcast %2 : i32 to vector<32x1xi32>
    %4 = arith.remsi %0, %3 : vector<32x1xi32>
    %c0_i32_0 = arith.constant 0 : i32
    %5 = vector.broadcast %c0_i32_0 : i32 to vector<32x1xi32>
    %6 = arith.cmpi ne, %4, %5 : vector<32x1xi32>
    %c0_i32_1 = arith.constant 0 : i32
    %7 = vector.broadcast %c0_i32_1 : i32 to vector<32x1xi32>
    %8 = arith.cmpi slt, %4, %7 : vector<32x1xi32>
    %c0_i32_2 = arith.constant 0 : i32
    %9 = arith.cmpi slt, %2, %c0_i32_2 : i32
    %10 = vector.broadcast %9 : i1 to vector<32x1xi1>
    %11 = vector.broadcast %10 : vector<32x1xi1> to vector<32x1xi1>
    %12 = arith.xori %8, %11 : vector<32x1xi1>
    %13 = arith.andi %12, %6 : vector<32x1xi1>
    %14 = vector.broadcast %2 : i32 to vector<32x1xi32>
    %15 = arith.addi %4, %14 : vector<32x1xi32>
    %16 = arith.select %13, %15, %4 : vector<32x1xi1>, vector<32x1xi32>
    %c0_i32_3 = arith.constant 0 : i32
    %17 = vector.broadcast %c0_i32_3 : i32 to vector<32x1xi32>
    %18 = arith.cmpi eq, %16, %17 : vector<32x1xi32>
    %c15_i32 = arith.constant 15 : i32
    %19 = vector.broadcast %c15_i32 : i32 to vector<32x1xi32>
    %20 = arith.cmpi eq, %16, %19 : vector<32x1xi32>
    %c8 = arith.constant 8 : index
    %c0 = arith.constant 0 : index
    %21 = vector.load %arg0[%c8, %c0] : memref<48x8xf32, #tpu.memory_space<vmem>>, vector<32x8xf32>
    %c7 = arith.constant 7 : index
    %c0_4 = arith.constant 0 : index
    %22 = vector.load %arg0[%c7, %c0_4] : memref<48x8xf32, #tpu.memory_space<vmem>>, vector<32x8xf32>
    %cst = arith.constant 0.000000e+00 : f32
    %23 = vector.shape_cast %18 : vector<32x1xi1> to vector<32x1xi1>
    %24 = vector.broadcast %23 : vector<32x1xi1> to vector<32x8xi1>
    %25 = vector.broadcast %cst : f32 to vector<32x8xf32>
    %26 = arith.select %24, %25, %22 : vector<32x8xi1>, vector<32x8xf32>
    %c9 = arith.constant 9 : index
    %c0_5 = arith.constant 0 : index
    %27 = vector.load %arg0[%c9, %c0_5] : memref<48x8xf32, #tpu.memory_space<vmem>>, vector<32x8xf32>
    %cst_6 = arith.constant 0.000000e+00 : f32
    %28 = vector.shape_cast %20 : vector<32x1xi1> to vector<32x1xi1>
    %29 = vector.broadcast %28 : vector<32x1xi1> to vector<32x8xi1>
    %30 = vector.broadcast %cst_6 : f32 to vector<32x8xf32>
    %31 = arith.select %29, %30, %27 : vector<32x8xi1>, vector<32x8xf32>
    %c0_7 = arith.constant 0 : index
    %c0_8 = arith.constant 0 : index
    %c0_9 = arith.constant 0 : index
    %32 = vector.load %arg1[%c0_7, %c0_8, %c0_9] : memref<3x8x32xf32, #tpu.memory_space<vmem>>, vector<1x8x32xf32>
    %33 = vector.shape_cast %32 : vector<1x8x32xf32> to vector<8x32xf32>
    %cst_10 = arith.constant dense<0.000000e+00> : vector<32x32xf32>
    %34 = tpu.matmul %26, %33, %cst_10 {dimension_numbers = #tpu.dot_dimension_numbers<[1], [0], [0], [1], [0, 0, 1, 1], [], []>} : vector<32x8xf32>, vector<8x32xf32>, vector<32x32xf32> -> vector<32x32xf32>
    %c1 = arith.constant 1 : index
    %c0_11 = arith.constant 0 : index
    %c0_12 = arith.constant 0 : index
    %35 = vector.load %arg1[%c1, %c0_11, %c0_12] : memref<3x8x32xf32, #tpu.memory_space<vmem>>, vector<1x8x32xf32>
    %36 = vector.shape_cast %35 : vector<1x8x32xf32> to vector<8x32xf32>
    %cst_13 = arith.constant dense<0.000000e+00> : vector<32x32xf32>
    %37 = tpu.matmul %21, %36, %cst_13 {dimension_numbers = #tpu.dot_dimension_numbers<[1], [0], [0], [1], [0, 0, 1, 1], [], []>} : vector<32x8xf32>, vector<8x32xf32>, vector<32x32xf32> -> vector<32x32xf32>
    %38 = arith.addf %34, %37 : vector<32x32xf32>
    %c2 = arith.constant 2 : index
    %c0_14 = arith.constant 0 : index
    %c0_15 = arith.constant 0 : index
    %39 = vector.load %arg1[%c2, %c0_14, %c0_15] : memref<3x8x32xf32, #tpu.memory_space<vmem>>, vector<1x8x32xf32>
    %40 = vector.shape_cast %39 : vector<1x8x32xf32> to vector<8x32xf32>
    %cst_16 = arith.constant dense<0.000000e+00> : vector<32x32xf32>
    %41 = tpu.matmul %31, %40, %cst_16 {dimension_numbers = #tpu.dot_dimension_numbers<[1], [0], [0], [1], [0, 0, 1, 1], [], []>} : vector<32x8xf32>, vector<8x32xf32>, vector<32x32xf32> -> vector<32x32xf32>
    %42 = arith.addf %38, %41 : vector<32x32xf32>
    %c0_17 = arith.constant 0 : index
    %c0_18 = arith.constant 0 : index
    %43 = vector.load %arg4[%c0_17, %c0_18] : memref<6x32xf32, #tpu.memory_space<vmem>>, vector<1x32xf32>
    %c1_19 = arith.constant 1 : index
    %c0_20 = arith.constant 0 : index
    %44 = vector.load %arg4[%c1_19, %c0_20] : memref<6x32xf32, #tpu.memory_space<vmem>>, vector<1x32xf32>
    %cst_21 = arith.constant dense<0.000000e+00> : vector<32xf32>
    %45 = vector.multi_reduction <add>, %42, %cst_21 [0] : vector<32x32xf32> to vector<32xf32>
    %46 = vector.shape_cast %45 : vector<32xf32> to vector<1x32xf32>
    %cst_22 = arith.constant 3.125000e-02 : f32
    %47 = vector.broadcast %cst_22 : f32 to vector<1x32xf32>
    %48 = arith.mulf %46, %47 : vector<1x32xf32>
    %49 = arith.mulf %42, %42 : vector<32x32xf32>
    %cst_23 = arith.constant dense<0.000000e+00> : vector<32xf32>
    %50 = vector.multi_reduction <add>, %49, %cst_23 [0] : vector<32x32xf32> to vector<32xf32>
    %51 = vector.shape_cast %50 : vector<32xf32> to vector<1x32xf32>
    %cst_24 = arith.constant 3.125000e-02 : f32
    %52 = vector.broadcast %cst_24 : f32 to vector<1x32xf32>
    %53 = arith.mulf %51, %52 : vector<1x32xf32>
    %54 = arith.mulf %48, %48 : vector<1x32xf32>
    %55 = arith.subf %53, %54 : vector<1x32xf32>
    %cst_25 = arith.constant 9.99999974E-6 : f32
    %56 = vector.broadcast %cst_25 : f32 to vector<1x32xf32>
    %57 = arith.addf %55, %56 : vector<1x32xf32>
    %58 = math.rsqrt %57 : vector<1x32xf32>
    %59 = arith.mulf %43, %58 : vector<1x32xf32>
    %60 = arith.mulf %48, %59 : vector<1x32xf32>
    %61 = arith.subf %44, %60 : vector<1x32xf32>
    %62 = vector.broadcast %59 : vector<1x32xf32> to vector<32x32xf32>
    %63 = arith.mulf %42, %62 : vector<32x32xf32>
    %64 = vector.broadcast %61 : vector<1x32xf32> to vector<32x32xf32>
    %65 = arith.addf %63, %64 : vector<32x32xf32>
    %cst_26 = arith.constant 0.000000e+00 : f32
    %66 = vector.broadcast %cst_26 : f32 to vector<32x32xf32>
    %67 = arith.maximumf %65, %66 : vector<32x32xf32>
    %c8_27 = arith.constant 8 : index
    %c0_28 = arith.constant 0 : index
    %68 = vector.load %arg18[%c8_27, %c0_28] : memref<48x32xf32, #tpu.memory_space<vmem>>, vector<32x32xf32>
    tpu.vector_store %arg18[%c8_27, %c0_28], %67 {strides = array<i32>} : memref<48x32xf32, #tpu.memory_space<vmem>>, vector<32x32xf32>,
    %c7_29 = arith.constant 7 : index
    %c0_30 = arith.constant 0 : index
    %69 = vector.load %arg18[%c7_29, %c0_30] : memref<48x32xf32, #tpu.memory_space<vmem>>, vector<32x32xf32>
    %cst_31 = arith.constant 0.000000e+00 : f32
    %70 = vector.shape_cast %18 : vector<32x1xi1> to vector<32x1xi1>
    %71 = vector.broadcast %70 : vector<32x1xi1> to vector<32x32xi1>
    %72 = vector.broadcast %cst_31 : f32 to vector<32x32xf32>
    %73 = arith.select %71, %72, %69 : vector<32x32xi1>, vector<32x32xf32>
    %c9_32 = arith.constant 9 : index
    %c0_33 = arith.constant 0 : index
    %74 = vector.load %arg18[%c9_32, %c0_33] : memref<48x32xf32, #tpu.memory_space<vmem>>, vector<32x32xf32>
    %cst_34 = arith.constant 0.000000e+00 : f32
    %75 = vector.shape_cast %20 : vector<32x1xi1> to vector<32x1xi1>
    %76 = vector.broadcast %75 : vector<32x1xi1> to vector<32x32xi1>
    %77 = vector.broadcast %cst_34 : f32 to vector<32x32xf32>
    %78 = arith.select %76, %77, %74 : vector<32x32xi1>, vector<32x32xf32>
    %c0_35 = arith.constant 0 : index
    %c0_36 = arith.constant 0 : index
    %c0_37 = arith.constant 0 : index
    %79 = vector.load %arg2[%c0_35, %c0_36, %c0_37] : memref<3x32x32xf32, #tpu.memory_space<vmem>>, vector<1x32x32xf32>
    %80 = vector.shape_cast %79 : vector<1x32x32xf32> to vector<32x32xf32>
    %cst_38 = arith.constant dense<0.000000e+00> : vector<32x32xf32>
    %81 = tpu.matmul %73, %80, %cst_38 {dimension_numbers = #tpu.dot_dimension_numbers<[1], [0], [0], [1], [0, 0, 1, 1], [], []>} : vector<32x32xf32>, vector<32x32xf32>, vector<32x32xf32> -> vector<32x32xf32>
    %c1_39 = arith.constant 1 : index
    %c0_40 = arith.constant 0 : index
    %c0_41 = arith.constant 0 : index
    %82 = vector.load %arg2[%c1_39, %c0_40, %c0_41] : memref<3x32x32xf32, #tpu.memory_space<vmem>>, vector<1x32x32xf32>
    %83 = vector.shape_cast %82 : vector<1x32x32xf32> to vector<32x32xf32>
    %cst_42 = arith.constant dense<0.000000e+00> : vector<32x32xf32>
    %84 = tpu.matmul %67, %83, %cst_42 {dimension_numbers = #tpu.dot_dimension_numbers<[1], [0], [0], [1], [0, 0, 1, 1], [], []>} : vector<32x32xf32>, vector<32x32xf32>, vector<32x32xf32> -> vector<32x32xf32>
    %85 = arith.addf %81, %84 : vector<32x32xf32>
    %c2_43 = arith.constant 2 : index
    %c0_44 = arith.constant 0 : index
    %c0_45 = arith.constant 0 : index
    %86 = vector.load %arg2[%c2_43, %c0_44, %c0_45] : memref<3x32x32xf32, #tpu.memory_space<vmem>>, vector<1x32x32xf32>
    %87 = vector.shape_cast %86 : vector<1x32x32xf32> to vector<32x32xf32>
    %cst_46 = arith.constant dense<0.000000e+00> : vector<32x32xf32>
    %88 = tpu.matmul %78, %87, %cst_46 {dimension_numbers = #tpu.dot_dimension_numbers<[1], [0], [0], [1], [0, 0, 1, 1], [], []>} : vector<32x32xf32>, vector<32x32xf32>, vector<32x32xf32> -> vector<32x32xf32>
    %89 = arith.addf %85, %88 : vector<32x32xf32>
    %c2_47 = arith.constant 2 : index
    %c0_48 = arith.constant 0 : index
    %90 = vector.load %arg4[%c2_47, %c0_48] : memref<6x32xf32, #tpu.memory_space<vmem>>, vector<1x32xf32>
    %c3 = arith.constant 3 : index
    %c0_49 = arith.constant 0 : index
    %91 = vector.load %arg4[%c3, %c0_49] : memref<6x32xf32, #tpu.memory_space<vmem>>, vector<1x32xf32>
    %cst_50 = arith.constant dense<0.000000e+00> : vector<32xf32>
    %92 = vector.multi_reduction <add>, %89, %cst_50 [0] : vector<32x32xf32> to vector<32xf32>
    %93 = vector.shape_cast %92 : vector<32xf32> to vector<1x32xf32>
    %cst_51 = arith.constant 3.125000e-02 : f32
    %94 = vector.broadcast %cst_51 : f32 to vector<1x32xf32>
    %95 = arith.mulf %93, %94 : vector<1x32xf32>
    %96 = arith.mulf %89, %89 : vector<32x32xf32>
    %cst_52 = arith.constant dense<0.000000e+00> : vector<32xf32>
    %97 = vector.multi_reduction <add>, %96, %cst_52 [0] : vector<32x32xf32> to vector<32xf32>
    %98 = vector.shape_cast %97 : vector<32xf32> to vector<1x32xf32>
    %cst_53 = arith.constant 3.125000e-02 : f32
    %99 = vector.broadcast %cst_53 : f32 to vector<1x32xf32>
    %100 = arith.mulf %98, %99 : vector<1x32xf32>
    %101 = arith.mulf %95, %95 : vector<1x32xf32>
    %102 = arith.subf %100, %101 : vector<1x32xf32>
    %cst_54 = arith.constant 9.99999974E-6 : f32
    %103 = vector.broadcast %cst_54 : f32 to vector<1x32xf32>
    %104 = arith.addf %102, %103 : vector<1x32xf32>
    %105 = math.rsqrt %104 : vector<1x32xf32>
    %106 = arith.mulf %90, %105 : vector<1x32xf32>
    %107 = arith.mulf %95, %106 : vector<1x32xf32>
    %108 = arith.subf %91, %107 : vector<1x32xf32>
    %109 = vector.broadcast %106 : vector<1x32xf32> to vector<32x32xf32>
    %110 = arith.mulf %89, %109 : vector<32x32xf32>
    %111 = vector.broadcast %108 : vector<1x32xf32> to vector<32x32xf32>
    %112 = arith.addf %110, %111 : vector<32x32xf32>
    %c0_55 = arith.constant 0 : index
    %c0_56 = arith.constant 0 : index
    %113 = vector.load %arg3[%c0_55, %c0_56] : memref<8x32xf32, #tpu.memory_space<vmem>>, vector<8x32xf32>
    %cst_57 = arith.constant dense<0.000000e+00> : vector<32x32xf32>
    %114 = tpu.matmul %21, %113, %cst_57 {dimension_numbers = #tpu.dot_dimension_numbers<[1], [0], [0], [1], [0, 0, 1, 1], [], []>} : vector<32x8xf32>, vector<8x32xf32>, vector<32x32xf32> -> vector<32x32xf32>
    %c4 = arith.constant 4 : index
    %c0_58 = arith.constant 0 : index
    %115 = vector.load %arg4[%c4, %c0_58] : memref<6x32xf32, #tpu.memory_space<vmem>>, vector<1x32xf32>
    %c5 = arith.constant 5 : index
    %c0_59 = arith.constant 0 : index
    %116 = vector.load %arg4[%c5, %c0_59] : memref<6x32xf32, #tpu.memory_space<vmem>>, vector<1x32xf32>
    %cst_60 = arith.constant dense<0.000000e+00> : vector<32xf32>
    %117 = vector.multi_reduction <add>, %114, %cst_60 [0] : vector<32x32xf32> to vector<32xf32>
    %118 = vector.shape_cast %117 : vector<32xf32> to vector<1x32xf32>
    %cst_61 = arith.constant 3.125000e-02 : f32
    %119 = vector.broadcast %cst_61 : f32 to vector<1x32xf32>
    %120 = arith.mulf %118, %119 : vector<1x32xf32>
    %121 = arith.mulf %114, %114 : vector<32x32xf32>
    %cst_62 = arith.constant dense<0.000000e+00> : vector<32xf32>
    %122 = vector.multi_reduction <add>, %121, %cst_62 [0] : vector<32x32xf32> to vector<32xf32>
    %123 = vector.shape_cast %122 : vector<32xf32> to vector<1x32xf32>
    %cst_63 = arith.constant 3.125000e-02 : f32
    %124 = vector.broadcast %cst_63 : f32 to vector<1x32xf32>
    %125 = arith.mulf %123, %124 : vector<1x32xf32>
    %126 = arith.mulf %120, %120 : vector<1x32xf32>
    %127 = arith.subf %125, %126 : vector<1x32xf32>
    %cst_64 = arith.constant 9.99999974E-6 : f32
    %128 = vector.broadcast %cst_64 : f32 to vector<1x32xf32>
    %129 = arith.addf %127, %128 : vector<1x32xf32>
    %130 = math.rsqrt %129 : vector<1x32xf32>
    %131 = arith.mulf %115, %130 : vector<1x32xf32>
    %132 = arith.mulf %120, %131 : vector<1x32xf32>
    %133 = arith.subf %116, %132 : vector<1x32xf32>
    %134 = vector.broadcast %131 : vector<1x32xf32> to vector<32x32xf32>
    %135 = arith.mulf %114, %134 : vector<32x32xf32>
    %136 = vector.broadcast %133 : vector<1x32xf32> to vector<32x32xf32>
    %137 = arith.addf %135, %136 : vector<32x32xf32>
    %138 = arith.addf %112, %137 : vector<32x32xf32>
    %cst_65 = arith.constant 0.000000e+00 : f32
    %139 = vector.broadcast %cst_65 : f32 to vector<32x32xf32>
    %140 = arith.maximumf %138, %139 : vector<32x32xf32>
    %c8_66 = arith.constant 8 : index
    %c0_67 = arith.constant 0 : index
    %141 = vector.load %arg18[%c8_66, %c0_67] : memref<48x32xf32, #tpu.memory_space<vmem>>, vector<32x32xf32>
    tpu.vector_store %arg18[%c8_66, %c0_67], %140 {strides = array<i32>} : memref<48x32xf32, #tpu.memory_space<vmem>>, vector<32x32xf32>,
    %142 = tpu.iota {dimensions = array<i32: 0>} : vector<16x1xi32>
    %c8_i32 = arith.constant 8 : i32
    %c0_i32_68 = arith.constant 0 : i32
    %143 = arith.cmpi eq, %c8_i32, %c0_i32_68 : i32
    %c1_i32_69 = arith.constant 1 : i32
    %144 = arith.select %143, %c1_i32_69, %c8_i32 : i32
    %145 = vector.broadcast %144 : i32 to vector<16x1xi32>
    %146 = arith.remsi %142, %145 : vector<16x1xi32>
    %c0_i32_70 = arith.constant 0 : i32
    %147 = vector.broadcast %c0_i32_70 : i32 to vector<16x1xi32>
    %148 = arith.cmpi ne, %146, %147 : vector<16x1xi32>
    %c0_i32_71 = arith.constant 0 : i32
    %149 = vector.broadcast %c0_i32_71 : i32 to vector<16x1xi32>
    %150 = arith.cmpi slt, %146, %149 : vector<16x1xi32>
    %c0_i32_72 = arith.constant 0 : i32
    %151 = arith.cmpi slt, %144, %c0_i32_72 : i32
    %152 = vector.broadcast %151 : i1 to vector<16x1xi1>
    %153 = vector.broadcast %152 : vector<16x1xi1> to vector<16x1xi1>
    %154 = arith.xori %150, %153 : vector<16x1xi1>
    %155 = arith.andi %154, %148 : vector<16x1xi1>
    %156 = vector.broadcast %144 : i32 to vector<16x1xi32>
    %157 = arith.addi %146, %156 : vector<16x1xi32>
    %158 = arith.select %155, %157, %146 : vector<16x1xi1>, vector<16x1xi32>
    %c0_i32_73 = arith.constant 0 : i32
    %159 = vector.broadcast %c0_i32_73 : i32 to vector<16x1xi32>
    %160 = arith.cmpi eq, %158, %159 : vector<16x1xi32>
    %c7_i32 = arith.constant 7 : i32
    %161 = vector.broadcast %c7_i32 : i32 to vector<16x1xi32>
    %162 = arith.cmpi eq, %158, %161 : vector<16x1xi32>
    %c8_74 = arith.constant 8 : index
    %c0_75 = arith.constant 0 : index
    %163 = tpu.strided_load %arg18[%c8_74, %c0_75] {strides = array<i32: 2, 1>} : memref<48x32xf32, #tpu.memory_space<vmem>>, vector<16x32xf32>
    %c7_76 = arith.constant 7 : index
    %c0_77 = arith.constant 0 : index
    %164 = tpu.strided_load %arg18[%c7_76, %c0_77] {strides = array<i32: 2, 1>} : memref<48x32xf32, #tpu.memory_space<vmem>>, vector<16x32xf32>
    %cst_78 = arith.constant 0.000000e+00 : f32
    %165 = vector.shape_cast %160 : vector<16x1xi1> to vector<16x1xi1>
    %166 = vector.broadcast %165 : vector<16x1xi1> to vector<16x32xi1>
    %167 = vector.broadcast %cst_78 : f32 to vector<16x32xf32>
    %168 = arith.select %166, %167, %164 : vector<16x32xi1>, vector<16x32xf32>
    %c9_79 = arith.constant 9 : index
    %c0_80 = arith.constant 0 : index
    %169 = tpu.strided_load %arg18[%c9_79, %c0_80] {strides = array<i32: 2, 1>} : memref<48x32xf32, #tpu.memory_space<vmem>>, vector<16x32xf32>
    %c0_81 = arith.constant 0 : index
    %c0_82 = arith.constant 0 : index
    %c0_83 = arith.constant 0 : index
    %170 = vector.load %arg5[%c0_81, %c0_82, %c0_83] : memref<3x32x32xf32, #tpu.memory_space<vmem>>, vector<1x32x32xf32>
    %171 = vector.shape_cast %170 : vector<1x32x32xf32> to vector<32x32xf32>
    %cst_84 = arith.constant dense<0.000000e+00> : vector<16x32xf32>
    %172 = tpu.matmul %168, %171, %cst_84 {dimension_numbers = #tpu.dot_dimension_numbers<[1], [0], [0], [1], [0, 0, 1, 1], [], []>} : vector<16x32xf32>, vector<32x32xf32>, vector<16x32xf32> -> vector<16x32xf32>
    %c1_85 = arith.constant 1 : index
    %c0_86 = arith.constant 0 : index
    %c0_87 = arith.constant 0 : index
    %173 = vector.load %arg5[%c1_85, %c0_86, %c0_87] : memref<3x32x32xf32, #tpu.memory_space<vmem>>, vector<1x32x32xf32>
    %174 = vector.shape_cast %173 : vector<1x32x32xf32> to vector<32x32xf32>
    %cst_88 = arith.constant dense<0.000000e+00> : vector<16x32xf32>
    %175 = tpu.matmul %163, %174, %cst_88 {dimension_numbers = #tpu.dot_dimension_numbers<[1], [0], [0], [1], [0, 0, 1, 1], [], []>} : vector<16x32xf32>, vector<32x32xf32>, vector<16x32xf32> -> vector<16x32xf32>
    %176 = arith.addf %172, %175 : vector<16x32xf32>
    %c2_89 = arith.constant 2 : index
    %c0_90 = arith.constant 0 : index
    %c0_91 = arith.constant 0 : index
    %177 = vector.load %arg5[%c2_89, %c0_90, %c0_91] : memref<3x32x32xf32, #tpu.memory_space<vmem>>, vector<1x32x32xf32>
    %178 = vector.shape_cast %177 : vector<1x32x32xf32> to vector<32x32xf32>
    %cst_92 = arith.constant dense<0.000000e+00> : vector<16x32xf32>
    %179 = tpu.matmul %169, %178, %cst_92 {dimension_numbers = #tpu.dot_dimension_numbers<[1], [0], [0], [1], [0, 0, 1, 1], [], []>} : vector<16x32xf32>, vector<32x32xf32>, vector<16x32xf32> -> vector<16x32xf32>
    %180 = arith.addf %176, %179 : vector<16x32xf32>
    %c0_93 = arith.constant 0 : index
    %c0_94 = arith.constant 0 : index
    %181 = vector.load %arg8[%c0_93, %c0_94] : memref<6x32xf32, #tpu.memory_space<vmem>>, vector<1x32xf32>
    %c1_95 = arith.constant 1 : index
    %c0_96 = arith.constant 0 : index
    %182 = vector.load %arg8[%c1_95, %c0_96] : memref<6x32xf32, #tpu.memory_space<vmem>>, vector<1x32xf32>
    %cst_97 = arith.constant dense<0.000000e+00> : vector<32xf32>
    %183 = vector.multi_reduction <add>, %180, %cst_97 [0] : vector<16x32xf32> to vector<32xf32>
    %184 = vector.shape_cast %183 : vector<32xf32> to vector<1x32xf32>
    %cst_98 = arith.constant 6.250000e-02 : f32
    %185 = vector.broadcast %cst_98 : f32 to vector<1x32xf32>
    %186 = arith.mulf %184, %185 : vector<1x32xf32>
    %187 = arith.mulf %180, %180 : vector<16x32xf32>
    %cst_99 = arith.constant dense<0.000000e+00> : vector<32xf32>
    %188 = vector.multi_reduction <add>, %187, %cst_99 [0] : vector<16x32xf32> to vector<32xf32>
    %189 = vector.shape_cast %188 : vector<32xf32> to vector<1x32xf32>
    %cst_100 = arith.constant 6.250000e-02 : f32
    %190 = vector.broadcast %cst_100 : f32 to vector<1x32xf32>
    %191 = arith.mulf %189, %190 : vector<1x32xf32>
    %192 = arith.mulf %186, %186 : vector<1x32xf32>
    %193 = arith.subf %191, %192 : vector<1x32xf32>
    %cst_101 = arith.constant 9.99999974E-6 : f32
    %194 = vector.broadcast %cst_101 : f32 to vector<1x32xf32>
    %195 = arith.addf %193, %194 : vector<1x32xf32>
    %196 = math.rsqrt %195 : vector<1x32xf32>
    %197 = arith.mulf %181, %196 : vector<1x32xf32>
    %198 = arith.mulf %186, %197 : vector<1x32xf32>
    %199 = arith.subf %182, %198 : vector<1x32xf32>
    %200 = vector.broadcast %197 : vector<1x32xf32> to vector<16x32xf32>
    %201 = arith.mulf %180, %200 : vector<16x32xf32>
    %202 = vector.broadcast %199 : vector<1x32xf32> to vector<16x32xf32>
    %203 = arith.addf %201, %202 : vector<16x32xf32>
    %cst_102 = arith.constant 0.000000e+00 : f32
    %204 = vector.broadcast %cst_102 : f32 to vector<16x32xf32>
    %205 = arith.maximumf %203, %204 : vector<16x32xf32>
    %c8_103 = arith.constant 8 : index
    %c0_104 = arith.constant 0 : index
    %206 = vector.load %arg18[%c8_103, %c0_104] : memref<48x32xf32, #tpu.memory_space<vmem>>, vector<16x32xf32>
    tpu.vector_store %arg18[%c8_103, %c0_104], %205 {strides = array<i32>} : memref<48x32xf32, #tpu.memory_space<vmem>>, vector<16x32xf32>,
    %c7_105 = arith.constant 7 : index
    %c0_106 = arith.constant 0 : index
    %207 = vector.load %arg18[%c7_105, %c0_106] : memref<48x32xf32, #tpu.memory_space<vmem>>, vector<16x32xf32>
    %cst_107 = arith.constant 0.000000e+00 : f32
    %208 = vector.shape_cast %160 : vector<16x1xi1> to vector<16x1xi1>
    %209 = vector.broadcast %208 : vector<16x1xi1> to vector<16x32xi1>
    %210 = vector.broadcast %cst_107 : f32 to vector<16x32xf32>
    %211 = arith.select %209, %210, %207 : vector<16x32xi1>, vector<16x32xf32>
    %c9_108 = arith.constant 9 : index
    %c0_109 = arith.constant 0 : index
    %212 = vector.load %arg18[%c9_108, %c0_109] : memref<48x32xf32, #tpu.memory_space<vmem>>, vector<16x32xf32>
    %cst_110 = arith.constant 0.000000e+00 : f32
    %213 = vector.shape_cast %162 : vector<16x1xi1> to vector<16x1xi1>
    %214 = vector.broadcast %213 : vector<16x1xi1> to vector<16x32xi1>
    %215 = vector.broadcast %cst_110 : f32 to vector<16x32xf32>
    %216 = arith.select %214, %215, %212 : vector<16x32xi1>, vector<16x32xf32>
    %c0_111 = arith.constant 0 : index
    %c0_112 = arith.constant 0 : index
    %c0_113 = arith.constant 0 : index
    %217 = vector.load %arg6[%c0_111, %c0_112, %c0_113] : memref<3x32x32xf32, #tpu.memory_space<vmem>>, vector<1x32x32xf32>
    %218 = vector.shape_cast %217 : vector<1x32x32xf32> to vector<32x32xf32>
    %cst_114 = arith.constant dense<0.000000e+00> : vector<16x32xf32>
    %219 = tpu.matmul %211, %218, %cst_114 {dimension_numbers = #tpu.dot_dimension_numbers<[1], [0], [0], [1], [0, 0, 1, 1], [], []>} : vector<16x32xf32>, vector<32x32xf32>, vector<16x32xf32> -> vector<16x32xf32>
    %c1_115 = arith.constant 1 : index
    %c0_116 = arith.constant 0 : index
    %c0_117 = arith.constant 0 : index
    %220 = vector.load %arg6[%c1_115, %c0_116, %c0_117] : memref<3x32x32xf32, #tpu.memory_space<vmem>>, vector<1x32x32xf32>
    %221 = vector.shape_cast %220 : vector<1x32x32xf32> to vector<32x32xf32>
    %cst_118 = arith.constant dense<0.000000e+00> : vector<16x32xf32>
    %222 = tpu.matmul %205, %221, %cst_118 {dimension_numbers = #tpu.dot_dimension_numbers<[1], [0], [0], [1], [0, 0, 1, 1], [], []>} : vector<16x32xf32>, vector<32x32xf32>, vector<16x32xf32> -> vector<16x32xf32>
    %223 = arith.addf %219, %222 : vector<16x32xf32>
    %c2_119 = arith.constant 2 : index
    %c0_120 = arith.constant 0 : index
    %c0_121 = arith.constant 0 : index
    %224 = vector.load %arg6[%c2_119, %c0_120, %c0_121] : memref<3x32x32xf32, #tpu.memory_space<vmem>>, vector<1x32x32xf32>
    %225 = vector.shape_cast %224 : vector<1x32x32xf32> to vector<32x32xf32>
    %cst_122 = arith.constant dense<0.000000e+00> : vector<16x32xf32>
    %226 = tpu.matmul %216, %225, %cst_122 {dimension_numbers = #tpu.dot_dimension_numbers<[1], [0], [0], [1], [0, 0, 1, 1], [], []>} : vector<16x32xf32>, vector<32x32xf32>, vector<16x32xf32> -> vector<16x32xf32>
    %227 = arith.addf %223, %226 : vector<16x32xf32>
    %c2_123 = arith.constant 2 : index
    %c0_124 = arith.constant 0 : index
    %228 = vector.load %arg8[%c2_123, %c0_124] : memref<6x32xf32, #tpu.memory_space<vmem>>, vector<1x32xf32>
    %c3_125 = arith.constant 3 : index
    %c0_126 = arith.constant 0 : index
    %229 = vector.load %arg8[%c3_125, %c0_126] : memref<6x32xf32, #tpu.memory_space<vmem>>, vector<1x32xf32>
    %cst_127 = arith.constant dense<0.000000e+00> : vector<32xf32>
    %230 = vector.multi_reduction <add>, %227, %cst_127 [0] : vector<16x32xf32> to vector<32xf32>
    %231 = vector.shape_cast %230 : vector<32xf32> to vector<1x32xf32>
    %cst_128 = arith.constant 6.250000e-02 : f32
    %232 = vector.broadcast %cst_128 : f32 to vector<1x32xf32>
    %233 = arith.mulf %231, %232 : vector<1x32xf32>
    %234 = arith.mulf %227, %227 : vector<16x32xf32>
    %cst_129 = arith.constant dense<0.000000e+00> : vector<32xf32>
    %235 = vector.multi_reduction <add>, %234, %cst_129 [0] : vector<16x32xf32> to vector<32xf32>
    %236 = vector.shape_cast %235 : vector<32xf32> to vector<1x32xf32>
    %cst_130 = arith.constant 6.250000e-02 : f32
    %237 = vector.broadcast %cst_130 : f32 to vector<1x32xf32>
    %238 = arith.mulf %236, %237 : vector<1x32xf32>
    %239 = arith.mulf %233, %233 : vector<1x32xf32>
    %240 = arith.subf %238, %239 : vector<1x32xf32>
    %cst_131 = arith.constant 9.99999974E-6 : f32
    %241 = vector.broadcast %cst_131 : f32 to vector<1x32xf32>
    %242 = arith.addf %240, %241 : vector<1x32xf32>
    %243 = math.rsqrt %242 : vector<1x32xf32>
    %244 = arith.mulf %228, %243 : vector<1x32xf32>
    %245 = arith.mulf %233, %244 : vector<1x32xf32>
    %246 = arith.subf %229, %245 : vector<1x32xf32>
    %247 = vector.broadcast %244 : vector<1x32xf32> to vector<16x32xf32>
    %248 = arith.mulf %227, %247 : vector<16x32xf32>
    %249 = vector.broadcast %246 : vector<1x32xf32> to vector<16x32xf32>
    %250 = arith.addf %248, %249 : vector<16x32xf32>
    %c0_132 = arith.constant 0 : index
    %c0_133 = arith.constant 0 : index
    %251 = vector.load %arg7[%c0_132, %c0_133] : memref<32x32xf32, #tpu.memory_space<vmem>>, vector<32x32xf32>
    %cst_134 = arith.constant dense<0.000000e+00> : vector<16x32xf32>
    %252 = tpu.matmul %163, %251, %cst_134 {dimension_numbers = #tpu.dot_dimension_numbers<[1], [0], [0], [1], [0, 0, 1, 1], [], []>} : vector<16x32xf32>, vector<32x32xf32>, vector<16x32xf32> -> vector<16x32xf32>
    %c4_135 = arith.constant 4 : index
    %c0_136 = arith.constant 0 : index
    %253 = vector.load %arg8[%c4_135, %c0_136] : memref<6x32xf32, #tpu.memory_space<vmem>>, vector<1x32xf32>
    %c5_137 = arith.constant 5 : index
    %c0_138 = arith.constant 0 : index
    %254 = vector.load %arg8[%c5_137, %c0_138] : memref<6x32xf32, #tpu.memory_space<vmem>>, vector<1x32xf32>
    %cst_139 = arith.constant dense<0.000000e+00> : vector<32xf32>
    %255 = vector.multi_reduction <add>, %252, %cst_139 [0] : vector<16x32xf32> to vector<32xf32>
    %256 = vector.shape_cast %255 : vector<32xf32> to vector<1x32xf32>
    %cst_140 = arith.constant 6.250000e-02 : f32
    %257 = vector.broadcast %cst_140 : f32 to vector<1x32xf32>
    %258 = arith.mulf %256, %257 : vector<1x32xf32>
    %259 = arith.mulf %252, %252 : vector<16x32xf32>
    %cst_141 = arith.constant dense<0.000000e+00> : vector<32xf32>
    %260 = vector.multi_reduction <add>, %259, %cst_141 [0] : vector<16x32xf32> to vector<32xf32>
    %261 = vector.shape_cast %260 : vector<32xf32> to vector<1x32xf32>
    %cst_142 = arith.constant 6.250000e-02 : f32
    %262 = vector.broadcast %cst_142 : f32 to vector<1x32xf32>
    %263 = arith.mulf %261, %262 : vector<1x32xf32>
    %264 = arith.mulf %258, %258 : vector<1x32xf32>
    %265 = arith.subf %263, %264 : vector<1x32xf32>
    %cst_143 = arith.constant 9.99999974E-6 : f32
    %266 = vector.broadcast %cst_143 : f32 to vector<1x32xf32>
    %267 = arith.addf %265, %266 : vector<1x32xf32>
    %268 = math.rsqrt %267 : vector<1x32xf32>
    %269 = arith.mulf %253, %268 : vector<1x32xf32>
    %270 = arith.mulf %258, %269 : vector<1x32xf32>
    %271 = arith.subf %254, %270 : vector<1x32xf32>
    %272 = vector.broadcast %269 : vector<1x32xf32> to vector<16x32xf32>
    %273 = arith.mulf %252, %272 : vector<16x32xf32>
    %274 = vector.broadcast %271 : vector<1x32xf32> to vector<16x32xf32>
    %275 = arith.addf %273, %274 : vector<16x32xf32>
    %276 = arith.addf %250, %275 : vector<16x32xf32>
    %cst_144 = arith.constant 0.000000e+00 : f32
    %277 = vector.broadcast %cst_144 : f32 to vector<16x32xf32>
    %278 = arith.maximumf %276, %277 : vector<16x32xf32>
    %c8_145 = arith.constant 8 : index
    %c0_146 = arith.constant 0 : index
    %279 = vector.load %arg18[%c8_145, %c0_146] : memref<48x32xf32, #tpu.memory_space<vmem>>, vector<16x32xf32>
    tpu.vector_store %arg18[%c8_145, %c0_146], %278 {strides = array<i32>} : memref<48x32xf32, #tpu.memory_space<vmem>>, vector<16x32xf32>,
    %280 = tpu.iota {dimensions = array<i32: 0>} : vector<8x1xi32>
    %c4_i32 = arith.constant 4 : i32
    %c0_i32_147 = arith.constant 0 : i32
    %281 = arith.cmpi eq, %c4_i32, %c0_i32_147 : i32
    %c1_i32_148 = arith.constant 1 : i32
    %282 = arith.select %281, %c1_i32_148, %c4_i32 : i32
    %283 = vector.broadcast %282 : i32 to vector<8x1xi32>
    %284 = arith.remsi %280, %283 : vector<8x1xi32>
    %c0_i32_149 = arith.constant 0 : i32
    %285 = vector.broadcast %c0_i32_149 : i32 to vector<8x1xi32>
    %286 = arith.cmpi ne, %284, %285 : vector<8x1xi32>
    %c0_i32_150 = arith.constant 0 : i32
    %287 = vector.broadcast %c0_i32_150 : i32 to vector<8x1xi32>
    %288 = arith.cmpi slt, %284, %287 : vector<8x1xi32>
    %c0_i32_151 = arith.constant 0 : i32
    %289 = arith.cmpi slt, %282, %c0_i32_151 : i32
    %290 = vector.broadcast %289 : i1 to vector<8x1xi1>
    %291 = vector.broadcast %290 : vector<8x1xi1> to vector<8x1xi1>
    %292 = arith.xori %288, %291 : vector<8x1xi1>
    %293 = arith.andi %292, %286 : vector<8x1xi1>
    %294 = vector.broadcast %282 : i32 to vector<8x1xi32>
    %295 = arith.addi %284, %294 : vector<8x1xi32>
    %296 = arith.select %293, %295, %284 : vector<8x1xi1>, vector<8x1xi32>
    %c0_i32_152 = arith.constant 0 : i32
    %297 = vector.broadcast %c0_i32_152 : i32 to vector<8x1xi32>
    %298 = arith.cmpi eq, %296, %297 : vector<8x1xi32>
    %c3_i32 = arith.constant 3 : i32
    %299 = vector.broadcast %c3_i32 : i32 to vector<8x1xi32>
    %300 = arith.cmpi eq, %296, %299 : vector<8x1xi32>
    %c8_153 = arith.constant 8 : index
    %c0_154 = arith.constant 0 : index
    %301 = tpu.strided_load %arg18[%c8_153, %c0_154] {strides = array<i32: 2, 1>} : memref<48x32xf32, #tpu.memory_space<vmem>>, vector<8x32xf32>
    %c7_155 = arith.constant 7 : index
    %c0_156 = arith.constant 0 : index
    %302 = tpu.strided_load %arg18[%c7_155, %c0_156] {strides = array<i32: 2, 1>} : memref<48x32xf32, #tpu.memory_space<vmem>>, vector<8x32xf32>
    %cst_157 = arith.constant 0.000000e+00 : f32
    %303 = vector.shape_cast %298 : vector<8x1xi1> to vector<8x1xi1>
    %304 = vector.broadcast %303 : vector<8x1xi1> to vector<8x32xi1>
    %305 = vector.broadcast %cst_157 : f32 to vector<8x32xf32>
    %306 = arith.select %304, %305, %302 : vector<8x32xi1>, vector<8x32xf32>
    %c9_158 = arith.constant 9 : index
    %c0_159 = arith.constant 0 : index
    %307 = tpu.strided_load %arg18[%c9_158, %c0_159] {strides = array<i32: 2, 1>} : memref<48x32xf32, #tpu.memory_space<vmem>>, vector<8x32xf32>
    %c0_160 = arith.constant 0 : index
    %c0_161 = arith.constant 0 : index
    %c0_162 = arith.constant 0 : index
    %308 = vector.load %arg9[%c0_160, %c0_161, %c0_162] : memref<3x32x32xf32, #tpu.memory_space<vmem>>, vector<1x32x32xf32>
    %309 = vector.shape_cast %308 : vector<1x32x32xf32> to vector<32x32xf32>
    %cst_163 = arith.constant dense<0.000000e+00> : vector<8x32xf32>
    %310 = tpu.matmul %306, %309, %cst_163 {dimension_numbers = #tpu.dot_dimension_numbers<[1], [0], [0], [1], [0, 0, 1, 1], [], []>} : vector<8x32xf32>, vector<32x32xf32>, vector<8x32xf32> -> vector<8x32xf32>
    %c1_164 = arith.constant 1 : index
    %c0_165 = arith.constant 0 : index
    %c0_166 = arith.constant 0 : index
    %311 = vector.load %arg9[%c1_164, %c0_165, %c0_166] : memref<3x32x32xf32, #tpu.memory_space<vmem>>, vector<1x32x32xf32>
    %312 = vector.shape_cast %311 : vector<1x32x32xf32> to vector<32x32xf32>
    %cst_167 = arith.constant dense<0.000000e+00> : vector<8x32xf32>
    %313 = tpu.matmul %301, %312, %cst_167 {dimension_numbers = #tpu.dot_dimension_numbers<[1], [0], [0], [1], [0, 0, 1, 1], [], []>} : vector<8x32xf32>, vector<32x32xf32>, vector<8x32xf32> -> vector<8x32xf32>
    %314 = arith.addf %310, %313 : vector<8x32xf32>
    %c2_168 = arith.constant 2 : index
    %c0_169 = arith.constant 0 : index
    %c0_170 = arith.constant 0 : index
    %315 = vector.load %arg9[%c2_168, %c0_169, %c0_170] : memref<3x32x32xf32, #tpu.memory_space<vmem>>, vector<1x32x32xf32>
    %316 = vector.shape_cast %315 : vector<1x32x32xf32> to vector<32x32xf32>
    %cst_171 = arith.constant dense<0.000000e+00> : vector<8x32xf32>
    %317 = tpu.matmul %307, %316, %cst_171 {dimension_numbers = #tpu.dot_dimension_numbers<[1], [0], [0], [1], [0, 0, 1, 1], [], []>} : vector<8x32xf32>, vector<32x32xf32>, vector<8x32xf32> -> vector<8x32xf32>
    %318 = arith.addf %314, %317 : vector<8x32xf32>
    %c0_172 = arith.constant 0 : index
    %c0_173 = arith.constant 0 : index
    %319 = vector.load %arg12[%c0_172, %c0_173] : memref<6x32xf32, #tpu.memory_space<vmem>>, vector<1x32xf32>
    %c1_174 = arith.constant 1 : index
    %c0_175 = arith.constant 0 : index
    %320 = vector.load %arg12[%c1_174, %c0_175] : memref<6x32xf32, #tpu.memory_space<vmem>>, vector<1x32xf32>
    %cst_176 = arith.constant dense<0.000000e+00> : vector<32xf32>
    %321 = vector.multi_reduction <add>, %318, %cst_176 [0] : vector<8x32xf32> to vector<32xf32>
    %322 = vector.shape_cast %321 : vector<32xf32> to vector<1x32xf32>
    %cst_177 = arith.constant 1.250000e-01 : f32
    %323 = vector.broadcast %cst_177 : f32 to vector<1x32xf32>
    %324 = arith.mulf %322, %323 : vector<1x32xf32>
    %325 = arith.mulf %318, %318 : vector<8x32xf32>
    %cst_178 = arith.constant dense<0.000000e+00> : vector<32xf32>
    %326 = vector.multi_reduction <add>, %325, %cst_178 [0] : vector<8x32xf32> to vector<32xf32>
    %327 = vector.shape_cast %326 : vector<32xf32> to vector<1x32xf32>
    %cst_179 = arith.constant 1.250000e-01 : f32
    %328 = vector.broadcast %cst_179 : f32 to vector<1x32xf32>
    %329 = arith.mulf %327, %328 : vector<1x32xf32>
    %330 = arith.mulf %324, %324 : vector<1x32xf32>
    %331 = arith.subf %329, %330 : vector<1x32xf32>
    %cst_180 = arith.constant 9.99999974E-6 : f32
    %332 = vector.broadcast %cst_180 : f32 to vector<1x32xf32>
    %333 = arith.addf %331, %332 : vector<1x32xf32>
    %334 = math.rsqrt %333 : vector<1x32xf32>
    %335 = arith.mulf %319, %334 : vector<1x32xf32>
    %336 = arith.mulf %324, %335 : vector<1x32xf32>
    %337 = arith.subf %320, %336 : vector<1x32xf32>
    %338 = vector.broadcast %335 : vector<1x32xf32> to vector<8x32xf32>
    %339 = arith.mulf %318, %338 : vector<8x32xf32>
    %340 = vector.broadcast %337 : vector<1x32xf32> to vector<8x32xf32>
    %341 = arith.addf %339, %340 : vector<8x32xf32>
    %cst_181 = arith.constant 0.000000e+00 : f32
    %342 = vector.broadcast %cst_181 : f32 to vector<8x32xf32>
    %343 = arith.maximumf %341, %342 : vector<8x32xf32>
    %c8_182 = arith.constant 8 : index
    %c0_183 = arith.constant 0 : index
    %344 = vector.load %arg18[%c8_182, %c0_183] : memref<48x32xf32, #tpu.memory_space<vmem>>, vector<8x32xf32>
    tpu.vector_store %arg18[%c8_182, %c0_183], %343 {strides = array<i32>} : memref<48x32xf32, #tpu.memory_space<vmem>>, vector<8x32xf32>,
    %c7_184 = arith.constant 7 : index
    %c0_185 = arith.constant 0 : index
    %345 = vector.load %arg18[%c7_184, %c0_185] : memref<48x32xf32, #tpu.memory_space<vmem>>, vector<8x32xf32>
    %cst_186 = arith.constant 0.000000e+00 : f32
    %346 = vector.shape_cast %298 : vector<8x1xi1> to vector<8x1xi1>
    %347 = vector.broadcast %346 : vector<8x1xi1> to vector<8x32xi1>
    %348 = vector.broadcast %cst_186 : f32 to vector<8x32xf32>
    %349 = arith.select %347, %348, %345 : vector<8x32xi1>, vector<8x32xf32>
    %c9_187 = arith.constant 9 : index
    %c0_188 = arith.constant 0 : index
    %350 = vector.load %arg18[%c9_187, %c0_188] : memref<48x32xf32, #tpu.memory_space<vmem>>, vector<8x32xf32>
    %cst_189 = arith.constant 0.000000e+00 : f32
    %351 = vector.shape_cast %300 : vector<8x1xi1> to vector<8x1xi1>
    %352 = vector.broadcast %351 : vector<8x1xi1> to vector<8x32xi1>
    %353 = vector.broadcast %cst_189 : f32 to vector<8x32xf32>
    %354 = arith.select %352, %353, %350 : vector<8x32xi1>, vector<8x32xf32>
    %c0_190 = arith.constant 0 : index
    %c0_191 = arith.constant 0 : index
    %c0_192 = arith.constant 0 : index
    %355 = vector.load %arg10[%c0_190, %c0_191, %c0_192] : memref<3x32x32xf32, #tpu.memory_space<vmem>>, vector<1x32x32xf32>
    %356 = vector.shape_cast %355 : vector<1x32x32xf32> to vector<32x32xf32>
    %cst_193 = arith.constant dense<0.000000e+00> : vector<8x32xf32>
    %357 = tpu.matmul %349, %356, %cst_193 {dimension_numbers = #tpu.dot_dimension_numbers<[1], [0], [0], [1], [0, 0, 1, 1], [], []>} : vector<8x32xf32>, vector<32x32xf32>, vector<8x32xf32> -> vector<8x32xf32>
    %c1_194 = arith.constant 1 : index
    %c0_195 = arith.constant 0 : index
    %c0_196 = arith.constant 0 : index
    %358 = vector.load %arg10[%c1_194, %c0_195, %c0_196] : memref<3x32x32xf32, #tpu.memory_space<vmem>>, vector<1x32x32xf32>
    %359 = vector.shape_cast %358 : vector<1x32x32xf32> to vector<32x32xf32>
    %cst_197 = arith.constant dense<0.000000e+00> : vector<8x32xf32>
    %360 = tpu.matmul %343, %359, %cst_197 {dimension_numbers = #tpu.dot_dimension_numbers<[1], [0], [0], [1], [0, 0, 1, 1], [], []>} : vector<8x32xf32>, vector<32x32xf32>, vector<8x32xf32> -> vector<8x32xf32>
    %361 = arith.addf %357, %360 : vector<8x32xf32>
    %c2_198 = arith.constant 2 : index
    %c0_199 = arith.constant 0 : index
    %c0_200 = arith.constant 0 : index
    %362 = vector.load %arg10[%c2_198, %c0_199, %c0_200] : memref<3x32x32xf32, #tpu.memory_space<vmem>>, vector<1x32x32xf32>
    %363 = vector.shape_cast %362 : vector<1x32x32xf32> to vector<32x32xf32>
    %cst_201 = arith.constant dense<0.000000e+00> : vector<8x32xf32>
    %364 = tpu.matmul %354, %363, %cst_201 {dimension_numbers = #tpu.dot_dimension_numbers<[1], [0], [0], [1], [0, 0, 1, 1], [], []>} : vector<8x32xf32>, vector<32x32xf32>, vector<8x32xf32> -> vector<8x32xf32>
    %365 = arith.addf %361, %364 : vector<8x32xf32>
    %c2_202 = arith.constant 2 : index
    %c0_203 = arith.constant 0 : index
    %366 = vector.load %arg12[%c2_202, %c0_203] : memref<6x32xf32, #tpu.memory_space<vmem>>, vector<1x32xf32>
    %c3_204 = arith.constant 3 : index
    %c0_205 = arith.constant 0 : index
    %367 = vector.load %arg12[%c3_204, %c0_205] : memref<6x32xf32, #tpu.memory_space<vmem>>, vector<1x32xf32>
    %cst_206 = arith.constant dense<0.000000e+00> : vector<32xf32>
    %368 = vector.multi_reduction <add>, %365, %cst_206 [0] : vector<8x32xf32> to vector<32xf32>
    %369 = vector.shape_cast %368 : vector<32xf32> to vector<1x32xf32>
    %cst_207 = arith.constant 1.250000e-01 : f32
    %370 = vector.broadcast %cst_207 : f32 to vector<1x32xf32>
    %371 = arith.mulf %369, %370 : vector<1x32xf32>
    %372 = arith.mulf %365, %365 : vector<8x32xf32>
    %cst_208 = arith.constant dense<0.000000e+00> : vector<32xf32>
    %373 = vector.multi_reduction <add>, %372, %cst_208 [0] : vector<8x32xf32> to vector<32xf32>
    %374 = vector.shape_cast %373 : vector<32xf32> to vector<1x32xf32>
    %cst_209 = arith.constant 1.250000e-01 : f32
    %375 = vector.broadcast %cst_209 : f32 to vector<1x32xf32>
    %376 = arith.mulf %374, %375 : vector<1x32xf32>
    %377 = arith.mulf %371, %371 : vector<1x32xf32>
    %378 = arith.subf %376, %377 : vector<1x32xf32>
    %cst_210 = arith.constant 9.99999974E-6 : f32
    %379 = vector.broadcast %cst_210 : f32 to vector<1x32xf32>
    %380 = arith.addf %378, %379 : vector<1x32xf32>
    %381 = math.rsqrt %380 : vector<1x32xf32>
    %382 = arith.mulf %366, %381 : vector<1x32xf32>
    %383 = arith.mulf %371, %382 : vector<1x32xf32>
    %384 = arith.subf %367, %383 : vector<1x32xf32>
    %385 = vector.broadcast %382 : vector<1x32xf32> to vector<8x32xf32>
    %386 = arith.mulf %365, %385 : vector<8x32xf32>
    %387 = vector.broadcast %384 : vector<1x32xf32> to vector<8x32xf32>
    %388 = arith.addf %386, %387 : vector<8x32xf32>
    %c0_211 = arith.constant 0 : index
    %c0_212 = arith.constant 0 : index
    %389 = vector.load %arg11[%c0_211, %c0_212] : memref<32x32xf32, #tpu.memory_space<vmem>>, vector<32x32xf32>
    %cst_213 = arith.constant dense<0.000000e+00> : vector<8x32xf32>
    %390 = tpu.matmul %301, %389, %cst_213 {dimension_numbers = #tpu.dot_dimension_numbers<[1], [0], [0], [1], [0, 0, 1, 1], [], []>} : vector<8x32xf32>, vector<32x32xf32>, vector<8x32xf32> -> vector<8x32xf32>
    %c4_214 = arith.constant 4 : index
    %c0_215 = arith.constant 0 : index
    %391 = vector.load %arg12[%c4_214, %c0_215] : memref<6x32xf32, #tpu.memory_space<vmem>>, vector<1x32xf32>
    %c5_216 = arith.constant 5 : index
    %c0_217 = arith.constant 0 : index
    %392 = vector.load %arg12[%c5_216, %c0_217] : memref<6x32xf32, #tpu.memory_space<vmem>>, vector<1x32xf32>
    %cst_218 = arith.constant dense<0.000000e+00> : vector<32xf32>
    %393 = vector.multi_reduction <add>, %390, %cst_218 [0] : vector<8x32xf32> to vector<32xf32>
    %394 = vector.shape_cast %393 : vector<32xf32> to vector<1x32xf32>
    %cst_219 = arith.constant 1.250000e-01 : f32
    %395 = vector.broadcast %cst_219 : f32 to vector<1x32xf32>
    %396 = arith.mulf %394, %395 : vector<1x32xf32>
    %397 = arith.mulf %390, %390 : vector<8x32xf32>
    %cst_220 = arith.constant dense<0.000000e+00> : vector<32xf32>
    %398 = vector.multi_reduction <add>, %397, %cst_220 [0] : vector<8x32xf32> to vector<32xf32>
    %399 = vector.shape_cast %398 : vector<32xf32> to vector<1x32xf32>
    %cst_221 = arith.constant 1.250000e-01 : f32
    %400 = vector.broadcast %cst_221 : f32 to vector<1x32xf32>
    %401 = arith.mulf %399, %400 : vector<1x32xf32>
    %402 = arith.mulf %396, %396 : vector<1x32xf32>
    %403 = arith.subf %401, %402 : vector<1x32xf32>
    %cst_222 = arith.constant 9.99999974E-6 : f32
    %404 = vector.broadcast %cst_222 : f32 to vector<1x32xf32>
    %405 = arith.addf %403, %404 : vector<1x32xf32>
    %406 = math.rsqrt %405 : vector<1x32xf32>
    %407 = arith.mulf %391, %406 : vector<1x32xf32>
    %408 = arith.mulf %396, %407 : vector<1x32xf32>
    %409 = arith.subf %392, %408 : vector<1x32xf32>
    %410 = vector.broadcast %407 : vector<1x32xf32> to vector<8x32xf32>
    %411 = arith.mulf %390, %410 : vector<8x32xf32>
    %412 = vector.broadcast %409 : vector<1x32xf32> to vector<8x32xf32>
    %413 = arith.addf %411, %412 : vector<8x32xf32>
    %414 = arith.addf %388, %413 : vector<8x32xf32>
    %cst_223 = arith.constant 0.000000e+00 : f32
    %415 = vector.broadcast %cst_223 : f32 to vector<8x32xf32>
    %416 = arith.maximumf %414, %415 : vector<8x32xf32>
    %c8_224 = arith.constant 8 : index
    %c0_225 = arith.constant 0 : index
    %417 = vector.load %arg18[%c8_224, %c0_225] : memref<48x32xf32, #tpu.memory_space<vmem>>, vector<8x32xf32>
    tpu.vector_store %arg18[%c8_224, %c0_225], %416 {strides = array<i32>} : memref<48x32xf32, #tpu.memory_space<vmem>>, vector<8x32xf32>,
    %418 = tpu.iota {dimensions = array<i32: 0>} : vector<4x1xi32>
    %c2_i32 = arith.constant 2 : i32
    %c0_i32_226 = arith.constant 0 : i32
    %419 = arith.cmpi eq, %c2_i32, %c0_i32_226 : i32
    %c1_i32_227 = arith.constant 1 : i32
    %420 = arith.select %419, %c1_i32_227, %c2_i32 : i32
    %421 = vector.broadcast %420 : i32 to vector<4x1xi32>
    %422 = arith.remsi %418, %421 : vector<4x1xi32>
    %c0_i32_228 = arith.constant 0 : i32
    %423 = vector.broadcast %c0_i32_228 : i32 to vector<4x1xi32>
    %424 = arith.cmpi ne, %422, %423 : vector<4x1xi32>
    %c0_i32_229 = arith.constant 0 : i32
    %425 = vector.broadcast %c0_i32_229 : i32 to vector<4x1xi32>
    %426 = arith.cmpi slt, %422, %425 : vector<4x1xi32>
    %c0_i32_230 = arith.constant 0 : i32
    %427 = arith.cmpi slt, %420, %c0_i32_230 : i32
    %428 = vector.broadcast %427 : i1 to vector<4x1xi1>
    %429 = vector.broadcast %428 : vector<4x1xi1> to vector<4x1xi1>
    %430 = arith.xori %426, %429 : vector<4x1xi1>
    %431 = arith.andi %430, %424 : vector<4x1xi1>
    %432 = vector.broadcast %420 : i32 to vector<4x1xi32>
    %433 = arith.addi %422, %432 : vector<4x1xi32>
    %434 = arith.select %431, %433, %422 : vector<4x1xi1>, vector<4x1xi32>
    %c0_i32_231 = arith.constant 0 : i32
    %435 = vector.broadcast %c0_i32_231 : i32 to vector<4x1xi32>
    %436 = arith.cmpi eq, %434, %435 : vector<4x1xi32>
    %c1_i32_232 = arith.constant 1 : i32
    %437 = vector.broadcast %c1_i32_232 : i32 to vector<4x1xi32>
    %438 = arith.cmpi eq, %434, %437 : vector<4x1xi32>
    %c8_233 = arith.constant 8 : index
    %c0_234 = arith.constant 0 : index
    %439 = tpu.strided_load %arg18[%c8_233, %c0_234] {strides = array<i32: 2, 1>} : memref<48x32xf32, #tpu.memory_space<vmem>>, vector<4x32xf32>
    %c7_235 = arith.constant 7 : index
    %c0_236 = arith.constant 0 : index
    %440 = tpu.strided_load %arg18[%c7_235, %c0_236] {strides = array<i32: 2, 1>} : memref<48x32xf32, #tpu.memory_space<vmem>>, vector<4x32xf32>
    %cst_237 = arith.constant 0.000000e+00 : f32
    %441 = vector.shape_cast %436 : vector<4x1xi1> to vector<4x1xi1>
    %442 = vector.broadcast %441 : vector<4x1xi1> to vector<4x32xi1>
    %443 = vector.broadcast %cst_237 : f32 to vector<4x32xf32>
    %444 = arith.select %442, %443, %440 : vector<4x32xi1>, vector<4x32xf32>
    %c9_238 = arith.constant 9 : index
    %c0_239 = arith.constant 0 : index
    %445 = tpu.strided_load %arg18[%c9_238, %c0_239] {strides = array<i32: 2, 1>} : memref<48x32xf32, #tpu.memory_space<vmem>>, vector<4x32xf32>
    %c0_240 = arith.constant 0 : index
    %c0_241 = arith.constant 0 : index
    %c0_242 = arith.constant 0 : index
    %446 = vector.load %arg13[%c0_240, %c0_241, %c0_242] : memref<3x32x32xf32, #tpu.memory_space<vmem>>, vector<1x32x32xf32>
    %447 = vector.shape_cast %446 : vector<1x32x32xf32> to vector<32x32xf32>
    %cst_243 = arith.constant dense<0.000000e+00> : vector<4x32xf32>
    %448 = tpu.matmul %444, %447, %cst_243 {dimension_numbers = #tpu.dot_dimension_numbers<[1], [0], [0], [1], [0, 0, 1, 1], [], []>} : vector<4x32xf32>, vector<32x32xf32>, vector<4x32xf32> -> vector<4x32xf32>
    %c1_244 = arith.constant 1 : index
    %c0_245 = arith.constant 0 : index
    %c0_246 = arith.constant 0 : index
    %449 = vector.load %arg13[%c1_244, %c0_245, %c0_246] : memref<3x32x32xf32, #tpu.memory_space<vmem>>, vector<1x32x32xf32>
    %450 = vector.shape_cast %449 : vector<1x32x32xf32> to vector<32x32xf32>
    %cst_247 = arith.constant dense<0.000000e+00> : vector<4x32xf32>
    %451 = tpu.matmul %439, %450, %cst_247 {dimension_numbers = #tpu.dot_dimension_numbers<[1], [0], [0], [1], [0, 0, 1, 1], [], []>} : vector<4x32xf32>, vector<32x32xf32>, vector<4x32xf32> -> vector<4x32xf32>
    %452 = arith.addf %448, %451 : vector<4x32xf32>
    %c2_248 = arith.constant 2 : index
    %c0_249 = arith.constant 0 : index
    %c0_250 = arith.constant 0 : index
    %453 = vector.load %arg13[%c2_248, %c0_249, %c0_250] : memref<3x32x32xf32, #tpu.memory_space<vmem>>, vector<1x32x32xf32>
    %454 = vector.shape_cast %453 : vector<1x32x32xf32> to vector<32x32xf32>
    %cst_251 = arith.constant dense<0.000000e+00> : vector<4x32xf32>
    %455 = tpu.matmul %445, %454, %cst_251 {dimension_numbers = #tpu.dot_dimension_numbers<[1], [0], [0], [1], [0, 0, 1, 1], [], []>} : vector<4x32xf32>, vector<32x32xf32>, vector<4x32xf32> -> vector<4x32xf32>
    %456 = arith.addf %452, %455 : vector<4x32xf32>
    %c0_252 = arith.constant 0 : index
    %c0_253 = arith.constant 0 : index
    %457 = vector.load %arg16[%c0_252, %c0_253] : memref<6x32xf32, #tpu.memory_space<vmem>>, vector<1x32xf32>
    %c1_254 = arith.constant 1 : index
    %c0_255 = arith.constant 0 : index
    %458 = vector.load %arg16[%c1_254, %c0_255] : memref<6x32xf32, #tpu.memory_space<vmem>>, vector<1x32xf32>
    %cst_256 = arith.constant dense<0.000000e+00> : vector<32xf32>
    %459 = vector.multi_reduction <add>, %456, %cst_256 [0] : vector<4x32xf32> to vector<32xf32>
    %460 = vector.shape_cast %459 : vector<32xf32> to vector<1x32xf32>
    %cst_257 = arith.constant 2.500000e-01 : f32
    %461 = vector.broadcast %cst_257 : f32 to vector<1x32xf32>
    %462 = arith.mulf %460, %461 : vector<1x32xf32>
    %463 = arith.mulf %456, %456 : vector<4x32xf32>
    %cst_258 = arith.constant dense<0.000000e+00> : vector<32xf32>
    %464 = vector.multi_reduction <add>, %463, %cst_258 [0] : vector<4x32xf32> to vector<32xf32>
    %465 = vector.shape_cast %464 : vector<32xf32> to vector<1x32xf32>
    %cst_259 = arith.constant 2.500000e-01 : f32
    %466 = vector.broadcast %cst_259 : f32 to vector<1x32xf32>
    %467 = arith.mulf %465, %466 : vector<1x32xf32>
    %468 = arith.mulf %462, %462 : vector<1x32xf32>
    %469 = arith.subf %467, %468 : vector<1x32xf32>
    %cst_260 = arith.constant 9.99999974E-6 : f32
    %470 = vector.broadcast %cst_260 : f32 to vector<1x32xf32>
    %471 = arith.addf %469, %470 : vector<1x32xf32>
    %472 = math.rsqrt %471 : vector<1x32xf32>
    %473 = arith.mulf %457, %472 : vector<1x32xf32>
    %474 = arith.mulf %462, %473 : vector<1x32xf32>
    %475 = arith.subf %458, %474 : vector<1x32xf32>
    %476 = vector.broadcast %473 : vector<1x32xf32> to vector<4x32xf32>
    %477 = arith.mulf %456, %476 : vector<4x32xf32>
    %478 = vector.broadcast %475 : vector<1x32xf32> to vector<4x32xf32>
    %479 = arith.addf %477, %478 : vector<4x32xf32>
    %cst_261 = arith.constant 0.000000e+00 : f32
    %480 = vector.broadcast %cst_261 : f32 to vector<4x32xf32>
    %481 = arith.maximumf %479, %480 : vector<4x32xf32>
    %c8_262 = arith.constant 8 : index
    %c0_263 = arith.constant 0 : index
    %482 = vector.load %arg18[%c8_262, %c0_263] : memref<48x32xf32, #tpu.memory_space<vmem>>, vector<4x32xf32>
    tpu.vector_store %arg18[%c8_262, %c0_263], %481 {strides = array<i32>} : memref<48x32xf32, #tpu.memory_space<vmem>>, vector<4x32xf32>,
    %c7_264 = arith.constant 7 : index
    %c0_265 = arith.constant 0 : index
    %483 = vector.load %arg18[%c7_264, %c0_265] : memref<48x32xf32, #tpu.memory_space<vmem>>, vector<4x32xf32>
    %cst_266 = arith.constant 0.000000e+00 : f32
    %484 = vector.shape_cast %436 : vector<4x1xi1> to vector<4x1xi1>
    %485 = vector.broadcast %484 : vector<4x1xi1> to vector<4x32xi1>
    %486 = vector.broadcast %cst_266 : f32 to vector<4x32xf32>
    %487 = arith.select %485, %486, %483 : vector<4x32xi1>, vector<4x32xf32>
    %c9_267 = arith.constant 9 : index
    %c0_268 = arith.constant 0 : index
    %488 = vector.load %arg18[%c9_267, %c0_268] : memref<48x32xf32, #tpu.memory_space<vmem>>, vector<4x32xf32>
    %cst_269 = arith.constant 0.000000e+00 : f32
    %489 = vector.shape_cast %438 : vector<4x1xi1> to vector<4x1xi1>
    %490 = vector.broadcast %489 : vector<4x1xi1> to vector<4x32xi1>
    %491 = vector.broadcast %cst_269 : f32 to vector<4x32xf32>
    %492 = arith.select %490, %491, %488 : vector<4x32xi1>, vector<4x32xf32>
    %c0_270 = arith.constant 0 : index
    %c0_271 = arith.constant 0 : index
    %c0_272 = arith.constant 0 : index
    %493 = vector.load %arg14[%c0_270, %c0_271, %c0_272] : memref<3x32x32xf32, #tpu.memory_space<vmem>>, vector<1x32x32xf32>
    %494 = vector.shape_cast %493 : vector<1x32x32xf32> to vector<32x32xf32>
    %cst_273 = arith.constant dense<0.000000e+00> : vector<4x32xf32>
    %495 = tpu.matmul %487, %494, %cst_273 {dimension_numbers = #tpu.dot_dimension_numbers<[1], [0], [0], [1], [0, 0, 1, 1], [], []>} : vector<4x32xf32>, vector<32x32xf32>, vector<4x32xf32> -> vector<4x32xf32>
    %c1_274 = arith.constant 1 : index
    %c0_275 = arith.constant 0 : index
    %c0_276 = arith.constant 0 : index
    %496 = vector.load %arg14[%c1_274, %c0_275, %c0_276] : memref<3x32x32xf32, #tpu.memory_space<vmem>>, vector<1x32x32xf32>
    %497 = vector.shape_cast %496 : vector<1x32x32xf32> to vector<32x32xf32>
    %cst_277 = arith.constant dense<0.000000e+00> : vector<4x32xf32>
    %498 = tpu.matmul %481, %497, %cst_277 {dimension_numbers = #tpu.dot_dimension_numbers<[1], [0], [0], [1], [0, 0, 1, 1], [], []>} : vector<4x32xf32>, vector<32x32xf32>, vector<4x32xf32> -> vector<4x32xf32>
    %499 = arith.addf %495, %498 : vector<4x32xf32>
    %c2_278 = arith.constant 2 : index
    %c0_279 = arith.constant 0 : index
    %c0_280 = arith.constant 0 : index
    %500 = vector.load %arg14[%c2_278, %c0_279, %c0_280] : memref<3x32x32xf32, #tpu.memory_space<vmem>>, vector<1x32x32xf32>
    %501 = vector.shape_cast %500 : vector<1x32x32xf32> to vector<32x32xf32>
    %cst_281 = arith.constant dense<0.000000e+00> : vector<4x32xf32>
    %502 = tpu.matmul %492, %501, %cst_281 {dimension_numbers = #tpu.dot_dimension_numbers<[1], [0], [0], [1], [0, 0, 1, 1], [], []>} : vector<4x32xf32>, vector<32x32xf32>, vector<4x32xf32> -> vector<4x32xf32>
    %503 = arith.addf %499, %502 : vector<4x32xf32>
    %c2_282 = arith.constant 2 : index
    %c0_283 = arith.constant 0 : index
    %504 = vector.load %arg16[%c2_282, %c0_283] : memref<6x32xf32, #tpu.memory_space<vmem>>, vector<1x32xf32>
    %c3_284 = arith.constant 3 : index
    %c0_285 = arith.constant 0 : index
    %505 = vector.load %arg16[%c3_284, %c0_285] : memref<6x32xf32, #tpu.memory_space<vmem>>, vector<1x32xf32>
    %cst_286 = arith.constant dense<0.000000e+00> : vector<32xf32>
    %506 = vector.multi_reduction <add>, %503, %cst_286 [0] : vector<4x32xf32> to vector<32xf32>
    %507 = vector.shape_cast %506 : vector<32xf32> to vector<1x32xf32>
    %cst_287 = arith.constant 2.500000e-01 : f32
    %508 = vector.broadcast %cst_287 : f32 to vector<1x32xf32>
    %509 = arith.mulf %507, %508 : vector<1x32xf32>
    %510 = arith.mulf %503, %503 : vector<4x32xf32>
    %cst_288 = arith.constant dense<0.000000e+00> : vector<32xf32>
    %511 = vector.multi_reduction <add>, %510, %cst_288 [0] : vector<4x32xf32> to vector<32xf32>
    %512 = vector.shape_cast %511 : vector<32xf32> to vector<1x32xf32>
    %cst_289 = arith.constant 2.500000e-01 : f32
    %513 = vector.broadcast %cst_289 : f32 to vector<1x32xf32>
    %514 = arith.mulf %512, %513 : vector<1x32xf32>
    %515 = arith.mulf %509, %509 : vector<1x32xf32>
    %516 = arith.subf %514, %515 : vector<1x32xf32>
    %cst_290 = arith.constant 9.99999974E-6 : f32
    %517 = vector.broadcast %cst_290 : f32 to vector<1x32xf32>
    %518 = arith.addf %516, %517 : vector<1x32xf32>
    %519 = math.rsqrt %518 : vector<1x32xf32>
    %520 = arith.mulf %504, %519 : vector<1x32xf32>
    %521 = arith.mulf %509, %520 : vector<1x32xf32>
    %522 = arith.subf %505, %521 : vector<1x32xf32>
    %523 = vector.broadcast %520 : vector<1x32xf32> to vector<4x32xf32>
    %524 = arith.mulf %503, %523 : vector<4x32xf32>
    %525 = vector.broadcast %522 : vector<1x32xf32> to vector<4x32xf32>
    %526 = arith.addf %524, %525 : vector<4x32xf32>
    %c0_291 = arith.constant 0 : index
    %c0_292 = arith.constant 0 : index
    %527 = vector.load %arg15[%c0_291, %c0_292] : memref<32x32xf32, #tpu.memory_space<vmem>>, vector<32x32xf32>
    %cst_293 = arith.constant dense<0.000000e+00> : vector<4x32xf32>
    %528 = tpu.matmul %439, %527, %cst_293 {dimension_numbers = #tpu.dot_dimension_numbers<[1], [0], [0], [1], [0, 0, 1, 1], [], []>} : vector<4x32xf32>, vector<32x32xf32>, vector<4x32xf32> -> vector<4x32xf32>
    %c4_294 = arith.constant 4 : index
    %c0_295 = arith.constant 0 : index
    %529 = vector.load %arg16[%c4_294, %c0_295] : memref<6x32xf32, #tpu.memory_space<vmem>>, vector<1x32xf32>
    %c5_296 = arith.constant 5 : index
    %c0_297 = arith.constant 0 : index
    %530 = vector.load %arg16[%c5_296, %c0_297] : memref<6x32xf32, #tpu.memory_space<vmem>>, vector<1x32xf32>
    %cst_298 = arith.constant dense<0.000000e+00> : vector<32xf32>
    %531 = vector.multi_reduction <add>, %528, %cst_298 [0] : vector<4x32xf32> to vector<32xf32>
    %532 = vector.shape_cast %531 : vector<32xf32> to vector<1x32xf32>
    %cst_299 = arith.constant 2.500000e-01 : f32
    %533 = vector.broadcast %cst_299 : f32 to vector<1x32xf32>
    %534 = arith.mulf %532, %533 : vector<1x32xf32>
    %535 = arith.mulf %528, %528 : vector<4x32xf32>
    %cst_300 = arith.constant dense<0.000000e+00> : vector<32xf32>
    %536 = vector.multi_reduction <add>, %535, %cst_300 [0] : vector<4x32xf32> to vector<32xf32>
    %537 = vector.shape_cast %536 : vector<32xf32> to vector<1x32xf32>
    %cst_301 = arith.constant 2.500000e-01 : f32
    %538 = vector.broadcast %cst_301 : f32 to vector<1x32xf32>
    %539 = arith.mulf %537, %538 : vector<1x32xf32>
    %540 = arith.mulf %534, %534 : vector<1x32xf32>
    %541 = arith.subf %539, %540 : vector<1x32xf32>
    %cst_302 = arith.constant 9.99999974E-6 : f32
    %542 = vector.broadcast %cst_302 : f32 to vector<1x32xf32>
    %543 = arith.addf %541, %542 : vector<1x32xf32>
    %544 = math.rsqrt %543 : vector<1x32xf32>
    %545 = arith.mulf %529, %544 : vector<1x32xf32>
    %546 = arith.mulf %534, %545 : vector<1x32xf32>
    %547 = arith.subf %530, %546 : vector<1x32xf32>
    %548 = vector.broadcast %545 : vector<1x32xf32> to vector<4x32xf32>
    %549 = arith.mulf %528, %548 : vector<4x32xf32>
    %550 = vector.broadcast %547 : vector<1x32xf32> to vector<4x32xf32>
    %551 = arith.addf %549, %550 : vector<4x32xf32>
    %552 = arith.addf %526, %551 : vector<4x32xf32>
    %cst_303 = arith.constant 0.000000e+00 : f32
    %553 = vector.broadcast %cst_303 : f32 to vector<4x32xf32>
    %554 = arith.maximumf %552, %553 : vector<4x32xf32>
    %c0_304 = arith.constant 0 : index
    %c0_305 = arith.constant 0 : index
    %555 = vector.load %arg17[%c0_304, %c0_305] : memref<4x32xf32, #tpu.memory_space<vmem>>, vector<4x32xf32>
    tpu.vector_store %arg17[%c0_304, %c0_305], %554 {strides = array<i32>} : memref<4x32xf32, #tpu.memory_space<vmem>>, vector<4x32xf32>,
    return
  }
}

</mosaic_0001>

<bundles_post_ra>
// kernel: _lambda_.1
= control target key start
LH: loop header
LB: loop body
LE: loop exit
PB: predicated region body
PF: predicated region fallthrough
CT: control target
= control target key end

     0   :  { %s5177_s0 = inlined_call_operand.vmem [shape: f32[48,8], index: 0, kind: input, shape index: {}]   ;;  %s5178_s1 = inlined_call_operand.vmem [shape: f32[3,8,32], index: 1, kind: input, shape index: {}]   ;;  %s5179_s2 = inlined_call_operand.hbm [shape: f32[3,32,32], index: 2, kind: input, shape index: {}]   ;;  %s5180_s3 = inlined_call_operand.hbm [shape: f32[8,32], index: 3, kind: input, shape index: {}]   ;;  %s5181_s4 = inlined_call_operand.hbm [shape: f32[6,32], index: 4, kind: input, shape index: {}]   ;;  %s5182_s5 = inlined_call_operand.hbm [shape: f32[3,32,32], index: 5, kind: input, shape index: {}]   ;;  %s5183_s6 = inlined_call_operand.hbm [shape: f32[3,32,32], index: 6, kind: input, shape index: {}]   ;;  %s5184_s7 = inlined_call_operand.hbm [shape: f32[32,32], index: 7, kind: input, shape index: {}]   ;;  %s5185_s8 = inlined_call_operand.hbm [shape: f32[6,32], index: 8, kind: input, shape index: {}]   ;;  %s5186_s9 = inlined_call_operand.hbm [shape: f32[3,32,32], index: 9, kind: input, shape index: {}]   ;;  %s5187_s10 = inlined_call_operand.hbm [shape: f32[3,32,32], index: 10, kind: input, shape index: {}]   ;;  %s5188_s11 = inlined_call_operand.vmem [shape: f32[32,32], index: 11, kind: input, shape index: {}]   ;;  %s5189_s12 = inlined_call_operand.hbm [shape: f32[6,32], index: 12, kind: input, shape index: {}]   ;;  %s5190_s13 = inlined_call_operand.hbm [shape: f32[3,32,32], index: 13, kind: input, shape index: {}]   ;;  %s5191_s14 = inlined_call_operand.vmem [shape: f32[3,32,32], index: 14, kind: input, shape index: {}]   ;;  %s5192_s15 = inlined_call_operand.vmem [shape: f32[32,32], index: 15, kind: input, shape index: {}]   ;;  %s5193_s16 = inlined_call_operand.vmem [shape: f32[6,32], index: 16, kind: input, shape index: {}]   ;;  %s5194_s17 = inlined_call_operand.hbm [shape: f32[4,32], index: 17, kind: output, shape index: {}]  }
   0x1   :  { %5197 = sst [smem:[#allocation29_spill]] %s5177_s0 }
   0x2   :  { %5198 = sst [smem:[#allocation30_spill]] %s5178_s1 }
   0x3   :  { %22 = vsyncpa [#allocation4], 0 }
   0x4   :  { %23 = vsyncpa [#allocation7], 0 }
   0x5   :  { %24 = vsyncpa [#allocation10], 0 }
   0x6   :  { %25 = vsyncpa [#allocation13], 0 }
   0x7   :  { %26 = vsyncpa [#allocation16], 0 }
   0x8   :  { %27 = vsyncpa [#allocation19], 0 }
   0x9   :  { %28 = vsyncpa [#allocation5], 0  ;;  %s4426_s24 = smov [#allocation6]   ;;  %s4148_s28 = scalar_lea.hbm %s5180_s3, 128 }
   0xa   :  { %s51_s25 = sshll.u32 %s4426_s24, 4  ;;  %p4149_p0 = scmp.ne.s32.totalorder %s5180_s3, %s4148_s28  ;;  %s52_s25 = int_to_ptr.vmem [resolvable:$true] %s51_s25 }
   0xb   :  { %p4152_p1 = scmp.lt.u32.totalorder %s4148_s28, %s5180_s3 }
   0xd   :  { %p4154_p2 = pnand %p4152_p1, %p4149_p0 }
   0xf   :  { %4157 = shalt.err (!%p4154_p2)
}
  0x10   :  { %s4158_s19 = scalar_lea.vmem %s52_s25, 128  ;;  %p4163_p4 = scmp.lt.s32.totalorder %s52_s25, %s52_s25 }
  0x11   :  { %p4159_p3 = scmp.ne.s32.totalorder %s52_s25, %s4158_s19  ;;  %p4164_p5 = scmp.lt.s32.totalorder %s4158_s19, %s4158_s19 }
  0x13   :  { %p4165_p6 = por %p4164_p5, %p4163_p4 }
  0x15   :  { %p4166_p7 = pnand %p4165_p6, %p4159_p3 }
  0x17   :  { %4169 = shalt.err (!%p4166_p7)
}
  0x18   :  { %54 = dma.hbm_to_vmem [thread:$0]  %s5180_s3, 128, %s52_s25, [#allocation7]  }
  0x19   :  { %s4427_s21 = smov [#allocation9]   ;;  %s4428_s23 = smov [#allocation12]  }
  0x1a   :  { %s70_s22 = sshll.u32 %s4427_s21, 4  ;;  %s94_s24 = sshll.u32 %s4428_s23, 4  ;;  %s71_s22 = int_to_ptr.vmem [resolvable:$true] %s70_s22  ;;  %s95_s24 = int_to_ptr.vmem [resolvable:$true] %s94_s24 }
  0x1b   :  { %s4170_s28 = scalar_lea.hbm %s5182_s5, 1536 }
  0x1c   :  { %p4171_p8 = scmp.ne.s32.totalorder %s5182_s5, %s4170_s28  ;;  %p4174_p9 = scmp.lt.u32.totalorder %s4170_s28, %s5182_s5 }
  0x1e   :  { %p4176_p10 = pnand %p4174_p9, %p4171_p8 }
  0x20   :  { %4179 = shalt.err (!%p4176_p10)
}
  0x21   :  { %s4180_s3 = scalar_lea.vmem %s71_s22, 1536  ;;  %p4185_p12 = scmp.lt.s32.totalorder %s71_s22, %s71_s22 }
  0x22   :  { %p4181_p11 = scmp.ne.s32.totalorder %s71_s22, %s4180_s3  ;;  %p4186_p13 = scmp.lt.s32.totalorder %s4180_s3, %s4180_s3 }
  0x24   :  { %p4187_p0 = por %p4186_p13, %p4185_p12 }
  0x26   :  { %p4188_p1 = pnand %p4187_p0, %p4181_p11 }
  0x28   :  { %4191 = shalt.err (!%p4188_p1)
}
  0x29   :  { %s4429_s25 = smov 128   ;;  %s4430_s19 = smov 8  }
  0x2a   :  { %76 = dma.hbm_to_vmem [thread:$0]  %s5182_s5, 1536, %s71_s22, [#allocation10], %s4429_s25, %s4429_s25, %s4430_s19  }
  0x2b   :  { %s4192_s26 = scalar_lea.hbm %s5184_s7, 512 }
  0x2c   :  { %p4193_p2 = scmp.ne.s32.totalorder %s5184_s7, %s4192_s26  ;;  %p4196_p3 = scmp.lt.u32.totalorder %s4192_s26, %s5184_s7 }
  0x2e   :  { %p4198_p4 = pnand %p4196_p3, %p4193_p2 }
  0x30   :  { %4201 = shalt.err (!%p4198_p4)
}
  0x31   :  { %s4202_s30 = scalar_lea.vmem %s95_s24, 512  ;;  %p4207_p6 = scmp.lt.s32.totalorder %s95_s24, %s95_s24 }
  0x32   :  { %p4203_p5 = scmp.ne.s32.totalorder %s95_s24, %s4202_s30  ;;  %p4208_p7 = scmp.lt.s32.totalorder %s4202_s30, %s4202_s30 }
  0x34   :  { %p4209_p8 = por %p4208_p7, %p4207_p6 }
  0x36   :  { %p4210_p9 = pnand %p4209_p8, %p4203_p5 }
  0x38   :  { %4213 = shalt.err (!%p4210_p9)
}
  0x39   :  { %100 = dma.hbm_to_vmem [thread:$0]  %s5184_s7, 512, %s95_s24, [#allocation13], %s4429_s25, %s4429_s25, %s4430_s19  }
  0x3a   :  { %s4431_s18 = smov [#allocation15]   ;;  %s4432_s1 = smov [#allocation18]  }
  0x3b   :  { %s116_s3 = sshll.u32 %s4431_s18, 4  ;;  %s143_s20 = sshll.u32 %s4432_s1, 4  ;;  %s117_s3 = int_to_ptr.vmem [resolvable:$true] %s116_s3  ;;  %s144_s20 = int_to_ptr.vmem [resolvable:$true] %s143_s20 }
  0x3c   :  { %s4214_s26 = scalar_lea.hbm %s5186_s9, 1536 }
  0x3d   :  { %p4215_p10 = scmp.ne.s32.totalorder %s5186_s9, %s4214_s26  ;;  %p4218_p11 = scmp.lt.u32.totalorder %s4214_s26, %s5186_s9 }
  0x3f   :  { %p4220_p12 = pnand %p4218_p11, %p4215_p10 }
  0x41   :  { %4223 = shalt.err (!%p4220_p12)
}
  0x42   :  { %s4224_s7 = scalar_lea.vmem %s117_s3, 1536  ;;  %p4229_p0 = scmp.lt.s32.totalorder %s117_s3, %s117_s3 }
  0x43   :  { %p4225_p13 = scmp.ne.s32.totalorder %s117_s3, %s4224_s7  ;;  %p4230_p1 = scmp.lt.s32.totalorder %s4224_s7, %s4224_s7 }
  0x45   :  { %p4231_p2 = por %p4230_p1, %p4229_p0 }
  0x47   :  { %p4232_p3 = pnand %p4231_p2, %p4225_p13 }
  0x49   :  { %4235 = shalt.err (!%p4232_p3)
}
  0x4a   :  { %122 = dma.hbm_to_vmem [thread:$0]  %s5186_s9, 1536, %s117_s3, [#allocation16], %s4429_s25, %s4429_s25, %s4430_s19  }
  0x4b   :  { %s4236_s18 = scalar_lea.hbm %s5189_s12, 128 }
  0x4c   :  { %p4237_p4 = scmp.ne.s32.totalorder %s5189_s12, %s4236_s18  ;;  %p4240_p5 = scmp.lt.u32.totalorder %s4236_s18, %s5189_s12 }
  0x4e   :  { %p4242_p6 = pnand %p4240_p5, %p4237_p4 }
  0x50   :  { %4245 = shalt.err (!%p4242_p6)
}
  0x51   :  { %s4246_s27 = scalar_lea.vmem %s144_s20, 128  ;;  %p4251_p8 = scmp.lt.s32.totalorder %s144_s20, %s144_s20 }
  0x52   :  { %p4247_p7 = scmp.ne.s32.totalorder %s144_s20, %s4246_s27  ;;  %p4252_p9 = scmp.lt.s32.totalorder %s4246_s27, %s4246_s27 }
  0x54   :  { %p4253_p10 = por %p4252_p9, %p4251_p8 }
  0x56   :  { %p4254_p11 = pnand %p4253_p10, %p4247_p7 }
  0x58   :  { %4257 = shalt.err (!%p4254_p11)
}
  0x59   :  { %146 = dma.hbm_to_vmem [thread:$0]  %s5189_s12, 128, %s144_s20, [#allocation19]  }
  0x5a   :  { %s4433_s28 = smov [#allocation3]   ;;  %s4434_s0 = smov [#allocation8]  }
  0x5b   :  { %s38_s29 = sshll.u32 %s4433_s28, 4  ;;  %s61_s7 = sshll.u32 %s4434_s0, 4  ;;  %s39_s29 = int_to_ptr.vmem [resolvable:$true] %s38_s29  ;;  %s62_s7 = int_to_ptr.vmem [resolvable:$true] %s61_s7 }
  0x5c   :  { %s4258_s5 = scalar_lea.hbm %s5179_s2, 1536 }
  0x5d   :  { %p4259_p12 = scmp.ne.s32.totalorder %s5179_s2, %s4258_s5  ;;  %p4262_p13 = scmp.lt.u32.totalorder %s4258_s5, %s5179_s2 }
  0x5f   :  { %p4264_p0 = pnand %p4262_p13, %p4259_p12 }
  0x61   :  { %4267 = shalt.err (!%p4264_p0)
}
  0x62   :  { %s4268_s12 = scalar_lea.vmem %s39_s29, 1536  ;;  %p4273_p2 = scmp.lt.s32.totalorder %s39_s29, %s39_s29 }
  0x63   :  { %p4269_p1 = scmp.ne.s32.totalorder %s39_s29, %s4268_s12  ;;  %p4274_p3 = scmp.lt.s32.totalorder %s4268_s12, %s4268_s12 }
  0x65   :  { %p4275_p4 = por %p4274_p3, %p4273_p2 }
  0x67   :  { %p4276_p5 = pnand %p4275_p4, %p4269_p1 }
  0x69   :  { %4279 = shalt.err (!%p4276_p5)
}
  0x6a   :  { %44 = dma.hbm_to_vmem [thread:$0]  %s5179_s2, 1536, %s39_s29, [#allocation4], %s4429_s25, %s4429_s25, %s4430_s19  }
  0x6b   :  { %s4280_s9 = scalar_lea.hbm %s5181_s4, 128 }
  0x6c   :  { %p4281_p6 = scmp.ne.s32.totalorder %s5181_s4, %s4280_s9  ;;  %p4284_p7 = scmp.lt.u32.totalorder %s4280_s9, %s5181_s4 }
  0x6e   :  { %p4286_p8 = pnand %p4284_p7, %p4281_p6 }
  0x70   :  { %4289 = shalt.err (!%p4286_p8)
}
  0x71   :  { %s4290_s30 = scalar_lea.vmem %s62_s7, 128  ;;  %p4295_p10 = scmp.lt.s32.totalorder %s62_s7, %s62_s7 }
  0x72   :  { %p4291_p9 = scmp.ne.s32.totalorder %s62_s7, %s4290_s30  ;;  %p4296_p11 = scmp.lt.s32.totalorder %s4290_s30, %s4290_s30 }
  0x74   :  { %p4297_p12 = por %p4296_p11, %p4295_p10 }
  0x76   :  { %p4298_p13 = pnand %p4297_p12, %p4291_p9 }
  0x78   :  { %4301 = shalt.err (!%p4298_p13)
}
  0x79   :  { %64 = dma.hbm_to_vmem [thread:$0]  %s5181_s4, 128, %s62_s7, [#allocation7]  }
  0x7a   :  { %s4435_s5 = smov [#allocation11]   ;;  %s4436_s18 = smov [#allocation14]  }
  0x7b   :  { %s82_s22 = sshll.u32 %s4435_s5, 4  ;;  %s107_s1 = sshll.u32 %s4436_s18, 4  ;;  %s83_s22 = int_to_ptr.vmem [resolvable:$true] %s82_s22  ;;  %s108_s1 = int_to_ptr.vmem [resolvable:$true] %s107_s1 }
  0x7c   :  { %s4302_s20 = scalar_lea.hbm %s5183_s6, 1536 }
  0x7d   :  { %p4303_p0 = scmp.ne.s32.totalorder %s5183_s6, %s4302_s20  ;;  %p4306_p1 = scmp.lt.u32.totalorder %s4302_s20, %s5183_s6 }
  0x7f   :  { %p4308_p2 = pnand %p4306_p1, %p4303_p0 }
  0x81   :  { %4311 = shalt.err (!%p4308_p2)
}
  0x82   :  { %s4312_s4 = scalar_lea.vmem %s83_s22, 1536  ;;  %p4317_p4 = scmp.lt.s32.totalorder %s83_s22, %s83_s22 }
  0x83   :  { %p4313_p3 = scmp.ne.s32.totalorder %s83_s22, %s4312_s4  ;;  %p4318_p5 = scmp.lt.s32.totalorder %s4312_s4, %s4312_s4 }
  0x85   :  { %p4319_p6 = por %p4318_p5, %p4317_p4 }
  0x87   :  { %p4320_p7 = pnand %p4319_p6, %p4313_p3 }
  0x89   :  { %4323 = shalt.err (!%p4320_p7)
}
  0x8a   :  { %88 = dma.hbm_to_vmem [thread:$0]  %s5183_s6, 1536, %s83_s22, [#allocation10], %s4429_s25, %s4429_s25, %s4430_s19  }
  0x8b   :  { %s4324_s24 = scalar_lea.hbm %s5185_s8, 128 }
  0x8c   :  { %p4325_p8 = scmp.ne.s32.totalorder %s5185_s8, %s4324_s24  ;;  %p4328_p9 = scmp.lt.u32.totalorder %s4324_s24, %s5185_s8 }
  0x8e   :  { %p4330_p10 = pnand %p4328_p9, %p4325_p8 }
  0x90   :  { %4333 = shalt.err (!%p4330_p10)
}
  0x91   :  { %s4334_s18 = scalar_lea.vmem %s108_s1, 128  ;;  %p4339_p12 = scmp.lt.s32.totalorder %s108_s1, %s108_s1 }
  0x92   :  { %p4335_p11 = scmp.ne.s32.totalorder %s108_s1, %s4334_s18  ;;  %p4340_p13 = scmp.lt.s32.totalorder %s4334_s18, %s4334_s18 }
  0x94   :  { %p4341_p0 = por %p4340_p13, %p4339_p12 }
  0x96   :  { %p4342_p1 = pnand %p4341_p0, %p4335_p11 }
  0x98   :  { %4345 = shalt.err (!%p4342_p1)
}
  0x99   :  { %110 = dma.hbm_to_vmem [thread:$0]  %s5185_s8, 128, %s108_s1, [#allocation13]  }
  0x9a   :  { %s4437_s21 = smov [#allocation17]   ;;  %s4438_s20 = smov [#allocation20]  }
  0x9b   :  { %s128_s12 = sshll.u32 %s4437_s21, 4  ;;  %s152_s23 = sshll.u32 %s4438_s20, 4  ;;  %s129_s12 = int_to_ptr.vmem [resolvable:$true] %s128_s12  ;;  %s153_s23 = int_to_ptr.vmem [resolvable:$true] %s152_s23 }
  0x9c   :  { %s4346_s9 = scalar_lea.hbm %s5187_s10, 1536 }
  0x9d   :  { %p4347_p2 = scmp.ne.s32.totalorder %s5187_s10, %s4346_s9  ;;  %p4350_p3 = scmp.lt.u32.totalorder %s4346_s9, %s5187_s10 }
  0x9f   :  { %p4352_p4 = pnand %p4350_p3, %p4347_p2 }
  0xa1   :  { %4355 = shalt.err (!%p4352_p4)
}
  0xa2   :  { %s4356_s8 = scalar_lea.vmem %s129_s12, 1536  ;;  %p4361_p6 = scmp.lt.s32.totalorder %s129_s12, %s129_s12 }
  0xa3   :  { %p4357_p5 = scmp.ne.s32.totalorder %s129_s12, %s4356_s8  ;;  %p4362_p7 = scmp.lt.s32.totalorder %s4356_s8, %s4356_s8 }
  0xa5   :  { %p4363_p8 = por %p4362_p7, %p4361_p6 }
  0xa7   :  { %p4364_p9 = pnand %p4363_p8, %p4357_p5 }
  0xa9   :  { %4367 = shalt.err (!%p4364_p9)
}
  0xaa   :  { %134 = dma.hbm_to_vmem [thread:$0]  %s5187_s10, 1536, %s129_s12, [#allocation16], %s4429_s25, %s4429_s25, %s4430_s19  }
  0xab   :  { %s4368_s2 = scalar_lea.hbm %s5190_s13, 1536 }
  0xac   :  { %p4369_p10 = scmp.ne.s32.totalorder %s5190_s13, %s4368_s2  ;;  %p4372_p11 = scmp.lt.u32.totalorder %s4368_s2, %s5190_s13 }
  0xae   :  { %p4374_p12 = pnand %p4372_p11, %p4369_p10 }
  0xb0   :  { %4377 = shalt.err (!%p4374_p12)
}
  0xb1   :  { %s4378_s22 = scalar_lea.vmem %s153_s23, 1536  ;;  %p4383_p0 = scmp.lt.s32.totalorder %s153_s23, %s153_s23 }
  0xb2   :  { %p4379_p13 = scmp.ne.s32.totalorder %s153_s23, %s4378_s22  ;;  %p4384_p1 = scmp.lt.s32.totalorder %s4378_s22, %s4378_s22 }
  0xb4   :  { %p4385_p2 = por %p4384_p1, %p4383_p0 }
  0xb6   :  { %p4386_p3 = pnand %p4385_p2, %p4379_p13 }
  0xb8   :  { %4389 = shalt.err (!%p4386_p3)
}
  0xb9   :  { %158 = dma.hbm_to_vmem [thread:$0]  %s5190_s13, 1536, %s153_s23, [#allocation19], %s4429_s25, %s4429_s25, %s4430_s19  }
  0xba   :  { %4412 = dma.done.wait [#allocation4], 1536  }
  0xbb   :  { %4413 = vsyncadd [#allocation4], 4294965760 }
  0xbc   :  { %4414 = dma.done.wait [#allocation7], 256  }
  0xbd   :  { %4415 = vsyncadd [#allocation7], 4294967040 }
  0xbe   :  { %4416 = dma.done.wait [#allocation10], 3072  }
  0xbf   :  { %4417 = vsyncadd [#allocation10], 4294964224 }
  0xc0   :  { %4418 = dma.done.wait [#allocation13], 640  }
  0xc1   :  { %4419 = vsyncadd [#allocation13], 4294966656 }
  0xc2   :  { %4420 = dma.done.wait [#allocation16], 3072  }
  0xc3   :  { %4421 = vsyncadd [#allocation16], 4294964224 }
  0xc4   :  { %4422 = dma.done.wait [#allocation19], 1664  }
  0xc5   :  { %4423 = vsyncadd [#allocation19], 4294965632  ;;  %v198_v0 = vlaneseq  ;;  %vm298_vm0 = vcmask 64512   ;;  %s5199_s19 = sld [smem:[#allocation30_spill]]  ;;  %s5200_s23 = sld [smem:[#allocation29_spill]]  ;;  %v1044_v32 = vld [vmem:[#allocation6] sm:$0xff] }
  0xc6   :  { %v683_v33 = vld [vmem:[#allocation3 + $0x20] sm:$0xff]  ;;  %v684_v34 = vld [vmem:[#allocation3 + $0x28] sm:$0xff]  ;;  %v685_v36 = vld [vmem:[#allocation3 + $0x30] sm:$0xff]  ;;  %vm598_vm5 = vcmask 261120   ;;  %vm4440_vm10 = vmmov 0   ;;  %vm2930_vm14 = vcmask 257024  }
  0xc7   :  { %v4686_v1 = vshrl.u32 %v198_v0, 7  ;;  %v3903_v35 = vpack.c.bf16 %v684_v34, %v683_v33  ;;  %v686_v37 = vld [vmem:[#allocation3 + $0x38] sm:$0xff]  ;;  %v678_v39 = vld [vmem:[#allocation3] sm:$0xff]  ;;  %v679_v40 = vld [vmem:[#allocation3 + $0x8] sm:$0xff]  ;;  %s4442_s25 = smov [#allocation21]  }
  0xc8   :  { %v3907_v38 = vpack.c.bf16 %v686_v37, %v685_v36  ;;  %v4780_v41 = vpack.c.bf16 %v679_v40, %v678_v39  ;;  %v680_v40 = vld [vmem:[#allocation3 + $0x10] sm:$0xff] }
  0xc9   :  { %v207_v2 = vand.u32 15, %v4686_v1  ;;  %v201_v3 = vadd.s32 16, %v4686_v1  ;;  %v4724_v15 = vadd.s32 8, %v4686_v1  ;;  %v202_v21 = vadd.s32 24, %v4686_v1  ;;  %3904 = vmatprep.subr.bf16.mxu1 %v3903_v35 }
  0xca   :  { %3906 = vmatpush3.bf16.msra.mxu1 %v3903_v35 }
  0xcb   :  { %v3376_v4 = vld [vmem:[%s5199_s19 + $0x8] sm:$0xff]  ;;  %v260_v6 = vld [vmem:[%s5200_s23 + $0x10] sm:$0xff]  ;;  %v295_v7 = vld [vmem:[%s5199_s19] sm:$0xff]  ;;  %vm4706_vm1 = vcmp.eq.s32.totalorder %v207_v2, 0  ;;  %v221_v12 = vand.u32 15, %v201_v3  ;;  %v214_v20 = vand.u32 15, %v4724_v15  ;;  %3908 = vmatprep.subr.bf16.mxu1 %v3907_v38 }
  0xcc   :  { %v259_v5 = vld [vmem:[%s5200_s23 + $0x8] sm:$0xff]  ;;  %3598 = vmatprep.subr.mxu0 %v3376_v4  ;;  %v261_v8 = vld [vmem:[%s5200_s23 + $0x18] sm:$0xff]  ;;  %v3385_v11 = vld [vmem:[%s5199_s19 + $0x10] sm:$0xff]  ;;  %v228_v26 = vand.u32 15, %v202_v21  ;;  %s3362_s19 = sshll.u32 %s4442_s25, 4  ;;  %s3363_s19 = int_to_ptr.vmem [resolvable:$true] %s3362_s19 }
  0xcd   :  { %3600 = vmatprep.mubr.msk.f32.mxu0 %vm298_vm0, %v259_v5  ;;  %3599 = vmatpush3.msra.mxu0 %v3376_v4  ;;  %v263_v10 = vld [vmem:[%s5200_s23 + $0x7] sm:$0xff]  ;;  %vm4726_vm2 = vcmp.eq.s32.totalorder %v221_v12, 0  ;;  %v265_v17 = vld [vmem:[%s5200_s23 + $0x17] sm:$0xff]  ;;  %v264_v18 = vld [vmem:[%s5200_s23 + $0xf] sm:$0xff]  ;;  %vm4750_vm3 = vcmp.eq.s32.totalorder %v214_v20, 15  ;;  %p4395_p5 = scmp.lt.s32.totalorder %s3363_s19, %s3363_s19 }
  0xce   :  { %3601 = vmatmul.mubr.msk.f32.vlgmr.msra.gmra.mrb[0].mxu0 %vm298_vm0, %v260_v6  ;;  %3606 = vmatprep.subr.mxu0 %v295_v7  ;;  %v262_v13 = vld [vmem:[%s5200_s23 + $0x20] sm:$0xff]  ;;  %v275_v14 = vsel %vm4706_vm1, 0.0, %v263_v10  ;;  %v277_v19 = vsel %vm4726_vm2, 0.0, %v265_v17  ;;  %v279_v23 = vld [vmem:[%s5200_s23 + $0x9] sm:$0xff]  ;;  %v280_v25 = vld [vmem:[%s5200_s23 + $0x11] sm:$0xff]  ;;  %vm4764_vm4 = vcmp.eq.s32.totalorder %v228_v26, 15 }
  0xcf   :  { %3607 = vmatpush3.msra.mxu0 %v295_v7  ;;  %3603 = vmatprep.mubr.msk.f32.mxu0 %vm298_vm0, %v261_v8  ;;  %v266_v22 = vld [vmem:[%s5200_s23 + $0x1f] sm:$0xff]  ;;  %v292_v27 = vsel %vm4750_vm3, 0.0, %v280_v25  ;;  %v596_v21 = vld [vmem:[#allocation8] sm:$0x1]  ;;  %v597_v26 = vld [vmem:[#allocation8 + $0x1] sm:$0x1] }
  0xd0   :  { %3614 = vmatprep.subr.mxu0 %v3385_v11  ;;  %v281_v28 = vld [vmem:[%s5200_s23 + $0x19] sm:$0xff]  ;;  %v282_v30 = vld [vmem:[%s5200_s23 + $0x21] sm:$0xff]  ;;  %3910 = vmatpush3.bf16.msra.mxu1 %v3907_v38 }
  0xd1   :  { %v294_v31 = vsel %vm4764_vm4, 0.0, %v282_v30  ;;  %3912 = vmatprep.subr.bf16.mxu1 %v4780_v41 }
  0xd2   :  { %3604 = vmatmul.mubr.msk.f32.gmra.mrb[2].mxu0 %vm298_vm0, %v262_v13 }
  0xd3   :  { %3608 = vmatprep.mubr.msk.f32.mxu0 %vm298_vm0, %v275_v14 }
  0xd6   :  { %3609 = vmatmul.mubr.msk.f32.vlgmr.msra.gmra.mrb[0].mxu0 %vm298_vm0, %v264_v18 }
  0xd7   :  { %3615 = vmatpush3.msra.mxu0 %v3385_v11  ;;  %3611 = vmatprep.mubr.msk.f32.mxu0 %vm298_vm0, %v277_v19 }
  0xd8   :  { %3664 = vmatprep.subr.mxu0 %v1044_v32 }
  0xda   :  { %3612 = vmatmul.mubr.msk.f32.gmra.mrb[2].mxu0 %vm298_vm0, %v266_v22  ;;  %v4792_v22 = vsub.s32 0, %v4686_v1 }
  0xdb   :  { %3616 = vmatprep.mubr.msk.f32.mxu0 %vm298_vm0, %v279_v23 }
  0xde   :  { %3617 = vmatmul.mubr.msk.f32.vlgmr.msra.gmra.mrb[0].mxu0 %vm298_vm0, %v292_v27 }
  0xdf   :  { %3619 = vmatprep.mubr.msk.f32.mxu0 %vm298_vm0, %v281_v28  ;;  %3665 = vmatpush3.msra.mxu0 %v1044_v32 }
  0xe2   :  { %3620 = vmatmul.mubr.msk.f32.gmra.mrb[2].mxu0 %vm298_vm0, %v294_v31 }
  0xe3   :  { %3666 = vmatprep.mubr.msk.f32.mxu0 %vm298_vm0, %v259_v5 }
  0xe6   :  { %3667 = vmatmul.mubr.msk.f32.vlgmr.msra.gmra.mrb[4].mxu0 %vm298_vm0, %v260_v6 }
  0xe7   :  { %3669 = vmatprep.mubr.msk.f32.mxu0 %vm298_vm0, %v261_v8 }
  0xea   :  { %3670 = vmatmul.mubr.msk.f32.gmra.mrb[6].mxu0 %vm298_vm0, %v262_v13 }
 0x1b1   :  { %v3618_v42 = vpop.f32.mrb[0].mxu0 }
 0x1b2   :  { %v600_v43 = vsel %vm598_vm5, %v3618_v42, 0.0  ;;  %v614_v44 = vmul.f32 %v3618_v42, %v3618_v42  ;;  %v573_v45 = vpop.f32.mrb[1].mxu0 }
 0x1b3   :  { %v599_v46 = vsel %vm598_vm5, %v573_v45, 0.0  ;;  %v613_v47 = vmul.f32 %v573_v45, %v573_v45 }
 0x1b4   :  { %v618_v48 = vsel %vm598_vm5, %v614_v44, 0.0  ;;  %v601_v49 = vadd.f32 %v600_v43, %v599_v46  ;;  %v681_v43 = vld [vmem:[#allocation3 + $0x18] sm:$0xff] }
 0x1b5   :  { %v617_v50 = vsel %vm598_vm5, %v613_v47, 0.0  ;;  %v3621_v51 = vpop.f32.mrb[2].mxu0 }
 0x1b6   :  { %v619_v52 = vadd.f32 %v618_v48, %v617_v50  ;;  %v583_v53 = vpop.f32.mrb[3].mxu0  ;;  %v616_v54 = vmul.f32 %v3621_v51, %v3621_v51  ;;  %v604_v58 = vsel %vm598_vm5, %v3621_v51, 0.0 }
 0x1b7   :  { %v602_v55 = vsel %vm598_vm5, %v583_v53, 0.0  ;;  %v615_v56 = vmul.f32 %v583_v53, %v583_v53 }
 0x1b8   :  { %v603_v57 = vadd.f32 %v602_v55, %v601_v49  ;;  %v622_v62 = vsel %vm598_vm5, %v616_v54, 0.0  ;;  %v3915_v49 = vpack.c.bf16 %v681_v43, %v680_v40 }
 0x1b9   :  { %v620_v59 = vsel %vm598_vm5, %v615_v56, 0.0 }
 0x1ba   :  { %v605_v60 = vadd.f32 %v604_v58, %v603_v57  ;;  %v621_v61 = vadd.f32 %v620_v59, %v619_v52  ;;  %v885_v52 = vld [vmem:[#allocation3 + $0x58] sm:$0xff] }
 0x1bc   :  { %v606_v63 = vrot.slane %v605_v60, 4  ;;  %v623_v0 = vadd.f32 %v622_v62, %v621_v61 }
 0x1be   :  { %v607_v2 = vadd.f32 %v606_v63, %v605_v60  ;;  %v624_v3 = vrot.slane %v623_v0, 4  ;;  %v3668_v63 = vpop.f32.mrb[4].mxu0 }
 0x1c0   :  { %v608_v4 = vrot.slane %v607_v2, 2  ;;  %v625_v5 = vadd.f32 %v624_v3, %v623_v0  ;;  %v1133_v0 = vsel %vm598_vm5, %v3668_v63, 0.0  ;;  %v1111_v3 = vpop.f32.mrb[5].mxu0 }
 0x1c1   :  { %v1146_v24 = vmul.f32 %v1111_v3, %v1111_v3 }
 0x1c2   :  { %v609_v6 = vadd.f32 %v608_v4, %v607_v2  ;;  %v626_v7 = vrot.slane %v625_v5, 2  ;;  %v1147_v2 = vmul.f32 %v3668_v63, %v3668_v63  ;;  %v1132_v4 = vsel %vm598_vm5, %v1111_v3, 0.0 }
 0x1c4   :  { %v610_v8 = vrot.slane %v609_v6, 1  ;;  %v627_v10 = vadd.f32 %v626_v7, %v625_v5  ;;  %v1151_v5 = vsel %vm598_vm5, %v1147_v2, 0.0  ;;  %v1150_v7 = vsel %vm598_vm5, %v1146_v24, 0.0 }
 0x1c6   :  { %v611_v11 = vadd.f32 %v610_v8, %v609_v6  ;;  %v628_v12 = vrot.slane %v627_v10, 1  ;;  %v1134_v6 = vadd.f32 %v1133_v0, %v1132_v4  ;;  %v3671_v8 = vpop.f32.mrb[6].mxu0  ;;  %v1246_v0 = vld [vmem:[#allocation9 + $0x8] sm:$0xff] }
 0x1c7   :  { %v1121_v29 = vpop.f32.mrb[7].mxu0 }
 0x1c8   :  { %v612_v13 = vmul.f32 0.03125, %v611_v11  ;;  %v629_v14 = vadd.f32 %v628_v12, %v627_v10  ;;  %v1152_v10 = vadd.f32 %v1151_v5, %v1150_v7  ;;  %v1149_v11 = vmul.f32 %v3671_v8, %v3671_v8 }
 0x1c9   :  { %v1137_v12 = vsel %vm598_vm5, %v3671_v8, 0.0 }
 0x1ca   :  { %v630_v17 = vmul.f32 0.03125, %v629_v14  ;;  %v631_v18 = vmul.f32 %v612_v13, %v612_v13  ;;  %v1148_v14 = vmul.f32 %v1121_v29, %v1121_v29 }
 0x1cc   :  { %v632_v19 = vsub.f32 %v630_v17, %v631_v18  ;;  %v1155_v18 = vsel %vm598_vm5, %v1149_v11, 0.0 }
 0x1ce   :  { %v633_v20 = vadd.f32 1e-05, %v632_v19  ;;  %v1153_v19 = vsel %vm598_vm5, %v1148_v14, 0.0 }
 0x1d0   :  { %4124 = vrsqrt.f32 %v633_v20 }
 0x1da   :  { %v4125_v23 = vpop.eup %4124 }
 0x1db   :  { %v635_v25 = vmul.f32 %v4125_v23, %v596_v21  ;;  %v1154_v21 = vadd.f32 %v1153_v19, %v1152_v10 }
 0x1dd   :  { %v636_v27 = vmul.f32 %v635_v25, %v612_v13  ;;  %v641_v28 = vrot.slane %v635_v25, %v4792_v22  ;;  %v1135_v13 = vsel %vm598_vm5, %v1121_v29, 0.0  ;;  %v1156_v25 = vadd.f32 %v1155_v18, %v1154_v21 }
 0x1de   :  { %v1136_v17 = vadd.f32 %v1135_v13, %v1134_v6 }
 0x1df   :  { %v637_v30 = vsub.f32 %v597_v26, %v636_v27  ;;  %v644_v31 = vmul.f32 %v641_v28, %v583_v53  ;;  %v642_v32 = vmul.f32 %v641_v28, %v573_v45  ;;  %v643_v33 = vmul.f32 %v3618_v42, %v641_v28  ;;  %v882_v42 = vld [vmem:[#allocation3 + $0x40] sm:$0xff]  ;;  %v883_v45 = vld [vmem:[#allocation3 + $0x48] sm:$0xff] }
 0x1e0   :  { %v645_v34 = vmul.f32 %v3621_v51, %v641_v28  ;;  %v3919_v50 = vpack.c.bf16 %v883_v45, %v882_v42  ;;  %v884_v51 = vld [vmem:[#allocation3 + $0x50] sm:$0xff]  ;;  %v1138_v20 = vadd.f32 %v1137_v12, %v1136_v17  ;;  %v1157_v27 = vrot.slane %v1156_v25, 4 }
 0x1e1   :  { %v649_v35 = vrot.slane %v637_v30, %v4792_v22  ;;  %v3923_v56 = vpack.c.bf16 %v885_v52, %v884_v51 }
 0x1e2   :  { %v1139_v23 = vrot.slane %v1138_v20, 4  ;;  %v1158_v30 = vadd.f32 %v1157_v27, %v1156_v25 }
 0x1e3   :  { %v652_v36 = vadd.f32 %v649_v35, %v644_v31  ;;  %v650_v37 = vadd.f32 %v649_v35, %v642_v32  ;;  %v651_v38 = vadd.f32 %v649_v35, %v643_v33  ;;  %v653_v39 = vadd.f32 %v649_v35, %v645_v34 }
 0x1e4   :  { %v1140_v26 = vadd.f32 %v1139_v23, %v1138_v20  ;;  %v1159_v32 = vrot.slane %v1158_v30, 2 }
 0x1e5   :  { %v656_v44 = vmax.f32 %v652_v36, 0.0  ;;  %v654_v46 = vmax.f32 %v650_v37, 0.0  ;;  %v655_v47 = vmax.f32 %v651_v38, 0.0  ;;  %v657_v48 = vmax.f32 %v653_v39, 0.0 }
 0x1e6   :  { %v1141_v28 = vrot.slane %v1140_v26, 2  ;;  %v1160_v34 = vadd.f32 %v1159_v32, %v1158_v30 }
 0x1e7   :  { %660 = vst.msk [vmem:[#allocation2 + $0x18] sm:$0xff] %vm598_vm5, %v656_v44  ;;  %658 = vst.msk [vmem:[#allocation2 + $0x8] sm:$0xff] %vm598_vm5, %v654_v46  ;;  %3630 = vmatprep.mubr.msk.f32.mxu1 %vm598_vm5, %v654_v46  ;;  %v1130_v46 = vld [vmem:[#allocation8 + $0x4] sm:$0x1] }
 0x1e8   :  { %659 = vst.msk [vmem:[#allocation2 + $0x10] sm:$0xff] %vm598_vm5, %v655_v47  ;;  %661 = vst.msk [vmem:[#allocation2 + $0x20] sm:$0xff] %vm598_vm5, %v657_v48  ;;  %3631 = vmatmul.mubr.msk.f32.vlgmr.msra.gmra.mrb[0].mxu1 %vm598_vm5, %v655_v47  ;;  %v1142_v31 = vadd.f32 %v1141_v28, %v1140_v26  ;;  %v1161_v36 = vrot.slane %v1160_v34, 1 }
 0x1e9   :  { %3633 = vmatprep.mubr.msk.f32.mxu1 %vm598_vm5, %v656_v44  ;;  %3914 = vmatpush3.bf16.msra.mxu1 %v4780_v41 }
 0x1ea   :  { %3916 = vmatprep.subr.bf16.mxu1 %v3915_v49  ;;  %v1143_v33 = vrot.slane %v1142_v31, 1  ;;  %v1162_v38 = vadd.f32 %v1161_v36, %v1160_v34 }
 0x1ec   :  { %3634 = vmatmul.mubr.msk.f32.gmra.mrb[2].mxu1 %vm598_vm5, %v657_v48  ;;  %v1144_v35 = vadd.f32 %v1143_v33, %v1142_v31  ;;  %v1163_v39 = vmul.f32 0.03125, %v1162_v38 }
 0x1ed   :  { %3918 = vmatpush3.bf16.msra.mxu1 %v3915_v49  ;;  %v1131_v49 = vld [vmem:[#allocation8 + $0x5] sm:$0x1] }
 0x1ee   :  { %v662_v53 = vld [vmem:[#allocation2 + $0x7] sm:$0xff]  ;;  %3920 = vmatprep.subr.bf16.mxu1 %v3919_v50  ;;  %v1145_v37 = vmul.f32 0.03125, %v1144_v35 }
 0x1ef   :  { %v664_v54 = vld [vmem:[#allocation2 + $0x17] sm:$0xff]  ;;  %v666_v55 = vsel %vm4706_vm1, 0.0, %v662_v53  ;;  %v663_v57 = vld [vmem:[#allocation2 + $0xf] sm:$0xff]  ;;  %v665_v58 = vld [vmem:[#allocation2 + $0x1f] sm:$0xff] }
 0x1f0   :  { %3644 = vmatprep.mubr.msk.f32.mxu1 %vm598_vm5, %v666_v55  ;;  %v668_v41 = vsel %vm4726_vm2, 0.0, %v664_v54  ;;  %v670_v59 = vld [vmem:[#allocation2 + $0x9] sm:$0xff]  ;;  %v671_v60 = vld [vmem:[#allocation2 + $0x11] sm:$0xff]  ;;  %v672_v61 = vld [vmem:[#allocation2 + $0x19] sm:$0xff]  ;;  %v1164_v40 = vmul.f32 %v1145_v37, %v1145_v37 }
 0x1f1   :  { %3645 = vmatmul.mubr.msk.f32.vlgmr.msra.gmra.mrb[0].mxu1 %vm598_vm5, %v663_v57  ;;  %v675_v9 = vsel %vm4750_vm3, 0.0, %v671_v60  ;;  %v673_v16 = vld [vmem:[#allocation2 + $0x21] sm:$0xff] }
 0x1f2   :  { %3647 = vmatprep.mubr.msk.f32.mxu1 %vm598_vm5, %v668_v41  ;;  %3922 = vmatpush3.bf16.msra.mxu1 %v3919_v50  ;;  %v677_v62 = vsel %vm4764_vm4, 0.0, %v673_v16  ;;  %v1165_v43 = vsub.f32 %v1163_v39, %v1164_v40  ;;  %v1251_v60 = vld [vmem:[#allocation9 + $0x28] sm:$0xff]  ;;  %v1253_v16 = vld [vmem:[#allocation9 + $0x38] sm:$0xff] }
 0x1f3   :  { %3924 = vmatprep.subr.bf16.mxu1 %v3923_v56 }
 0x1f4   :  { %v1166_v44 = vadd.f32 1e-05, %v1165_v43 }
 0x1f5   :  { %3648 = vmatmul.mubr.msk.f32.gmra.mrb[2].mxu1 %vm598_vm5, %v665_v58 }
 0x1f6   :  { %3926 = vmatpush3.bf16.msra.mxu1 %v3923_v56  ;;  %3658 = vmatprep.mubr.msk.f32.mxu1 %vm598_vm5, %v670_v59  ;;  %4126 = vrsqrt.f32 %v1166_v44  ;;  %v1250_v59 = vld [vmem:[#allocation9 + $0x20] sm:$0xff] }
 0x1f9   :  { %3659 = vmatmul.mubr.msk.f32.vlgmr.msra.gmra.mrb[0].mxu1 %vm598_vm5, %v675_v9  ;;  %v3927_v9 = vpack.c.bf16 %v1251_v60, %v1250_v59 }
 0x1fa   :  { %3661 = vmatprep.mubr.msk.f32.mxu1 %vm598_vm5, %v672_v61  ;;  %v1252_v61 = vld [vmem:[#allocation9 + $0x30] sm:$0xff] }
 0x1fb   :  { %3928 = vmatprep.subr.bf16.mxu1 %v3927_v9 }
 0x1fc   :  { %3930 = vmatpush3.bf16.msra.mxu1 %v3927_v9 }
 0x1fd   :  { %3662 = vmatmul.mubr.msk.f32.gmra.mrb[2].mxu1 %vm598_vm5, %v677_v62  ;;  %v3931_v62 = vpack.c.bf16 %v1253_v16, %v1252_v61 }
 0x1ff   :  { %3932 = vmatprep.subr.bf16.mxu1 %v3931_v62 }
 0x200   :  { %v4127_v47 = vpop.eup %4126  ;;  %3934 = vmatpush3.bf16.msra.mxu1 %v3931_v62 }
 0x201   :  { %v1168_v48 = vmul.f32 %v4127_v47, %v1130_v46 }
 0x203   :  { %v1169_v42 = vmul.f32 %v1168_v48, %v1145_v37  ;;  %v1174_v45 = vrot.slane %v1168_v48, %v4792_v22 }
 0x205   :  { %v1170_v50 = vsub.f32 %v1131_v49, %v1169_v42  ;;  %v1175_v51 = vmul.f32 %v1174_v45, %v1111_v3  ;;  %v1176_v52 = vmul.f32 %v3668_v63, %v1174_v45  ;;  %v1177_v53 = vmul.f32 %v1174_v45, %v1121_v29  ;;  %v1245_v63 = vld [vmem:[#allocation9] sm:$0xff]  ;;  %v987_v49 = vld [vmem:[#allocation8 + $0x2] sm:$0x1] }
 0x206   :  { %v1178_v54 = vmul.f32 %v3671_v8, %v1174_v45  ;;  %v4839_v2 = vpack.c.bf16 %v1246_v0, %v1245_v63 }
 0x207   :  { %v1182_v55 = vrot.slane %v1170_v50, %v4792_v22  ;;  %v988_v50 = vld [vmem:[#allocation8 + $0x3] sm:$0x1] }
 0x208   :  { %3936 = vmatprep.subr.bf16.mxu1 %v4839_v2 }
 0x209   :  { %v4831_v56 = vadd.f32 %v1182_v55, %v1175_v51  ;;  %v4833_v57 = vadd.f32 %v1182_v55, %v1176_v52  ;;  %v4835_v41 = vadd.f32 %v1182_v55, %v1177_v53  ;;  %v4837_v58 = vadd.f32 %v1182_v55, %v1178_v54 }
 0x2cc   :  { %v3660_v3 = vpop.f32.mrb[0].mxu1 }
 0x2cd   :  { %v990_v4 = vsel %vm598_vm5, %v3660_v3, 0.0  ;;  %v1004_v24 = vmul.f32 %v3660_v3, %v3660_v3  ;;  %v964_v5 = vpop.f32.mrb[1].mxu1 }
 0x2ce   :  { %v989_v6 = vsel %vm598_vm5, %v964_v5, 0.0  ;;  %v1003_v7 = vmul.f32 %v964_v5, %v964_v5 }
 0x2cf   :  { %v1008_v8 = vsel %vm598_vm5, %v1004_v24, 0.0  ;;  %v991_v10 = vadd.f32 %v990_v4, %v989_v6 }
 0x2d0   :  { %v1007_v11 = vsel %vm598_vm5, %v1003_v7, 0.0  ;;  %v3663_v29 = vpop.f32.mrb[2].mxu1 }
 0x2d1   :  { %v1009_v12 = vadd.f32 %v1008_v8, %v1007_v11  ;;  %v974_v13 = vpop.f32.mrb[3].mxu1  ;;  %v1006_v14 = vmul.f32 %v3663_v29, %v3663_v29  ;;  %v994_v20 = vsel %vm598_vm5, %v3663_v29, 0.0 }
 0x2d2   :  { %v992_v17 = vsel %vm598_vm5, %v974_v13, 0.0  ;;  %v1005_v18 = vmul.f32 %v974_v13, %v974_v13 }
 0x2d3   :  { %v993_v19 = vadd.f32 %v992_v17, %v991_v10  ;;  %v1012_v26 = vsel %vm598_vm5, %v1006_v14, 0.0  ;;  %v1247_v10 = vld [vmem:[#allocation9 + $0x10] sm:$0xff]  ;;  %v1417_v14 = vld [vmem:[#allocation9 + $0x40] sm:$0xff]  ;;  %v1418_v17 = vld [vmem:[#allocation9 + $0x48] sm:$0xff] }
 0x2d4   :  { %v1010_v21 = vsel %vm598_vm5, %v1005_v18, 0.0  ;;  %v1210_v18 = vand.u32 7, %v4724_v15 }
 0x2d5   :  { %v995_v23 = vadd.f32 %v994_v20, %v993_v19  ;;  %v1011_v25 = vadd.f32 %v1010_v21, %v1009_v12  ;;  %v3943_v19 = vpack.c.bf16 %v1418_v17, %v1417_v14  ;;  %v1419_v20 = vld [vmem:[#allocation9 + $0x50] sm:$0xff]  ;;  %v1420_v21 = vld [vmem:[#allocation9 + $0x58] sm:$0xff] }
 0x2d6   :  { %vm4876_vm7 = vcmp.eq.s32.totalorder %v1210_v18, 0  ;;  %vm1226_vm9 = vcmp.eq.s32.totalorder %v1210_v18, 7 }
 0x2d7   :  { %v996_v27 = vrot.slane %v995_v23, 4  ;;  %v1013_v28 = vadd.f32 %v1012_v26, %v1011_v25  ;;  %v3947_v26 = vpack.c.bf16 %v1420_v21, %v1419_v20 }
 0x2d9   :  { %v997_v30 = vadd.f32 %v996_v27, %v995_v23  ;;  %v1014_v31 = vrot.slane %v1013_v28, 4  ;;  %v2018_v23 = vld [vmem:[#allocation15 + $0x20] sm:$0xff] }
 0x2db   :  { %v998_v32 = vrot.slane %v997_v30, 2  ;;  %v1015_v33 = vadd.f32 %v1014_v31, %v1013_v28  ;;  %v1866_v28 = vld [vmem:[#allocation12 + $0x8] sm:$0xff] }
 0x2dd   :  { %v999_v34 = vadd.f32 %v998_v32, %v997_v30  ;;  %v1016_v35 = vrot.slane %v1015_v33, 2  ;;  %v1867_v32 = vld [vmem:[#allocation12 + $0x10] sm:$0xff] }
 0x2df   :  { %v1000_v36 = vrot.slane %v999_v34, 1  ;;  %v1017_v37 = vadd.f32 %v1016_v35, %v1015_v33  ;;  %v1868_v33 = vld [vmem:[#allocation12 + $0x18] sm:$0xff] }
 0x2e1   :  { %v1001_v38 = vadd.f32 %v1000_v36, %v999_v34  ;;  %v1018_v39 = vrot.slane %v1017_v37, 1  ;;  %v3979_v34 = vpack.c.bf16 %v1868_v33, %v1867_v32  ;;  %v1568_v36 = vld [vmem:[#allocation11 + $0x20] sm:$0xff] }
 0x2e3   :  { %v1002_v40 = vmul.f32 0.03125, %v1001_v38  ;;  %v1019_v43 = vadd.f32 %v1018_v39, %v1017_v37  ;;  %v1569_v37 = vld [vmem:[#allocation11 + $0x28] sm:$0xff]  ;;  %v1570_v39 = vld [vmem:[#allocation11 + $0x30] sm:$0xff] }
 0x2e4   :  { %v3951_v38 = vpack.c.bf16 %v1569_v37, %v1568_v36 }
 0x2e5   :  { %v1020_v44 = vmul.f32 0.03125, %v1019_v43  ;;  %v1021_v46 = vmul.f32 %v1002_v40, %v1002_v40 }
 0x2e6   :  { %3952 = vmatprep.subr.bf16.mxu0 %v3951_v38 }
 0x2e7   :  { %v1022_v47 = vsub.f32 %v1020_v44, %v1021_v46  ;;  %3954 = vmatpush3.bf16.msra.mxu0 %v3951_v38  ;;  %v1563_v44 = vld [vmem:[#allocation11] sm:$0xff]  ;;  %v1564_v46 = vld [vmem:[#allocation11 + $0x8] sm:$0xff] }
 0x2e9   :  { %v1023_v48 = vadd.f32 1e-05, %v1022_v47  ;;  %v4887_v47 = vpack.c.bf16 %v1564_v46, %v1563_v44  ;;  %v1504_v44 = vld [vmem:[#allocation14] sm:$0x1] }
 0x2eb   :  { %4128 = vrsqrt.f32 %v1023_v48 }
 0x2f5   :  { %v4129_v42 = vpop.eup %4128 }
 0x2f6   :  { %v1025_v45 = vmul.f32 %v4129_v42, %v987_v49 }
 0x2f8   :  { %v1026_v51 = vmul.f32 %v1025_v45, %v1002_v40  ;;  %v1031_v52 = vrot.slane %v1025_v45, %v4792_v22  ;;  %v1571_v40 = vld [vmem:[#allocation11 + $0x38] sm:$0xff] }
 0x2f9   :  { %v3955_v43 = vpack.c.bf16 %v1571_v40, %v1570_v39 }
 0x2fa   :  { %v1027_v53 = vsub.f32 %v988_v50, %v1026_v51  ;;  %v1032_v54 = vmul.f32 %v1031_v52, %v964_v5  ;;  %v1033_v55 = vmul.f32 %v3660_v3, %v1031_v52  ;;  %v1034_v59 = vmul.f32 %v1031_v52, %v974_v13 }
 0x2fb   :  { %v1035_v60 = vmul.f32 %v3663_v29, %v1031_v52  ;;  %3956 = vmatprep.subr.bf16.mxu0 %v3955_v43 }
 0x2fc   :  { %v1039_v9 = vrot.slane %v1027_v53, %v4792_v22  ;;  %3958 = vmatpush3.bf16.msra.mxu0 %v3955_v43 }
 0x2fd   :  { %3960 = vmatprep.subr.bf16.mxu0 %v4887_v47 }
 0x2fe   :  { %v1040_v61 = vadd.f32 %v1039_v9, %v1032_v54  ;;  %v1041_v16 = vadd.f32 %v1039_v9, %v1033_v55  ;;  %v1042_v62 = vadd.f32 %v1039_v9, %v1034_v59  ;;  %v1043_v63 = vadd.f32 %v1039_v9, %v1035_v60 }
 0x300   :  { %v1187_v0 = vadd.f32 %v4831_v56, %v1040_v61  ;;  %v1188_v4 = vadd.f32 %v4833_v57, %v1041_v16  ;;  %v1189_v24 = vadd.f32 %v4835_v41, %v1042_v62  ;;  %v1190_v6 = vadd.f32 %v4837_v58, %v1043_v63  ;;  %v1248_v57 = vld [vmem:[#allocation9 + $0x18] sm:$0xff] }
 0x301   :  { %v1203_v56 = vand.u32 7, %v4686_v1  ;;  %v3939_v12 = vpack.c.bf16 %v1248_v57, %v1247_v10 }
 0x302   :  { %v1191_v7 = vmax.f32 %v1187_v0, 0.0  ;;  %v1192_v8 = vmax.f32 %v1188_v4, 0.0  ;;  %v1193_v5 = vmax.f32 %v1189_v24, 0.0  ;;  %v1194_v3 = vmax.f32 %v1190_v6, 0.0 }
 0x303   :  { %vm4863_vm6 = vcmp.eq.s32.totalorder %v1203_v56, 0  ;;  %vm1225_vm8 = vcmp.eq.s32.totalorder %v1203_v56, 7 }
 0x304   :  { %1195 = vst.msk [vmem:[#allocation2 + $0x8] sm:$0xff] %vm598_vm5, %v1191_v7  ;;  %1197 = vst.msk [vmem:[#allocation2 + $0x18] sm:$0xff] %vm598_vm5, %v1193_v5 }
 0x305   :  { %1196 = vst.msk [vmem:[#allocation2 + $0x10] sm:$0xff] %vm598_vm5, %v1192_v8  ;;  %1198 = vst.msk [vmem:[#allocation2 + $0x20] sm:$0xff] %vm598_vm5, %v1194_v3 }
 0x30c   :  { %v1228_v58 = vld [vmem:[#allocation2 + $0x8] ss:$2 sm:$0xff]  ;;  %v1230_v11 = vld [vmem:[#allocation2 + $0x18] ss:$2 sm:$0xff]  ;;  %v1232_v29 = vld [vmem:[#allocation2 + $0x7] ss:$2 sm:$0xff] }
 0x30d   :  { %3680 = vmatprep.mubr.msk.f32.mxu1 %vm598_vm5, %v1228_v58  ;;  %v1239_v13 = vsel %vm4863_vm6, 0.0, %v1232_v29  ;;  %v1234_v25 = vld [vmem:[#allocation2 + $0x17] ss:$2 sm:$0xff] }
 0x30e   :  { %3681 = vmatmul.mubr.msk.f32.vlgmr.msra.gmra.mrb[4].mxu1 %vm598_vm5, %v1230_v11  ;;  %v1240_v27 = vsel %vm4876_vm7, 0.0, %v1234_v25  ;;  %v1242_v30 = vld [vmem:[#allocation2 + $0x9] ss:$2 sm:$0xff]  ;;  %v1244_v35 = vld [vmem:[#allocation2 + $0x19] ss:$2 sm:$0xff] }
 0x30f   :  { %3938 = vmatpush3.bf16.msra.mxu1 %v4839_v2  ;;  %3691 = vmatprep.mubr.msk.f32.mxu1 %vm598_vm5, %v1239_v13  ;;  %v1865_v2 = vld [vmem:[#allocation12] sm:$0xff] }
 0x310   :  { %3940 = vmatprep.subr.bf16.mxu1 %v3939_v12  ;;  %v3975_v31 = vpack.c.bf16 %v1866_v28, %v1865_v2 }
 0x313   :  { %3942 = vmatpush3.bf16.msra.mxu1 %v3939_v12 }
 0x314   :  { %3944 = vmatprep.subr.bf16.mxu1 %v3943_v19 }
 0x316   :  { %3692 = vmatmul.mubr.msk.f32.vlgmr.msra.gmra.mrb[4].mxu1 %vm598_vm5, %v1240_v27 }
 0x317   :  { %3946 = vmatpush3.bf16.msra.mxu1 %v3943_v19  ;;  %3702 = vmatprep.mubr.msk.f32.mxu1 %vm598_vm5, %v1242_v30 }
 0x318   :  { %3948 = vmatprep.subr.bf16.mxu1 %v3947_v26 }
 0x31b   :  { %3950 = vmatpush3.bf16.msra.mxu1 %v3947_v26 }
 0x31c   :  { %3976 = vmatprep.subr.bf16.mxu1 %v3975_v31 }
 0x31e   :  { %3703 = vmatmul.mubr.msk.f32.vlgmr.msra.gmra.mrb[4].mxu1 %vm598_vm5, %v1244_v35 }
 0x31f   :  { %3978 = vmatpush3.bf16.msra.mxu1 %v3975_v31  ;;  %3746 = vmatprep.mubr.msk.f32.mxu1 %vm598_vm5, %v1228_v58 }
 0x320   :  { %3980 = vmatprep.subr.bf16.mxu1 %v3979_v34 }
 0x323   :  { %3982 = vmatpush3.bf16.msra.mxu1 %v3979_v34 }
 0x326   :  { %3747 = vmatmul.mubr.msk.f32.vlgmr.msra.gmra.mrb[6].mxu1 %vm598_vm5, %v1230_v11 }
 0x3f1   :  { %v4890_v48 = vpop.f32.mrb[4].mxu1 }
 0x3f2   :  { %v1507_v49 = vsel %vm598_vm5, %v4890_v48, 0.0  ;;  %v1517_v42 = vmul.f32 %v4890_v48, %v4890_v48  ;;  %v1493_v45 = vpop.f32.mrb[5].mxu1 }
 0x3f3   :  { %v1506_v50 = vsel %vm598_vm5, %v1493_v45, 0.0  ;;  %v1516_v51 = vmul.f32 %v1493_v45, %v1493_v45 }
 0x3f4   :  { %v1519_v52 = vsel %vm598_vm5, %v1517_v42, 0.0  ;;  %v1508_v53 = vadd.f32 %v1507_v49, %v1506_v50  ;;  %v1505_v42 = vld [vmem:[#allocation14 + $0x1] sm:$0x1] }
 0x3f5   :  { %v1518_v54 = vsel %vm598_vm5, %v1516_v51, 0.0 }
 0x3f6   :  { %v1509_v55 = vrot.slane %v1508_v53, 4  ;;  %v1520_v59 = vadd.f32 %v1519_v52, %v1518_v54 }
 0x3f8   :  { %v1510_v60 = vadd.f32 %v1509_v55, %v1508_v53  ;;  %v1521_v9 = vrot.slane %v1520_v59, 4  ;;  %v1944_v55 = vld [vmem:[#allocation14 + $0x4] sm:$0x1] }
 0x3f9   :  { %v4899_v61 = vpop.f32.mrb[6].mxu1 }
 0x3fa   :  { %v1511_v16 = vrot.slane %v1510_v60, 2  ;;  %v1522_v62 = vadd.f32 %v1521_v9, %v1520_v59  ;;  %v1947_v63 = vsel %vm598_vm5, %v4899_v61, 0.0  ;;  %v1957_v0 = vmul.f32 %v4899_v61, %v4899_v61  ;;  %v4905_v4 = vpop.f32.mrb[7].mxu1 }
 0x3fb   :  { %v1946_v24 = vsel %vm598_vm5, %v4905_v4, 0.0  ;;  %v1956_v6 = vmul.f32 %v4905_v4, %v4905_v4 }
 0x3fc   :  { %v1512_v7 = vadd.f32 %v1511_v16, %v1510_v60  ;;  %v1523_v8 = vrot.slane %v1522_v62, 2  ;;  %v1959_v5 = vsel %vm598_vm5, %v1957_v0, 0.0  ;;  %v1948_v3 = vadd.f32 %v1947_v63, %v1946_v24  ;;  %v1565_v63 = vld [vmem:[#allocation11 + $0x10] sm:$0xff]  ;;  %v1566_v0 = vld [vmem:[#allocation11 + $0x18] sm:$0xff]  ;;  %v1945_v24 = vld [vmem:[#allocation14 + $0x5] sm:$0x1] }
 0x3fd   :  { %v1958_v10 = vsel %vm598_vm5, %v1956_v6, 0.0 }
 0x3fe   :  { %v1513_v57 = vrot.slane %v1512_v7, 1  ;;  %v1524_v58 = vadd.f32 %v1523_v8, %v1522_v62  ;;  %v1949_v11 = vrot.slane %v1948_v3, 4  ;;  %v1960_v29 = vadd.f32 %v1959_v5, %v1958_v10 }
 0x400   :  { %v1514_v12 = vadd.f32 %v1513_v57, %v1512_v7  ;;  %v1525_v13 = vrot.slane %v1524_v58, 1  ;;  %v1950_v14 = vadd.f32 %v1949_v11, %v1948_v3  ;;  %v1961_v17 = vrot.slane %v1960_v29, 4  ;;  %v1735_v57 = vld [vmem:[#allocation11 + $0x40] sm:$0xff] }
 0x401   :  { %v3963_v3 = vpack.c.bf16 %v1566_v0, %v1565_v63  ;;  %v1822_v0 = vld [vmem:[#allocation14 + $0x2] sm:$0x1] }
 0x402   :  { %v1515_v19 = vmul.f32 0.0625, %v1514_v12  ;;  %v1526_v20 = vadd.f32 %v1525_v13, %v1524_v58  ;;  %v1951_v21 = vrot.slane %v1950_v14, 2  ;;  %v1962_v25 = vadd.f32 %v1961_v17, %v1960_v29  ;;  %v1736_v58 = vld [vmem:[#allocation11 + $0x48] sm:$0xff] }
 0x403   :  { %v3967_v29 = vpack.c.bf16 %v1736_v58, %v1735_v57 }
 0x404   :  { %v1527_v26 = vmul.f32 0.0625, %v1526_v20  ;;  %v1528_v27 = vmul.f32 %v1515_v19, %v1515_v19  ;;  %v1952_v2 = vadd.f32 %v1951_v21, %v1950_v14  ;;  %v1963_v28 = vrot.slane %v1962_v25, 2  ;;  %v1737_v14 = vld [vmem:[#allocation11 + $0x50] sm:$0xff] }
 0x406   :  { %v1529_v30 = vsub.f32 %v1527_v26, %v1528_v27  ;;  %v1953_v31 = vrot.slane %v1952_v2, 1  ;;  %v1964_v32 = vadd.f32 %v1963_v28, %v1962_v25  ;;  %v2019_v26 = vld [vmem:[#allocation15 + $0x28] sm:$0xff]  ;;  %v2021_v28 = vld [vmem:[#allocation15 + $0x38] sm:$0xff] }
 0x407   :  { %v3984_v27 = vpack.c.bf16 %v2019_v26, %v2018_v23 }
 0x408   :  { %v1530_v33 = vadd.f32 1e-05, %v1529_v30  ;;  %v1954_v34 = vadd.f32 %v1953_v31, %v1952_v2  ;;  %v1965_v35 = vrot.slane %v1964_v32, 1  ;;  %v2020_v2 = vld [vmem:[#allocation15 + $0x30] sm:$0xff]  ;;  %v4439_v30 = vmov 0.0|0.0  }
 0x409   :  { %v4441_v31 = vmov 0.0   ;;  %v3987_v15 = vpack.c.bf16 %v2021_v28, %v2020_v2  ;;  %4001 = vmatprep.subr.bf16.mxu1 %v4439_v30  ;;  %v2172_v2 = vld [vmem:[#allocation15 + $0x58] sm:$0xff] }
 0x40a   :  { %4130 = vrsqrt.f32 %v1530_v33  ;;  %v1955_v36 = vmul.f32 0.0625, %v1954_v34  ;;  %v1966_v37 = vadd.f32 %v1965_v35, %v1964_v32  ;;  %3790 = vmatprep.mubr.msk.f32.mxu1 %vm4440_vm10, %v4441_v31 }
 0x40c   :  { %v1967_v38 = vmul.f32 0.0625, %v1966_v37  ;;  %v1968_v39 = vmul.f32 %v1955_v36, %v1955_v36 }
 0x40e   :  { %v1969_v40 = vsub.f32 %v1967_v38, %v1968_v39 }
 0x410   :  { %v1970_v43 = vadd.f32 1e-05, %v1969_v40 }
 0x412   :  { %4132 = vrsqrt.f32 %v1970_v43 }
 0x414   :  { %v4131_v46 = vpop.eup %4130 }
 0x415   :  { %v1532_v49 = vmul.f32 %v4131_v46, %v1504_v44 }
 0x417   :  { %v1533_v50 = vmul.f32 %v1532_v49, %v1515_v19  ;;  %v1538_v51 = vrot.slane %v1532_v49, %v4792_v22 }
 0x419   :  { %v1534_v52 = vsub.f32 %v1505_v42, %v1533_v50  ;;  %v1539_v53 = vmul.f32 %v1538_v51, %v1493_v45  ;;  %v1540_v54 = vmul.f32 %v4890_v48, %v1538_v51 }
 0x41b   :  { %v1544_v59 = vrot.slane %v1534_v52, %v4792_v22 }
 0x41c   :  { %v4133_v60 = vpop.eup %4132 }
 0x41d   :  { %v1545_v9 = vadd.f32 %v1544_v59, %v1539_v53  ;;  %v1546_v16 = vadd.f32 %v1544_v59, %v1540_v54  ;;  %v1972_v62 = vmul.f32 %v4133_v60, %v1944_v55 }
 0x41f   :  { %v1547_v6 = vmax.f32 %v1545_v9, 0.0  ;;  %v1548_v7 = vmax.f32 %v1546_v16, 0.0  ;;  %v1973_v8 = vmul.f32 %v1972_v62, %v1955_v36  ;;  %v1978_v5 = vrot.slane %v1972_v62, %v4792_v22 }
 0x421   :  { %1549 = vst.msk [vmem:[#allocation2 + $0x8] sm:$0xff] %vm598_vm5, %v1547_v6  ;;  %1550 = vst.msk [vmem:[#allocation2 + $0x10] sm:$0xff] %vm598_vm5, %v1548_v7  ;;  %v1974_v48 = vsub.f32 %v1945_v24, %v1973_v8  ;;  %v1979_v45 = vmul.f32 %v1978_v5, %v4905_v4  ;;  %v1980_v10 = vmul.f32 %v4899_v61, %v1978_v5  ;;  %3713 = vmatprep.mubr.msk.f32.mxu0 %vm598_vm5, %v1547_v6  ;;  %v1738_v4 = vld [vmem:[#allocation11 + $0x58] sm:$0xff] }
 0x422   :  { %3714 = vmatmul.mubr.msk.f32.vlgmr.msra.gmra.mrb[8].mxu0 %vm598_vm5, %v1548_v7  ;;  %v3971_v21 = vpack.c.bf16 %v1738_v4, %v1737_v14  ;;  %v1823_v7 = vld [vmem:[#allocation14 + $0x3] sm:$0x1] }
 0x423   :  { %v1984_v11 = vrot.slane %v1974_v48, %v4792_v22  ;;  %3962 = vmatpush3.bf16.msra.mxu0 %v4887_v47 }
 0x424   :  { %3964 = vmatprep.subr.bf16.mxu0 %v3963_v3 }
 0x425   :  { %v4925_v12 = vadd.f32 %v1984_v11, %v1979_v45  ;;  %v4927_v13 = vadd.f32 %v1984_v11, %v1980_v10 }
 0x427   :  { %3966 = vmatpush3.bf16.msra.mxu0 %v3963_v3 }
 0x428   :  { %v1551_v61 = vld [vmem:[#allocation2 + $0x7] sm:$0xff]  ;;  %v1552_v17 = vld [vmem:[#allocation2 + $0xf] sm:$0xff]  ;;  %3968 = vmatprep.subr.bf16.mxu0 %v3967_v29 }
 0x429   :  { %v1555_v19 = vld [vmem:[#allocation2 + $0x9] sm:$0xff]  ;;  %v1553_v20 = vsel %vm4863_vm6, 0.0, %v1551_v61  ;;  %v1554_v47 = vsel %vm4876_vm7, 0.0, %v1552_v17  ;;  %v1556_v56 = vld [vmem:[#allocation2 + $0x11] sm:$0xff] }
 0x42a   :  { %3724 = vmatprep.mubr.msk.f32.mxu0 %vm598_vm5, %v1553_v20  ;;  %v1561_v25 = vsel %vm1225_vm8, 0.0, %v1555_v19  ;;  %v1562_v41 = vsel %vm1226_vm9, 0.0, %v1556_v56  ;;  %v2013_v61 = vld [vmem:[#allocation15] sm:$0xff]  ;;  %v2014_v17 = vld [vmem:[#allocation15 + $0x8] sm:$0xff]  ;;  %v2015_v20 = vld [vmem:[#allocation15 + $0x10] sm:$0xff] }
 0x42b   :  { %3725 = vmatmul.mubr.msk.f32.vlgmr.msra.gmra.mrb[8].mxu0 %vm598_vm5, %v1554_v47  ;;  %v3990_v19 = vpack.c.bf16 %v2014_v17, %v2013_v61  ;;  %v2016_v47 = vld [vmem:[#allocation15 + $0x18] sm:$0xff]  ;;  %v2170_v56 = vld [vmem:[#allocation15 + $0x48] sm:$0xff] }
 0x42c   :  { %3970 = vmatpush3.bf16.msra.mxu0 %v3967_v29  ;;  %3735 = vmatprep.mubr.msk.f32.mxu0 %vm598_vm5, %v1561_v25  ;;  %v1997_v25 = vand.u32 3, %v4686_v1 }
 0x42d   :  { %3972 = vmatprep.subr.bf16.mxu0 %v3971_v21 }
 0x42e   :  { %vm4966_vm11 = vcmp.eq.s32.totalorder %v1997_v25, 0  ;;  %vm2006_vm12 = vcmp.eq.s32.totalorder %v1997_v25, 3 }
 0x430   :  { %3974 = vmatpush3.bf16.msra.mxu0 %v3971_v21 }
 0x431   :  { %3983 = vmatprep.subr.bf16.mxu0 %v4439_v30 }
 0x433   :  { %3736 = vmatmul.mubr.msk.f32.vlgmr.msra.gmra.mrb[8].mxu0 %vm598_vm5, %v1562_v41  ;;  %v2699_v41 = vld [vmem:[#allocation20 + $0x20] sm:$0xff] }
 0x434   :  { %3757 = vmatprep.mubr.msk.f32.mxu0 %vm4440_vm10, %v4441_v31  ;;  %3985 = vmatpush3.bf16.msra.mxu0 %v3984_v27  ;;  %v2171_v27 = vld [vmem:[#allocation15 + $0x50] sm:$0xff] }
 0x435   :  { %3986 = vmatprep.subr.bf16.mxu0 %v4439_v30 }
 0x438   :  { %3988 = vmatpush3.bf16.msra.mxu0 %v3987_v15  ;;  %v3999_v15 = vpack.c.bf16 %v2172_v2, %v2171_v27  ;;  %v2447_v27 = vld [vmem:[#allocation17 + $0x40] sm:$0xff]  ;;  %v2448_v2 = vld [vmem:[#allocation17 + $0x48] sm:$0xff] }
 0x439   :  { %3989 = vmatprep.subr.bf16.mxu0 %v4439_v30 }
 0x506   :  { %v3737_v18 = vpop.f32.mrb[8].mxu0 }
 0x507   :  { %v1825_v32 = vsel %vm598_vm5, %v3737_v18, 0.0  ;;  %v1835_v33 = vmul.f32 %v3737_v18, %v3737_v18  ;;  %v1811_v34 = vpop.f32.mrb[9].mxu0 }
 0x508   :  { %v1824_v35 = vsel %vm598_vm5, %v1811_v34, 0.0  ;;  %v1834_v36 = vmul.f32 %v1811_v34, %v1811_v34 }
 0x509   :  { %v1837_v37 = vsel %vm598_vm5, %v1835_v33, 0.0  ;;  %v1826_v38 = vadd.f32 %v1825_v32, %v1824_v35  ;;  %v2562_v32 = vld [vmem:[%s5188_s11 + $0x8] sm:$0xff]  ;;  %v2564_v35 = vld [vmem:[%s5188_s11 + $0x18] sm:$0xff] }
 0x50a   :  { %v1836_v39 = vsel %vm598_vm5, %v1834_v36, 0.0 }
 0x50b   :  { %v1827_v40 = vrot.slane %v1826_v38, 4  ;;  %v1838_v43 = vadd.f32 %v1837_v37, %v1836_v39  ;;  %v2297_v39 = vld [vmem:[#allocation17 + $0x28] sm:$0xff] }
 0x50d   :  { %v1828_v44 = vadd.f32 %v1827_v40, %v1826_v38  ;;  %v1839_v46 = vrot.slane %v1838_v43, 4  ;;  %v2296_v38 = vld [vmem:[#allocation17 + $0x20] sm:$0xff] }
 0x50e   :  { %v4002_v40 = vpack.c.bf16 %v2297_v39, %v2296_v38  ;;  %v2701_v39 = vld [vmem:[#allocation20 + $0x30] sm:$0xff] }
 0x50f   :  { %v1829_v49 = vrot.slane %v1828_v44, 2  ;;  %v1840_v42 = vadd.f32 %v1839_v46, %v1838_v43  ;;  %v2298_v43 = vld [vmem:[#allocation17 + $0x30] sm:$0xff] }
 0x510   :  { %4003 = vmatpush3.bf16.msra.mxu1 %v4002_v40  ;;  %v2702_v40 = vld [vmem:[#allocation20 + $0x38] sm:$0xff] }
 0x511   :  { %v1830_v50 = vadd.f32 %v1829_v49, %v1828_v44  ;;  %v1841_v51 = vrot.slane %v1840_v42, 2  ;;  %4004 = vmatprep.subr.bf16.mxu1 %v4439_v30  ;;  %v2299_v44 = vld [vmem:[#allocation17 + $0x38] sm:$0xff] }
 0x512   :  { %v4005_v46 = vpack.c.bf16 %v2299_v44, %v2298_v43  ;;  %v4029_v43 = vpack.c.bf16 %v2702_v40, %v2701_v39 }
 0x513   :  { %v1831_v52 = vrot.slane %v1830_v50, 1  ;;  %v1842_v53 = vadd.f32 %v1841_v51, %v1840_v42 }
 0x514   :  { %4006 = vmatpush3.bf16.msra.mxu1 %v4005_v46 }
 0x515   :  { %v1832_v54 = vadd.f32 %v1831_v52, %v1830_v50  ;;  %v1843_v55 = vrot.slane %v1842_v53, 1  ;;  %4007 = vmatprep.subr.bf16.mxu1 %v4439_v30 }
 0x517   :  { %v1833_v59 = vmul.f32 0.0625, %v1832_v54  ;;  %v1844_v60 = vadd.f32 %v1843_v55, %v1842_v53 }
 0x519   :  { %v1845_v9 = vmul.f32 0.0625, %v1844_v60  ;;  %v1846_v16 = vmul.f32 %v1833_v59, %v1833_v59 }
 0x51b   :  { %v1847_v62 = vsub.f32 %v1845_v9, %v1846_v16 }
 0x51d   :  { %v1848_v63 = vadd.f32 1e-05, %v1847_v62 }
 0x51f   :  { %4134 = vrsqrt.f32 %v1848_v63 }
 0x529   :  { %v4135_v24 = vpop.eup %4134 }
 0x52a   :  { %v1850_v6 = vmul.f32 %v4135_v24, %v1822_v0 }
 0x52c   :  { %v1851_v8 = vmul.f32 %v1850_v6, %v1833_v59  ;;  %v1856_v5 = vrot.slane %v1850_v6, %v4792_v22 }
 0x52e   :  { %v1852_v3 = vsub.f32 %v1823_v7, %v1851_v8  ;;  %v1857_v48 = vmul.f32 %v1856_v5, %v1811_v34  ;;  %v1858_v45 = vmul.f32 %v3737_v18, %v1856_v5  ;;  %v2561_v18 = vld [vmem:[%s5188_s11] sm:$0xff]  ;;  %v2563_v34 = vld [vmem:[%s5188_s11 + $0x10] sm:$0xff] }
 0x52f   :  { %v4020_v33 = vpack.c.bf16 %v2562_v32, %v2561_v18  ;;  %v4023_v37 = vpack.c.bf16 %v2564_v35, %v2563_v34  ;;  %v2449_v18 = vld [vmem:[#allocation17 + $0x50] sm:$0xff]  ;;  %v2450_v32 = vld [vmem:[#allocation17 + $0x58] sm:$0xff] }
 0x530   :  { %v1862_v10 = vrot.slane %v1852_v3, %v4792_v22  ;;  %v4017_v34 = vpack.c.bf16 %v2450_v32, %v2449_v18  ;;  %v2525_v18 = vld [vmem:[#allocation18 + $0x2] sm:$0x1] }
 0x532   :  { %v1863_v57 = vadd.f32 %v1862_v10, %v1857_v48  ;;  %v1864_v58 = vadd.f32 %v1862_v10, %v1858_v45 }
 0x534   :  { %v1987_v11 = vadd.f32 %v4925_v12, %v1863_v57  ;;  %v1988_v29 = vadd.f32 %v4927_v13, %v1864_v58  ;;  %v3993_v12 = vpack.c.bf16 %v2016_v47, %v2015_v20  ;;  %v2169_v13 = vld [vmem:[#allocation15 + $0x40] sm:$0xff]  ;;  %v2292_v47 = vld [vmem:[#allocation17 + $0x8] sm:$0xff] }
 0x535   :  { %v3996_v26 = vpack.c.bf16 %v2170_v56, %v2169_v13  ;;  %v2247_v57 = vld [vmem:[#allocation18] sm:$0x1]  ;;  %v2293_v56 = vld [vmem:[#allocation17 + $0x10] sm:$0xff] }
 0x536   :  { %v1989_v14 = vmax.f32 %v1987_v11, 0.0  ;;  %v1990_v4 = vmax.f32 %v1988_v29, 0.0  ;;  %v2248_v29 = vld [vmem:[#allocation18 + $0x1] sm:$0x1] }
 0x537   :  { %v2291_v20 = vld [vmem:[#allocation17] sm:$0xff] }
 0x538   :  { %1991 = vst.msk [vmem:[#allocation2 + $0x8] sm:$0xff] %vm598_vm5, %v1989_v14  ;;  %1992 = vst.msk [vmem:[#allocation2 + $0x10] sm:$0xff] %vm598_vm5, %v1990_v4 }
 0x53f   :  { %v2007_v21 = vld [vmem:[#allocation2 + $0x8] ss:$2 sm:$0xff]  ;;  %v2008_v23 = vld [vmem:[#allocation2 + $0x7] ss:$2 sm:$0xff] }
 0x540   :  { %3758 = vmatmul.mubr.msk.f32.vlgmr.msra.gmra.mrb[10].mxu0 %vm598_vm5, %v2007_v21  ;;  %v2011_v28 = vsel %vm4966_vm11, 0.0, %v2008_v23  ;;  %v2012_v36 = vld [vmem:[#allocation2 + $0x9] ss:$2 sm:$0xff]  ;;  %v2294_v23 = vld [vmem:[#allocation17 + $0x18] sm:$0xff] }
 0x541   :  { %3991 = vmatpush3.bf16.msra.mxu0 %v3990_v19  ;;  %3768 = vmatprep.mubr.msk.f32.mxu0 %vm4440_vm10, %v4441_v31 }
 0x542   :  { %3992 = vmatprep.subr.bf16.mxu0 %v4439_v30 }
 0x545   :  { %3994 = vmatpush3.bf16.msra.mxu0 %v3993_v12  ;;  %v4008_v12 = vpack.c.bf16 %v2292_v47, %v2291_v20 }
 0x546   :  { %3995 = vmatprep.subr.bf16.mxu0 %v4439_v30 }
 0x548   :  { %3769 = vmatmul.mubr.msk.f32.vlgmr.msra.gmra.mrb[10].mxu0 %vm598_vm5, %v2011_v28  ;;  %v4014_v28 = vpack.c.bf16 %v2448_v2, %v2447_v27  ;;  %v2635_v27 = vld [vmem:[#allocation18 + $0x4] sm:$0x1] }
 0x549   :  { %3997 = vmatpush3.bf16.msra.mxu0 %v3996_v26  ;;  %3779 = vmatprep.mubr.msk.f32.mxu0 %vm4440_vm10, %v4441_v31  ;;  %v4011_v26 = vpack.c.bf16 %v2294_v23, %v2293_v56 }
 0x54a   :  { %3998 = vmatprep.subr.bf16.mxu0 %v4439_v30 }
 0x54d   :  { %4000 = vmatpush3.bf16.msra.mxu0 %v3999_v15 }
 0x54e   :  { %4019 = vmatprep.subr.bf16.mxu0 %v4439_v30 }
 0x550   :  { %3780 = vmatmul.mubr.msk.f32.vlgmr.msra.gmra.mrb[10].mxu0 %vm598_vm5, %v2012_v36 }
 0x551   :  { %4021 = vmatpush3.bf16.msra.mxu0 %v4020_v33  ;;  %3823 = vmatprep.mubr.msk.f32.mxu0 %vm4440_vm10, %v4441_v31 }
 0x552   :  { %4022 = vmatprep.subr.bf16.mxu0 %v4439_v30 }
 0x555   :  { %4024 = vmatpush3.bf16.msra.mxu0 %v4023_v37  ;;  %v2700_v37 = vld [vmem:[#allocation20 + $0x28] sm:$0xff] }
 0x556   :  { %4043 = vmatprep.subr.bf16.mxu0 %v4439_v30  ;;  %v4026_v38 = vpack.c.bf16 %v2700_v37, %v2699_v41 }
 0x558   :  { %3824 = vmatmul.mubr.msk.f32.vlgmr.msra.gmra.mrb[12].mxu0 %vm598_vm5, %v2007_v21 }
 0x559   :  { %3867 = vmatprep.mubr.msk.f32.mxu0 %vm4440_vm10, %v4441_v31 }
 0x623   :  { %v2242_v49 = vpop.f32.mrb[10].mxu0 }
 0x624   :  { %v2249_v42 = vsel %vm598_vm5, %v2242_v49, 0.0  ;;  %v2257_v50 = vmul.f32 %v2242_v49, %v2242_v49  ;;  %v3781_v51 = vpop.f32.mrb[11].mxu0 }
 0x625   :  { %v2250_v52 = vrot.slane %v2249_v42, 4 }
 0x626   :  { %v2258_v53 = vsel %vm598_vm5, %v2257_v50, 0.0 }
 0x627   :  { %v2251_v54 = vadd.f32 %v2250_v52, %v2249_v42  ;;  %v2259_v55 = vrot.slane %v2258_v53, 4 }
 0x629   :  { %v2252_v59 = vrot.slane %v2251_v54, 2  ;;  %v2260_v60 = vadd.f32 %v2259_v55, %v2258_v53 }
 0x62b   :  { %v2253_v9 = vadd.f32 %v2252_v59, %v2251_v54  ;;  %v2261_v16 = vrot.slane %v2260_v60, 2  ;;  %v5002_v62 = vpop.f32.mrb[12].mxu0 }
 0x62c   :  { %v3825_v63 = vpop.f32.mrb[13].mxu0  ;;  %v2637_v25 = vsel %vm598_vm5, %v5002_v62, 0.0  ;;  %v2645_v44 = vmul.f32 %v5002_v62, %v5002_v62 }
 0x62d   :  { %v2254_v0 = vrot.slane %v2253_v9, 1  ;;  %v2262_v24 = vadd.f32 %v2261_v16, %v2260_v60  ;;  %v2638_v46 = vrot.slane %v2637_v25, 4 }
 0x62f   :  { %v2255_v6 = vadd.f32 %v2254_v0, %v2253_v9  ;;  %v2263_v7 = vrot.slane %v2262_v24, 1  ;;  %v2639_v42 = vadd.f32 %v2638_v46, %v2637_v25 }
 0x631   :  { %v2256_v8 = vmul.f32 0.125, %v2255_v6  ;;  %v2264_v5 = vadd.f32 %v2263_v7, %v2262_v24  ;;  %v2640_v51 = vrot.slane %v2639_v42, 2 }
 0x633   :  { %v2265_v3 = vmul.f32 0.125, %v2264_v5  ;;  %v2266_v48 = vmul.f32 %v2256_v8, %v2256_v8  ;;  %v2641_v53 = vadd.f32 %v2640_v51, %v2639_v42  ;;  %v2695_v51 = vld [vmem:[#allocation20 + $0x8] sm:$0xff] }
 0x635   :  { %v2267_v45 = vsub.f32 %v2265_v3, %v2266_v48  ;;  %v2642_v55 = vrot.slane %v2641_v53, 1 }
 0x637   :  { %v2268_v10 = vadd.f32 1e-05, %v2267_v45  ;;  %v2643_v60 = vadd.f32 %v2642_v55, %v2641_v53  ;;  %v2696_v53 = vld [vmem:[#allocation20 + $0x10] sm:$0xff] }
 0x639   :  { %4136 = vrsqrt.f32 %v2268_v10  ;;  %v2644_v16 = vmul.f32 0.125, %v2643_v60  ;;  %v2850_v60 = vld [vmem:[#allocation20 + $0x40] sm:$0xff] }
 0x63b   :  { %v2654_v24 = vmul.f32 %v2644_v16, %v2644_v16 }
 0x643   :  { %v4137_v58 = vpop.eup %4136 }
 0x644   :  { %v2270_v11 = vmul.f32 %v4137_v58, %v2247_v57 }
 0x646   :  { %v2271_v14 = vmul.f32 %v2270_v11, %v2256_v8  ;;  %v2276_v4 = vrot.slane %v2270_v11, %v4792_v22 }
 0x648   :  { %v2272_v61 = vsub.f32 %v2248_v29, %v2271_v14  ;;  %v2277_v17 = vmul.f32 %v2276_v4, %v2242_v49  ;;  %v2646_v49 = vsel %vm598_vm5, %v2645_v44, 0.0 }
 0x649   :  { %v2647_v50 = vrot.slane %v2646_v49, 4 }
 0x64a   :  { %v2281_v19 = vrot.slane %v2272_v61, %v4792_v22 }
 0x64b   :  { %v2648_v52 = vadd.f32 %v2647_v50, %v2646_v49  ;;  %v2694_v50 = vld [vmem:[#allocation20] sm:$0xff] }
 0x64c   :  { %v2282_v21 = vadd.f32 %v2281_v19, %v2277_v17 }
 0x64d   :  { %v2649_v54 = vrot.slane %v2648_v52, 2 }
 0x64e   :  { %v2283_v13 = vmax.f32 %v2282_v21, 0.0 }
 0x64f   :  { %v2650_v59 = vadd.f32 %v2649_v54, %v2648_v52  ;;  %v4032_v52 = vpack.c.bf16 %v2695_v51, %v2694_v50  ;;  %v2697_v54 = vld [vmem:[#allocation20 + $0x18] sm:$0xff] }
 0x650   :  { %2284 = vst.msk [vmem:[#allocation2 + $0x8] sm:$0xff] %vm598_vm5, %v2283_v13  ;;  %3791 = vmatmul.mubr.msk.f32.vlgmr.msra.gmra.mrb[8].mxu1 %vm598_vm5, %v2283_v13 }
 0x651   :  { %4009 = vmatpush3.bf16.msra.mxu1 %v4008_v12  ;;  %3801 = vmatprep.mubr.msk.f32.mxu1 %vm4440_vm10, %v4441_v31  ;;  %v2651_v9 = vrot.slane %v2650_v59, 1 }
 0x652   :  { %4010 = vmatprep.subr.bf16.mxu1 %v4439_v30 }
 0x653   :  { %v2652_v63 = vadd.f32 %v2651_v9, %v2650_v59  ;;  %v2678_v59 = vand.u32 1, %v4686_v1  ;;  %v2851_v9 = vld [vmem:[#allocation20 + $0x48] sm:$0xff] }
 0x655   :  { %4012 = vmatpush3.bf16.msra.mxu1 %v4011_v26  ;;  %v2653_v0 = vmul.f32 0.125, %v2652_v63  ;;  %vm5046_vm13 = vcmp.eq.s32.totalorder %v2678_v59, 0  ;;  %vm2687_vm15 = vcmp.eq.s32.totalorder %v2678_v59, 1 }
 0x656   :  { %4013 = vmatprep.subr.bf16.mxu1 %v4439_v30 }
 0x657   :  { %v2285_v15 = vld [vmem:[#allocation2 + $0x7] sm:$0xff]  ;;  %v2655_v45 = vsub.f32 %v2653_v0, %v2654_v24  ;;  %v4038_v0 = vpack.c.bf16 %v2851_v9, %v2850_v60  ;;  %v2975_v9 = vld [vmem:[%s5191_s14 + $0x10] sm:$0xff] }
 0x658   :  { %v2286_v33 = vsel %vm4966_vm11, 0.0, %v2285_v15  ;;  %v2287_v35 = vld [vmem:[#allocation2 + $0x9] sm:$0xff]  ;;  %v2852_v24 = vld [vmem:[#allocation20 + $0x50] sm:$0xff] }
 0x659   :  { %3802 = vmatmul.mubr.msk.f32.vlgmr.msra.gmra.mrb[8].mxu1 %vm598_vm5, %v2286_v33  ;;  %v2290_v36 = vsel %vm2006_vm12, 0.0, %v2287_v35  ;;  %v2656_v29 = vadd.f32 1e-05, %v2655_v45  ;;  %v2636_v15 = vld [vmem:[#allocation18 + $0x5] sm:$0x1]  ;;  %v3245_v45 = vld [vmem:[%s5192_s15 + $0x10] sm:$0xff] }
 0x65a   :  { %4015 = vmatpush3.bf16.msra.mxu1 %v4014_v28  ;;  %3812 = vmatprep.mubr.msk.f32.mxu1 %vm4440_vm10, %v4441_v31  ;;  %v2526_v35 = vld [vmem:[#allocation18 + $0x3] sm:$0x1] }
 0x65b   :  { %4016 = vmatprep.subr.bf16.mxu1 %v4439_v30  ;;  %4138 = vrsqrt.f32 %v2656_v29  ;;  %v3431_v29 = vld [vmem:[%s5191_s14 + $0x28] sm:$0xff] }
 0x65e   :  { %4018 = vmatpush3.bf16.msra.mxu1 %v4017_v34 }
 0x65f   :  { %4025 = vmatprep.subr.bf16.mxu1 %v4439_v30 }
 0x661   :  { %3813 = vmatmul.mubr.msk.f32.vlgmr.msra.gmra.mrb[8].mxu1 %vm598_vm5, %v2290_v36 }
 0x662   :  { %3834 = vmatprep.mubr.msk.f32.mxu1 %vm4440_vm10, %v4441_v31  ;;  %4027 = vmatpush3.bf16.msra.mxu1 %v4026_v38 }
 0x663   :  { %4028 = vmatprep.subr.bf16.mxu1 %v4439_v30 }
 0x665   :  { %v4139_v26 = vpop.eup %4138 }
 0x666   :  { %4030 = vmatpush3.bf16.msra.mxu1 %v4029_v43  ;;  %v2658_v2 = vmul.f32 %v4139_v26, %v2635_v27 }
 0x667   :  { %4031 = vmatprep.subr.bf16.mxu1 %v4439_v30 }
 0x668   :  { %v2659_v28 = vmul.f32 %v2658_v2, %v2644_v16  ;;  %v2664_v36 = vrot.slane %v2658_v2, %v4792_v22 }
 0x66a   :  { %v2660_v33 = vsub.f32 %v2636_v15, %v2659_v28  ;;  %v2665_v40 = vmul.f32 %v2664_v36, %v5002_v62  ;;  %v4035_v62 = vpack.c.bf16 %v2697_v54, %v2696_v53  ;;  %v2973_v53 = vld [vmem:[%s5191_s14] sm:$0xff]  ;;  %v2974_v54 = vld [vmem:[%s5191_s14 + $0x8] sm:$0xff] }
 0x66c   :  { %v2669_v38 = vrot.slane %v2660_v33, %v4792_v22 }
 0x66e   :  { %v2670_v44 = vadd.f32 %v2669_v38, %v2665_v40 }
 0x734   :  { %v2520_v6 = vpop.f32.mrb[8].mxu1 }
 0x735   :  { %v2527_v7 = vsel %vm598_vm5, %v2520_v6, 0.0  ;;  %v2535_v8 = vmul.f32 %v2520_v6, %v2520_v6  ;;  %v3814_v5 = vpop.f32.mrb[9].mxu1 }
 0x736   :  { %v2528_v3 = vrot.slane %v2527_v7, 4  ;;  %v3243_v5 = vld [vmem:[%s5192_s15] sm:$0xff] }
 0x737   :  { %v2536_v48 = vsel %vm598_vm5, %v2535_v8, 0.0 }
 0x738   :  { %v2529_v10 = vadd.f32 %v2528_v3, %v2527_v7  ;;  %v2537_v57 = vrot.slane %v2536_v48, 4  ;;  %v3244_v3 = vld [vmem:[%s5192_s15 + $0x8] sm:$0xff] }
 0x73a   :  { %v2530_v58 = vrot.slane %v2529_v10, 2  ;;  %v2538_v11 = vadd.f32 %v2537_v57, %v2536_v48  ;;  %v4062_v48 = vpack.c.bf16 %v3244_v3, %v3243_v5  ;;  %v3438_v5 = vld [vmem:[%s5191_s14 + $0x50] sm:$0xff]  ;;  %v3439_v3 = vld [vmem:[%s5191_s14 + $0x58] sm:$0xff] }
 0x73c   :  { %v2531_v14 = vadd.f32 %v2530_v58, %v2529_v10  ;;  %v2539_v4 = vrot.slane %v2538_v11, 2  ;;  %v3246_v10 = vld [vmem:[%s5192_s15 + $0x18] sm:$0xff] }
 0x73d   :  { %v4065_v58 = vpack.c.bf16 %v3246_v10, %v3245_v45  ;;  %v4059_v45 = vpack.c.bf16 %v3439_v3, %v3438_v5 }
 0x73e   :  { %v2532_v61 = vrot.slane %v2531_v14, 1  ;;  %v2540_v17 = vadd.f32 %v2539_v4, %v2538_v11  ;;  %v3430_v11 = vld [vmem:[%s5191_s14 + $0x20] sm:$0xff]  ;;  %v3432_v4 = vld [vmem:[%s5191_s14 + $0x30] sm:$0xff] }
 0x740   :  { %v2533_v19 = vadd.f32 %v2532_v61, %v2531_v14  ;;  %v2541_v20 = vrot.slane %v2540_v17, 1  ;;  %v4044_v14 = vpack.c.bf16 %v3431_v29, %v3430_v11  ;;  %v3433_v61 = vld [vmem:[%s5191_s14 + $0x38] sm:$0xff] }
 0x742   :  { %v2534_v47 = vmul.f32 0.125, %v2533_v19  ;;  %v2542_v21 = vadd.f32 %v2541_v20, %v2540_v17  ;;  %4045 = vmatpush3.bf16.msra.mxu0 %v4044_v14  ;;  %v4047_v17 = vpack.c.bf16 %v3433_v61, %v3432_v4 }
 0x743   :  { %4046 = vmatprep.subr.bf16.mxu0 %v4439_v30 }
 0x744   :  { %v2543_v12 = vmul.f32 0.125, %v2542_v21  ;;  %v2544_v13 = vmul.f32 %v2534_v47, %v2534_v47 }
 0x746   :  { %v2545_v56 = vsub.f32 %v2543_v12, %v2544_v13  ;;  %4048 = vmatpush3.bf16.msra.mxu0 %v4047_v17 }
 0x747   :  { %4049 = vmatprep.subr.bf16.mxu0 %v4439_v30 }
 0x748   :  { %v2546_v23 = vadd.f32 1e-05, %v2545_v56 }
 0x74a   :  { %4140 = vrsqrt.f32 %v2546_v23 }
 0x754   :  { %v4141_v32 = vpop.eup %4140 }
 0x755   :  { %v2548_v34 = vmul.f32 %v4141_v32, %v2525_v18 }
 0x757   :  { %v2549_v41 = vmul.f32 %v2548_v34, %v2534_v47  ;;  %v2554_v37 = vrot.slane %v2548_v34, %v4792_v22 }
 0x759   :  { %v2550_v39 = vsub.f32 %v2526_v35, %v2549_v41  ;;  %v2555_v43 = vmul.f32 %v2554_v37, %v2520_v6  ;;  %v2853_v6 = vld [vmem:[#allocation20 + $0x58] sm:$0xff] }
 0x75a   :  { %v4041_v8 = vpack.c.bf16 %v2853_v6, %v2852_v24  ;;  %v3436_v24 = vld [vmem:[%s5191_s14 + $0x40] sm:$0xff]  ;;  %v3437_v6 = vld [vmem:[%s5191_s14 + $0x48] sm:$0xff] }
 0x75b   :  { %v2559_v25 = vrot.slane %v2550_v39, %v4792_v22 }
 0x75d   :  { %v2560_v46 = vadd.f32 %v2559_v25, %v2555_v43  ;;  %v2928_v43 = vld [vmem:[%s5193_s16] sm:$0x1] }
 0x75f   :  { %v2671_v49 = vadd.f32 %v2670_v44, %v2560_v46  ;;  %v2929_v46 = vld [vmem:[%s5193_s16 + $0x1] sm:$0x1] }
 0x761   :  { %v2672_v42 = vmax.f32 %v2671_v49, 0.0 }
 0x763   :  { %2673 = vst.msk [vmem:[#allocation2 + $0x8] sm:$0xff] %vm598_vm5, %v2672_v42 }
 0x76a   :  { %v2688_v55 = vld [vmem:[#allocation2 + $0x8] ss:$2 sm:$0xf]  ;;  %v2689_v63 = vld [vmem:[#allocation2 + $0x7] ss:$2 sm:$0xf] }
 0x76b   :  { %3835 = vmatmul.mubr.msk.f32.vlgmr.msra.gmra.mrb[10].mxu1 %vm598_vm5, %v2688_v55  ;;  %v2692_v7 = vsel %vm5046_vm13, 0.0, %v2689_v63  ;;  %v2693_v57 = vld [vmem:[#allocation2 + $0x9] ss:$2 sm:$0xf]  ;;  %v2976_v63 = vld [vmem:[%s5191_s14 + $0x18] sm:$0xff] }
 0x76c   :  { %4033 = vmatpush3.bf16.msra.mxu1 %v4032_v52  ;;  %3845 = vmatprep.mubr.msk.f32.mxu1 %vm4440_vm10, %v4441_v31 }
 0x76d   :  { %4034 = vmatprep.subr.bf16.mxu1 %v4439_v30 }
 0x770   :  { %4036 = vmatpush3.bf16.msra.mxu1 %v4035_v62  ;;  %v4050_v62 = vpack.c.bf16 %v2974_v54, %v2973_v53 }
 0x771   :  { %4037 = vmatprep.subr.bf16.mxu1 %v4439_v30 }
 0x773   :  { %3846 = vmatmul.mubr.msk.f32.vlgmr.msra.gmra.mrb[10].mxu1 %vm598_vm5, %v2692_v7  ;;  %v4056_v7 = vpack.c.bf16 %v3437_v6, %v3436_v24 }
 0x774   :  { %4039 = vmatpush3.bf16.msra.mxu1 %v4038_v0  ;;  %3856 = vmatprep.mubr.msk.f32.mxu1 %vm4440_vm10, %v4441_v31  ;;  %v4053_v0 = vpack.c.bf16 %v2976_v63, %v2975_v9 }
 0x775   :  { %4040 = vmatprep.subr.bf16.mxu1 %v4439_v30 }
 0x778   :  { %4042 = vmatpush3.bf16.msra.mxu1 %v4041_v8 }
 0x779   :  { %4061 = vmatprep.subr.bf16.mxu1 %v4439_v30 }
 0x77b   :  { %3857 = vmatmul.mubr.msk.f32.vlgmr.msra.gmra.mrb[10].mxu1 %vm598_vm5, %v2693_v57 }
 0x77c   :  { %4063 = vmatpush3.bf16.msra.mxu1 %v4062_v48  ;;  %3900 = vmatprep.mubr.msk.f32.mxu1 %vm4440_vm10, %v4441_v31 }
 0x77d   :  { %4064 = vmatprep.subr.bf16.mxu1 %v4439_v30 }
 0x780   :  { %4066 = vmatpush3.bf16.msra.mxu1 %v4065_v58 }
 0x783   :  { %3901 = vmatmul.mubr.msk.f32.vlgmr.msra.gmra.mrb[12].mxu1 %vm598_vm5, %v2688_v55 }
 0x84e   :  { %v2923_v19 = vpop.f32.mrb[10].mxu1 }
 0x84f   :  { %v2931_v20 = vsel %vm2930_vm14, %v2923_v19, 0.0  ;;  %v2939_v47 = vmul.f32 %v2923_v19, %v2923_v19  ;;  %v3858_v21 = vpop.f32.mrb[11].mxu1 }
 0x850   :  { %v2932_v12 = vrot.slane %v2931_v20, 4 }
 0x851   :  { %v2940_v13 = vsel %vm2930_vm14, %v2939_v47, 0.0 }
 0x852   :  { %v2933_v56 = vadd.f32 %v2932_v12, %v2931_v20  ;;  %v2941_v23 = vrot.slane %v2940_v13, 4 }
 0x854   :  { %v2934_v26 = vrot.slane %v2933_v56, 2  ;;  %v2942_v27 = vadd.f32 %v2941_v23, %v2940_v13 }
 0x856   :  { %v2935_v2 = vadd.f32 %v2934_v26, %v2933_v56  ;;  %v2943_v28 = vrot.slane %v2942_v27, 2  ;;  %v5091_v15 = vpop.f32.mrb[12].mxu1 }
 0x857   :  { %v3902_v18 = vpop.f32.mrb[13].mxu1  ;;  %v3319_v16 = vsel %vm2930_vm14, %v5091_v15, 0.0  ;;  %v3327_v58 = vmul.f32 %v5091_v15, %v5091_v15 }
 0x858   :  { %v2936_v32 = vrot.slane %v2935_v2, 1  ;;  %v2944_v33 = vadd.f32 %v2943_v28, %v2942_v27  ;;  %v3320_v11 = vrot.slane %v3319_v16, 4 }
 0x859   :  { %v3328_v29 = vsel %vm2930_vm14, %v3327_v58, 0.0 }
 0x85a   :  { %v2937_v34 = vadd.f32 %v2936_v32, %v2935_v2  ;;  %v2945_v35 = vrot.slane %v2944_v33, 1  ;;  %v3329_v14 = vrot.slane %v3328_v29, 4 }
 0x85c   :  { %v2938_v36 = vmul.f32 0.25, %v2937_v34  ;;  %v2946_v41 = vadd.f32 %v2945_v35, %v2944_v33  ;;  %v3330_v4 = vadd.f32 %v3329_v14, %v3328_v29 }
 0x85e   :  { %v2947_v37 = vmul.f32 0.25, %v2946_v41  ;;  %v2948_v38 = vmul.f32 %v2938_v36, %v2938_v36  ;;  %v3331_v59 = vrot.slane %v3330_v4, 2 }
 0x860   :  { %v2949_v39 = vsub.f32 %v2947_v37, %v2948_v38  ;;  %v3332_v17 = vadd.f32 %v3331_v59, %v3330_v4 }
 0x862   :  { %v2950_v40 = vadd.f32 1e-05, %v2949_v39  ;;  %v3333_v20 = vrot.slane %v3332_v17, 1 }
 0x864   :  { %4142 = vrsqrt.f32 %v2950_v40  ;;  %v3334_v21 = vadd.f32 %v3333_v20, %v3332_v17 }
 0x866   :  { %v3335_v12 = vmul.f32 0.25, %v3334_v21 }
 0x86e   :  { %v4143_v25 = vpop.eup %4142 }
 0x86f   :  { %v2952_v44 = vmul.f32 %v4143_v25, %v2928_v43 }
 0x871   :  { %v2953_v49 = vmul.f32 %v2952_v44, %v2938_v36  ;;  %v2958_v42 = vrot.slane %v2952_v44, %v4792_v22 }
 0x873   :  { %v2954_v50 = vsub.f32 %v2929_v46, %v2953_v49  ;;  %v2959_v51 = vmul.f32 %v2958_v42, %v2923_v19 }
 0x875   :  { %v2963_v52 = vrot.slane %v2954_v50, %v4792_v22 }
 0x877   :  { %v2964_v55 = vadd.f32 %v2963_v52, %v2959_v51  ;;  %v3317_v52 = vld [vmem:[%s5193_s16 + $0x4] sm:$0x1] }
 0x879   :  { %v2965_v60 = vmax.f32 %v2964_v55, 0.0  ;;  %v3318_v55 = vld [vmem:[%s5193_s16 + $0x5] sm:$0x1] }
 0x87b   :  { %2966 = vst.msk [vmem:[#allocation2 + $0x8] sm:$0xf] %vm2930_vm14, %v2965_v60  ;;  %3868 = vmatmul.mubr.msk.f32.vlgmr.msra.gmra.mrb[14].mxu0 %vm598_vm5, %v2965_v60 }
 0x87c   :  { %4051 = vmatpush3.bf16.msra.mxu0 %v4050_v62  ;;  %3878 = vmatprep.mubr.msk.f32.mxu0 %vm4440_vm10, %v4441_v31  ;;  %v3207_v62 = vld [vmem:[%s5193_s16 + $0x2] sm:$0x1] }
 0x87d   :  { %4052 = vmatprep.subr.bf16.mxu0 %v4439_v30 }
 0x880   :  { %4054 = vmatpush3.bf16.msra.mxu0 %v4053_v0  ;;  %v3208_v0 = vld [vmem:[%s5193_s16 + $0x3] sm:$0x1]  ;;  %s4390_s16 = scalar_lea.vmem %s3363_s19, 64 }
 0x881   :  { %4055 = vmatprep.subr.bf16.mxu0 %v4439_v30  ;;  %p4391_p4 = scmp.ne.s32.totalorder %s3363_s19, %s4390_s16  ;;  %p4396_p6 = scmp.lt.s32.totalorder %s4390_s16, %s4390_s16 }
 0x882   :  { %v2967_v8 = vld [vmem:[#allocation2 + $0x7] sm:$0xf] }
 0x883   :  { %v2968_v48 = vsel %vm5046_vm13, 0.0, %v2967_v8  ;;  %v2969_v10 = vld [vmem:[#allocation2 + $0x9] sm:$0xf]  ;;  %p4397_p7 = por %p4396_p6, %p4395_p5 }
 0x884   :  { %3879 = vmatmul.mubr.msk.f32.vlgmr.msra.gmra.mrb[14].mxu0 %vm598_vm5, %v2968_v48  ;;  %v2972_v57 = vsel %vm2687_vm15, 0.0, %v2969_v10 }
 0x885   :  { %4057 = vmatpush3.bf16.msra.mxu0 %v4056_v7  ;;  %3889 = vmatprep.mubr.msk.f32.mxu0 %vm4440_vm10, %v4441_v31  ;;  %v3321_v31 = vadd.f32 %v3320_v11, %v3319_v16  ;;  %p4398_p8 = pnand %p4397_p7, %p4391_p4 }
 0x886   :  { %4058 = vmatprep.subr.bf16.mxu0 %v4439_v30 }
 0x887   :  { %v3322_v30 = vrot.slane %v3321_v31, 2 }
 0x889   :  { %4060 = vmatpush3.bf16.msra.mxu0 %v4059_v45  ;;  %v3323_v1 = vadd.f32 %v3322_v30, %v3321_v31 }
 0x88b   :  { %v3324_v61 = vrot.slane %v3323_v1, 1 }
 0x88c   :  { %3890 = vmatmul.mubr.msk.f32.vlgmr.msra.gmra.mrb[14].mxu0 %vm598_vm5, %v2972_v57 }
 0x88d   :  { %v3325_v19 = vadd.f32 %v3324_v61, %v3323_v1 }
 0x88f   :  { %v3326_v47 = vmul.f32 0.25, %v3325_v19 }
 0x891   :  { %v3336_v13 = vmul.f32 %v3326_v47, %v3326_v47 }
 0x893   :  { %v3337_v18 = vsub.f32 %v3335_v12, %v3336_v13 }
 0x895   :  { %v3338_v36 = vadd.f32 1e-05, %v3337_v18 }
 0x897   :  { %4144 = vrsqrt.f32 %v3338_v36 }
 0x8a1   :  { %v4145_v51 = vpop.eup %4144 }
 0x8a2   :  { %v3340_v53 = vmul.f32 %v4145_v51, %v3317_v52 }
 0x8a4   :  { %v3341_v54 = vmul.f32 %v3340_v53, %v3326_v47  ;;  %v3346_v24 = vrot.slane %v3340_v53, %v4792_v22 }
 0x8a6   :  { %v3342_v9 = vsub.f32 %v3318_v55, %v3341_v54  ;;  %v3347_v3 = vmul.f32 %v3346_v24, %v5091_v15 }
 0x8a8   :  { %v3351_v8 = vrot.slane %v3342_v9, %v4792_v22 }
 0x8aa   :  { %v3352_v10 = vadd.f32 %v3351_v8, %v3347_v3 }
 0x95f   :  { %v3202_v56 = vpop.f32.mrb[14].mxu0 }
 0x960   :  { %v3209_v23 = vsel %vm2930_vm14, %v3202_v56, 0.0  ;;  %v3217_v26 = vmul.f32 %v3202_v56, %v3202_v56  ;;  %v3891_v27 = vpop.f32.mrb[15].mxu0 }
 0x961   :  { %v3210_v2 = vrot.slane %v3209_v23, 4 }
 0x962   :  { %v3218_v28 = vsel %vm2930_vm14, %v3217_v26, 0.0 }
 0x963   :  { %v3211_v32 = vadd.f32 %v3210_v2, %v3209_v23  ;;  %v3219_v33 = vrot.slane %v3218_v28, 4 }
 0x965   :  { %v3212_v34 = vrot.slane %v3211_v32, 2  ;;  %v3220_v35 = vadd.f32 %v3219_v33, %v3218_v28 }
 0x967   :  { %v3213_v41 = vadd.f32 %v3212_v34, %v3211_v32  ;;  %v3221_v37 = vrot.slane %v3220_v35, 2 }
 0x969   :  { %v3214_v38 = vrot.slane %v3213_v41, 1  ;;  %v3222_v39 = vadd.f32 %v3221_v37, %v3220_v35 }
 0x96b   :  { %v3215_v40 = vadd.f32 %v3214_v38, %v3213_v41  ;;  %v3223_v43 = vrot.slane %v3222_v39, 1 }
 0x96d   :  { %v3216_v25 = vmul.f32 0.25, %v3215_v40  ;;  %v3224_v44 = vadd.f32 %v3223_v43, %v3222_v39 }
 0x96f   :  { %v3225_v46 = vmul.f32 0.25, %v3224_v44  ;;  %v3226_v49 = vmul.f32 %v3216_v25, %v3216_v25 }
 0x971   :  { %v3227_v42 = vsub.f32 %v3225_v46, %v3226_v49 }
 0x973   :  { %v3228_v50 = vadd.f32 1e-05, %v3227_v42 }
 0x975   :  { %4146 = vrsqrt.f32 %v3228_v50 }
 0x97f   :  { %v4147_v60 = vpop.eup %4146 }
 0x980   :  { %v3230_v63 = vmul.f32 %v4147_v60, %v3207_v62 }
 0x982   :  { %v3231_v6 = vmul.f32 %v3230_v63, %v3216_v25  ;;  %v3236_v7 = vrot.slane %v3230_v63, %v4792_v22 }
 0x984   :  { %v3232_v5 = vsub.f32 %v3208_v0, %v3231_v6  ;;  %v3237_v48 = vmul.f32 %v3236_v7, %v3202_v56 }
 0x986   :  { %v3241_v45 = vrot.slane %v3232_v5, %v4792_v22 }
 0x988   :  { %v3242_v57 = vadd.f32 %v3241_v45, %v3237_v48 }
 0x98a   :  { %v3353_v16 = vadd.f32 %v3352_v10, %v3242_v57 }
 0x98c   :  { %v3354_v58 = vmax.f32 %v3353_v16, 0.0 }
 0x98e   :  { %3355 = vst.msk [vmem:[#allocation21] sm:$0xf] %vm2930_vm14, %v3354_v58 }
 0x98f   :  { %4401 = shalt.err (!%p4398_p8)
}
 0x990   :  { %s4402_s26 = scalar_lea.hbm %s5194_s17, 64 }
 0x991   :  { %p4403_p9 = scmp.ne.s32.totalorder %s5194_s17, %s4402_s26  ;;  %p4406_p10 = scmp.lt.u32.totalorder %s4402_s26, %s5194_s17 }
 0x993   :  { %p4408_p11 = pnand %p4406_p10, %p4403_p9 }
 0x995   :  { %4411 = shalt.err (!%p4408_p11)
}
 0x996   :  { %3365 = dma.vmem_to_hbm [thread:$0]  %s3363_s19, 64, %s5194_s17, [#allocation5]  }
 0x997   :  { %4424 = dma.done.wait [#allocation5], 64  }
 0x998   :  { %4425 = vsyncadd [#allocation5], 4294967232 }
 0x999   :  { %3369 = vsyncpa [#allocation4], 1 }
 0x99a   :  { %3370 = vsyncpa [#allocation7], 1 }
 0x99b   :  { %3371 = vsyncpa [#allocation10], 1 }
 0x99c   :  { %3372 = vsyncpa [#allocation13], 1 }
 0x99d   :  { %3373 = vsyncpa [#allocation16], 1 }
 0x99e   :  { %3374 = vsyncpa [#allocation19], 1 }
 0x99f   :  { %3375 = vsyncpa [#allocation5], 1 }

</bundles_post_ra>
